<compile_context>
chip_gen: v6e
topology: v6e:2x2x1
jax: 0.10.0
libtpu: 0.0.40
codegen_flags: <defaults>
</compile_context>

<pallas_src>
import jax
import jax.numpy as jnp
from jax.experimental import pallas as pl
from jax.experimental.pallas import tpu as pltpu

OBS_RADIUS = 4           # (2*obs_radius+1)^2 == 81 == 9*9 in the torch code
NUM_HEADS = 4
MESSAGE_DIM = 32         # per-head message dim -> MH = 128
POS_EMBED_DIM = 16
LN_EPS = 1e-5


# --------------------------------------------------------------------------
# Pallas kernel: request + reply CommLayer forward for a batch tile.
# --------------------------------------------------------------------------
def _comm_block_kernel(hidden_ref, pe_ref, mask_ref, mask_t_ref, head_ref,
                       # request-layer fused weights
                       g1_ref, be1_ref, wqkv1_ref, bqkv1_ref,
                       wga1_ref, wgx1_ref, bgru1_ref,
                       # reply-layer fused weights
                       g2_ref, be2_ref, wqkv2_ref, bqkv2_ref,
                       wga2_ref, wgx2_ref, bgru2_ref,
                       out_ref):
    BT, N, H = hidden_ref.shape
    MH = head_ref.shape[0]
    neg = jnp.finfo(jnp.float32).min

    P = head_ref[...]                    # (MH, MH) bf16 block-diagonal head matrix
    x0 = hidden_ref[...]                 # (BT, N, H) f32
    mask = mask_ref[...]                 # (BT, N, N) 1.0 where comm allowed
    mask_t = mask_t_ref[...]             # transposed mask (reply layer)

    def comm_layer(x, pe_k, pe_v, m, gamma, beta, wqkv, bqkv, wga, wgx, bgru):
        rows = x.reshape(BT * N, H)

        # ---- LayerNorm over feature axis (f32, VPU) ----
        mean = jnp.mean(rows, axis=-1, keepdims=True)
        var = jnp.mean((rows - mean) ** 2, axis=-1, keepdims=True)
        ln = (rows - mean) * jax.lax.rsqrt(var + LN_EPS)
        ln = ln * gamma + beta

        # ---- fused q|k|v projection: one (BT*N, H)@(H, 3MH) bf16 MXU op ----
        qkv = jnp.dot(ln.astype(wqkv.dtype), wqkv,
                      preferred_element_type=jnp.float32) + bqkv
        q = qkv[:, :MH].reshape(BT, N, MH)          # 1/sqrt(M) pre-folded
        kh = qkv[:, MH:2 * MH].reshape(BT, N, MH)   # carries bk + pos_bias@wkp
        vh = qkv[:, 2 * MH:].reshape(BT, N, MH)     # carries bv + pos_bias@wvp
        k = kh[:, :, None, :] + pe_k.astype(jnp.float32)   # (b, i, j, MH)
        v = vh[:, :, None, :] + pe_v.astype(jnp.float32)

        # ---- per-head scores, replicated over each head's lanes, via the
        #      block-diagonal P: one lane-dense bf16 (BT*N*N, MH)@(MH, MH) ----
        prod = (q[:, None, :, :] * k).astype(jnp.bfloat16)
        score = jnp.dot(prod.reshape(BT * N * N, MH), P,
                        preferred_element_type=jnp.float32)
        score = score.reshape(BT, N, N, MH)
        score = jnp.where(m[..., None] > 0.5, score, neg)

        # softmax over senders (axis 1) on the lane-dense slab (f32)
        smax = jnp.max(score, axis=1, keepdims=True)
        e = jnp.exp(score - smax)
        denom = jnp.sum(e, axis=1, keepdims=True)
        attn = e * pl.reciprocal(denom, approx=True)        # (b, i, j, MH)

        agg = jnp.sum(attn * v, axis=1)                      # (b, j, MH)
        # (head_agg Linear is folded into the GRU input weight in the wrapper)

        # ---- GRU: two accumulating bf16 MXU dots (no zero block, no concat)
        #      columns of gx: [r | z | n_sum_hid | gh_n], of ga: [r | z | n] ----
        ga = jnp.dot(agg.reshape(BT * N, MH).astype(wga.dtype), wga,
                     preferred_element_type=jnp.float32)          # (BT*N, 3H)
        gx = jnp.dot(rows.astype(wgx.dtype), wgx,
                     preferred_element_type=jnp.float32) + bgru    # (BT*N, 4H)
        r = jax.nn.sigmoid(ga[:, :H] + gx[:, :H])
        z = jax.nn.sigmoid(ga[:, H:2 * H] + gx[:, H:2 * H])
        n = jnp.tanh(ga[:, 2 * H:] + gx[:, 2 * H:3 * H] + (r - 1.0) * gx[:, 3 * H:])
        h_new = ((1.0 - z) * n + z * rows).reshape(BT, N, H)

        # Only receivers with at least one incoming message get updated.
        upd = jnp.max(m, axis=1)[:, :, None] > 0.5                # (BT, N, 1)
        return jnp.where(upd, h_new, x)

    # pre-projected position embeddings: [req_k | req_v | rep_k | rep_v]
    h1 = comm_layer(x0,
                    pe_ref[:, :, :, 0 * MH:1 * MH],
                    pe_ref[:, :, :, 1 * MH:2 * MH],
                    mask,
                    g1_ref[0], be1_ref[0], wqkv1_ref[...], bqkv1_ref[0],
                    wga1_ref[...], wgx1_ref[...], bgru1_ref[0])
    h2 = comm_layer(h1,
                    pe_ref[:, :, :, 2 * MH:3 * MH],
                    pe_ref[:, :, :, 3 * MH:4 * MH],
                    mask_t,
                    g2_ref[0], be2_ref[0], wqkv2_ref[...], bqkv2_ref[0],
                    wga2_ref[...], wgx2_ref[...], bgru2_ref[0])
    out_ref[...] = h2.astype(out_ref.dtype)


# --------------------------------------------------------------------------
# JAX glue
# --------------------------------------------------------------------------
def position_index(relative_pos):
    """relative_pos (B, N, N, 2) int -> flat one-hot index in [0, 81)."""
    rp = relative_pos.astype(jnp.int32)
    invalid = jnp.any(jnp.abs(rp) > OBS_RADIUS, axis=-1, keepdims=True)
    rp = jnp.where(invalid, 0, rp)
    rp = rp + OBS_RADIUS
    return rp[..., 0] + rp[..., 1] * 9


FUSED_LAYER_KEYS = ("gamma", "beta", "w_qkv", "b_qkv", "w_gru_a", "w_gru_x", "b_gru")


def prepare_comm_layer_params(p):
    """Fold/concat the raw (torch-layout) params of one CommLayer."""
    H, MH = p["wq"].shape
    M = MH // NUM_HEADS
    inv_sqrt_m = 1.0 / (M ** 0.5)
    # q | k | v projection fused; 1/sqrt(M) folded into the q columns/bias;
    # key/value biases absorb pos_bias @ w*p.
    w_qkv = jnp.concatenate([p["wq"] * inv_sqrt_m, p["wkh"], p["wvh"]], axis=1)
    b_qkv = jnp.concatenate([p["bq"][0] * inv_sqrt_m,
                             p["bk"][0] + p["pos_bias"] @ p["wkp"],
                             p["bv"][0] + p["pos_bias"] @ p["wvp"]])[None]   # (1, 3MH)
    # head_agg folded into the GRU input weight (exact: Linear o Linear).
    w_gru_a = p["wagg"] @ p["wih"]                                           # (MH, 3H)
    bih_f = p["bih"][0] + p["bagg"][0] @ p["wih"]                            # (3H,)
    whh, bhh = p["whh"], p["bhh"][0]
    # Hidden-side GRU weight: [W_hr | W_hz | W_hn | W_hn].  The extra copy of
    # W_hn carries the un-gated new-gate term so n = tanh(n_sum + (r-1)*gh_n)
    # reproduces the torch formula n = tanh(W_in x + b_in + r*(W_hn h + b_hn)).
    w_gru_x = jnp.concatenate([whh, whh[:, 2 * H:]], axis=1)                 # (H, 4H)
    b_gru = jnp.concatenate([bih_f[:2 * H] + bhh[:2 * H],
                             bih_f[2 * H:] + bhh[2 * H:],
                             bhh[2 * H:]])[None]                             # (1, 4H)
    return {
        "gamma": p["gamma"], "beta": p["beta"],
        "w_qkv": w_qkv.astype(jnp.bfloat16), "b_qkv": b_qkv,
        "w_gru_a": w_gru_a.astype(jnp.bfloat16),
        "w_gru_x": w_gru_x.astype(jnp.bfloat16), "b_gru": b_gru,
        "pos_k_tab": p["pos_table"] @ p["wkp"],      # (81, MH), proj folded in
        "pos_v_tab": p["pos_table"] @ p["wvp"],      # (81, MH)
    }


def prepare_comm_block_params(params):
    req = prepare_comm_layer_params(params["request"])
    rep = prepare_comm_layer_params(params["reply"])
    pe_table = jnp.concatenate([req.pop("pos_k_tab"), req.pop("pos_v_tab"),
                                rep.pop("pos_k_tab"), rep.pop("pos_v_tab")],
                               axis=1).astype(jnp.bfloat16)        # (81, 4*MH)
    # Block-diagonal head matrix P[m, m'] = 1 iff same head (exact in bf16).
    MH = NUM_HEADS * MESSAGE_DIM
    lane = jnp.arange(MH)
    head_mat = (lane[:, None] // MESSAGE_DIM
                == lane[None, :] // MESSAGE_DIM).astype(jnp.bfloat16)
    return {"pe_table": pe_table, "head_mat": head_mat,
            "request": req, "reply": rep}


def _default_batch_tile(batch):
    """Whole batch per step on single-TC chips; >=2 parallel steps on v7x."""
    try:
        kind = jax.devices()[0].device_kind.lower()
    except Exception:
        kind = ""
    if ("v7" in kind or "7x" in kind) and batch >= 2:
        tile = batch // 2          # keep both v7x TensorCores busy
    else:
        tile = batch               # v5e/v6e: one grid step, all rows per matmul
    while tile > 1 and batch % tile:
        tile -= 1
    return max(tile, 1)


def comm_block_apply(fused, latent, relative_pos, comm_mask, b_tile=None):
    B, N, H = latent.shape
    MH = NUM_HEADS * MESSAGE_DIM
    bt = _default_batch_tile(B) if b_tile is None else b_tile

    # One-hot @ Linear == embedding-table gather; projection is pre-folded
    # into the (bf16) table, so the gather directly yields lane-dense (…,4*MH).
    # TODO(synk): the integer gather itself is not expressed inside the Pallas kernel.
    idx = position_index(relative_pos)                       # (B, N, N)
    pe_all = fused["pe_table"][idx]                          # (B, N, N, 4*MH) bf16
    mask_f = comm_mask.astype(jnp.float32)
    mask_t = jnp.swapaxes(mask_f, 1, 2)                      # reply-layer mask (512 B)

    weights = ([fused["request"][k] for k in FUSED_LAYER_KEYS]
               + [fused["reply"][k] for k in FUSED_LAYER_KEYS])

    in_specs = [
        pl.BlockSpec((bt, N, H), lambda b: (b, 0, 0)),
        pl.BlockSpec((bt, N, N, 4 * MH), lambda b: (b, 0, 0, 0)),
        pl.BlockSpec((bt, N, N), lambda b: (b, 0, 0)),
        pl.BlockSpec((bt, N, N), lambda b: (b, 0, 0)),
        pl.BlockSpec((MH, MH), lambda b: (0, 0)),
    ]
    for w in weights:
        in_specs.append(pl.BlockSpec(w.shape, lambda b, nd=w.ndim: (0,) * nd))

    out = pl.pallas_call(
        _comm_block_kernel,
        grid=(B // bt,),
        in_specs=in_specs,
        out_specs=pl.BlockSpec((bt, N, H), lambda b: (b, 0, 0)),
        out_shape=jax.ShapeDtypeStruct((B, N, H), latent.dtype),
        compiler_params=pltpu.CompilerParams(dimension_semantics=("parallel",)),
    )(latent, pe_all, mask_f, mask_t, fused["head_mat"], *weights)

    # torch early-return "if sum(comm_mask)==0: return latent" -> branch-free.
    total = jnp.sum(comm_mask.astype(jnp.int32))
    return jnp.where(total > 0, out, latent)


# --------------------------------------------------------------------------
# Deterministic synthetic parameters (torch-style layout)
# --------------------------------------------------------------------------
def init_comm_layer_params(key, hidden_dim, pos_dim=POS_EMBED_DIM,
                           message_dim=MESSAGE_DIM, num_heads=NUM_HEADS):
    H, MH = hidden_dim, message_dim * num_heads
    ks = jax.random.split(key, 16)

    def w(k, shape, scale=0.05):
        return jax.random.normal(k, shape, jnp.float32) * scale

    return {
        "gamma": jnp.ones((1, H), jnp.float32),
        "beta": jnp.zeros((1, H), jnp.float32),
        "pos_table": w(ks[0], (81, pos_dim)),        # Linear(81, P) weight.T
        "pos_bias": w(ks[1], (pos_dim,)),
        "wq": w(ks[2], (H, MH)), "bq": w(ks[3], (1, MH)),
        "wkh": w(ks[4], (H, MH)), "wkp": w(ks[5], (pos_dim, MH)), "bk": w(ks[6], (1, MH)),
        "wvh": w(ks[7], (H, MH)), "wvp": w(ks[8], (pos_dim, MH)), "bv": w(ks[9], (1, MH)),
        "wagg": w(ks[10], (MH, MH)), "bagg": w(ks[11], (1, MH)),
        "wih": w(ks[12], (MH, 3 * H)), "bih": w(ks[13], (1, 3 * H)),
        "whh": w(ks[14], (H, 3 * H)), "bhh": w(ks[15], (1, 3 * H)),
    }


# --------------------------------------------------------------------------
# Pure-JAX f32 reference (mirrors the torch forward) for a correctness check
# --------------------------------------------------------------------------
def comm_layer_ref(p, hidden, relative_pos, comm_mask, num_heads=NUM_HEADS):
    B, N, H = hidden.shape
    MH = p["wq"].shape[1]
    M = MH // num_heads
    idx = position_index(relative_pos)
    pe = p["pos_table"][idx] + p["pos_bias"]
    x = hidden
    mean = x.mean(-1, keepdims=True)
    var = ((x - mean) ** 2).mean(-1, keepdims=True)
    ln = (x - mean) / jnp.sqrt(var + LN_EPS) * p["gamma"][0] + p["beta"][0]
    q = ln @ p["wq"] + p["bq"][0]
    k = (ln @ p["wkh"])[:, :, None, :] + jnp.einsum("bijp,pm->bijm", pe, p["wkp"]) + p["bk"][0]
    v = (ln @ p["wvh"])[:, :, None, :] + jnp.einsum("bijp,pm->bijm", pe, p["wvp"]) + p["bv"][0]
    q4 = q.reshape(B, N, num_heads, M)
    k4 = k.reshape(B, N, N, num_heads, M)
    v4 = v.reshape(B, N, N, num_heads, M)
    score = jnp.einsum("bjhm,bijhm->bijh", q4, k4) / (M ** 0.5)
    score = jnp.where(comm_mask[..., None], score, jnp.finfo(jnp.float32).min)
    attn = jax.nn.softmax(score, axis=1)
    agg = jnp.einsum("bijh,bijhm->bjhm", attn, v4).reshape(B, N, MH)
    agg = agg @ p["wagg"] + p["bagg"][0]
    gi = agg @ p["wih"] + p["bih"][0]
    gh = x @ p["whh"] + p["bhh"][0]
    r = jax.nn.sigmoid(gi[..., :H] + gh[..., :H])
    z = jax.nn.sigmoid(gi[..., H:2 * H] + gh[..., H:2 * H])
    n = jnp.tanh(gi[..., 2 * H:] + r * gh[..., 2 * H:])
    h_new = (1.0 - z) * n + z * x
    upd = jnp.any(comm_mask, axis=1)[..., None]
    return jnp.where(upd, h_new, x)


def comm_block_ref(params, latent, relative_pos, comm_mask):
    total = jnp.sum(comm_mask.astype(jnp.int32))
    h = comm_layer_ref(params["request"], latent, relative_pos, comm_mask)
    h = comm_layer_ref(params["reply"], h, relative_pos, jnp.swapaxes(comm_mask, 1, 2))
    return jnp.where(total > 0, h, latent)


# --------------------------------------------------------------------------
if __name__ == "__main__":
    B, N, H = 2, 8, 128   # batch, num_agents, hidden_dim

    key = jax.random.PRNGKey(0)
    k_lat, k_pos, k_mask, k_req, k_rep = jax.random.split(key, 5)

    latent = jax.random.normal(k_lat, (B, N, H), jnp.float32)
    relative_pos = jax.random.randint(k_pos, (B, N, N, 2), -6, 7, jnp.int32)
    comm_mask = jax.random.bernoulli(k_mask, 0.4, (B, N, N))

    params = {
        "request": init_comm_layer_params(k_req, H),
        "reply": init_comm_layer_params(k_rep, H),
    }
    fused = prepare_comm_block_params(params)

    out = comm_block_apply(fused, latent, relative_pos, comm_mask)
    out = jax.block_until_ready(out)

    ref = comm_block_ref(params, latent, relative_pos, comm_mask)
    err = float(jnp.max(jnp.abs(out - ref)))
    # bf16 MXU inputs / bf16 pe table (f32 accumulate everywhere) -> validate
    # against the f32 reference with a correspondingly looser tolerance.
    assert jnp.allclose(out, ref, rtol=5e-2, atol=5e-2), f"max abs err {err}"

    print("KERNEL_OK")
</pallas_src>

<mosaic_0001>
module attributes {stable_mosaic.version = 11 : i64} {
  func.func @_comm_block_kernel(%arg0: i32, %arg1: memref<2x8x128xf32, #tpu.memory_space<vmem>>, %arg2: memref<2x8x8x512xbf16, #tpu.memory_space<vmem>>, %arg3: memref<2x8x8xf32, #tpu.memory_space<vmem>>, %arg4: memref<2x8x8xf32, #tpu.memory_space<vmem>>, %arg5: memref<128x128xbf16, #tpu.memory_space<vmem>>, %arg6: memref<1x128xf32, #tpu.memory_space<vmem>>, %arg7: memref<1x128xf32, #tpu.memory_space<vmem>>, %arg8: memref<128x384xbf16, #tpu.memory_space<vmem>>, %arg9: memref<1x384xf32, #tpu.memory_space<vmem>>, %arg10: memref<128x384xbf16, #tpu.memory_space<vmem>>, %arg11: memref<128x512xbf16, #tpu.memory_space<vmem>>, %arg12: memref<1x512xf32, #tpu.memory_space<vmem>>, %arg13: memref<1x128xf32, #tpu.memory_space<vmem>>, %arg14: memref<1x128xf32, #tpu.memory_space<vmem>>, %arg15: memref<128x384xbf16, #tpu.memory_space<vmem>>, %arg16: memref<1x384xf32, #tpu.memory_space<vmem>>, %arg17: memref<128x384xbf16, #tpu.memory_space<vmem>>, %arg18: memref<128x512xbf16, #tpu.memory_space<vmem>>, %arg19: memref<1x512xf32, #tpu.memory_space<vmem>>, %arg20: memref<2x8x128xf32, #tpu.memory_space<vmem>>) attributes {dimension_semantics = [#tpu.dimension_semantics<parallel>], iteration_bounds = array<i64: 1>, scalar_prefetch = 0 : i64, scratch_operands = 0 : i64, tpu.core_type = #tpu.core_type<tc>, window_params = [{transform_indices = @transform_0, window_bounds = array<i64: 2, 8, 128>}, {transform_indices = @transform_1, window_bounds = array<i64: 2, 8, 8, 512>}, {transform_indices = @transform_2, window_bounds = array<i64: 2, 8, 8>}, {transform_indices = @transform_3, window_bounds = array<i64: 2, 8, 8>}, {pipeline_mode = #tpu.pipeline_mode<synchronous>, transform_indices = @transform_4, window_bounds = array<i64: 128, 128>}, {pipeline_mode = #tpu.pipeline_mode<synchronous>, transform_indices = @transform_5, window_bounds = array<i64: 1, 128>}, {pipeline_mode = #tpu.pipeline_mode<synchronous>, transform_indices = @transform_6, window_bounds = array<i64: 1, 128>}, {pipeline_mode = #tpu.pipeline_mode<synchronous>, transform_indices = @transform_7, window_bounds = array<i64: 128, 384>}, {pipeline_mode = #tpu.pipeline_mode<synchronous>, transform_indices = @transform_8, window_bounds = array<i64: 1, 384>}, {pipeline_mode = #tpu.pipeline_mode<synchronous>, transform_indices = @transform_9, window_bounds = array<i64: 128, 384>}, {pipeline_mode = #tpu.pipeline_mode<synchronous>, transform_indices = @transform_10, window_bounds = array<i64: 128, 512>}, {pipeline_mode = #tpu.pipeline_mode<synchronous>, transform_indices = @transform_11, window_bounds = array<i64: 1, 512>}, {pipeline_mode = #tpu.pipeline_mode<synchronous>, transform_indices = @transform_12, window_bounds = array<i64: 1, 128>}, {pipeline_mode = #tpu.pipeline_mode<synchronous>, transform_indices = @transform_13, window_bounds = array<i64: 1, 128>}, {pipeline_mode = #tpu.pipeline_mode<synchronous>, transform_indices = @transform_14, window_bounds = array<i64: 128, 384>}, {pipeline_mode = #tpu.pipeline_mode<synchronous>, transform_indices = @transform_15, window_bounds = array<i64: 1, 384>}, {pipeline_mode = #tpu.pipeline_mode<synchronous>, transform_indices = @transform_16, window_bounds = array<i64: 128, 384>}, {pipeline_mode = #tpu.pipeline_mode<synchronous>, transform_indices = @transform_17, window_bounds = array<i64: 128, 512>}, {pipeline_mode = #tpu.pipeline_mode<synchronous>, transform_indices = @transform_18, window_bounds = array<i64: 1, 512>}, {transform_indices = @transform_19, window_bounds = array<i64: 2, 8, 128>}]} {
    %c0 = arith.constant 0 : index
    %c0_0 = arith.constant 0 : index
    %0 = vector.load %arg5[%c0, %c0_0] : memref<128x128xbf16, #tpu.memory_space<vmem>>, vector<128x128xbf16>
    %c0_1 = arith.constant 0 : index
    %c0_2 = arith.constant 0 : index
    %c0_3 = arith.constant 0 : index
    %1 = vector.load %arg1[%c0_1, %c0_2, %c0_3] : memref<2x8x128xf32, #tpu.memory_space<vmem>>, vector<2x8x128xf32>
    %c0_4 = arith.constant 0 : index
    %c0_5 = arith.constant 0 : index
    %c0_6 = arith.constant 0 : index
    %2 = vector.load %arg3[%c0_4, %c0_5, %c0_6] : memref<2x8x8xf32, #tpu.memory_space<vmem>>, vector<2x8x8xf32>
    %c0_7 = arith.constant 0 : index
    %c0_8 = arith.constant 0 : index
    %c0_9 = arith.constant 0 : index
    %3 = vector.load %arg4[%c0_7, %c0_8, %c0_9] : memref<2x8x8xf32, #tpu.memory_space<vmem>>, vector<2x8x8xf32>
    %c0_10 = arith.constant 0 : index
    %c0_11 = arith.constant 0 : index
    %c0_12 = arith.constant 0 : index
    %c0_13 = arith.constant 0 : index
    %4 = vector.load %arg2[%c0_10, %c0_11, %c0_12, %c0_13] : memref<2x8x8x512xbf16, #tpu.memory_space<vmem>>, vector<2x8x8x128xbf16>
    %c0_14 = arith.constant 0 : index
    %c0_15 = arith.constant 0 : index
    %c0_16 = arith.constant 0 : index
    %c128 = arith.constant 128 : index
    %5 = vector.load %arg2[%c0_14, %c0_15, %c0_16, %c128] : memref<2x8x8x512xbf16, #tpu.memory_space<vmem>>, vector<2x8x8x128xbf16>
    %c0_17 = arith.constant 0 : index
    %c0_18 = arith.constant 0 : index
    %6 = vector.load %arg6[%c0_17, %c0_18] : memref<1x128xf32, #tpu.memory_space<vmem>>, vector<1x128xf32>
    %7 = vector.shape_cast %6 : vector<1x128xf32> to vector<128xf32>
    %c0_19 = arith.constant 0 : index
    %c0_20 = arith.constant 0 : index
    %8 = vector.load %arg7[%c0_19, %c0_20] : memref<1x128xf32, #tpu.memory_space<vmem>>, vector<1x128xf32>
    %9 = vector.shape_cast %8 : vector<1x128xf32> to vector<128xf32>
    %c0_21 = arith.constant 0 : index
    %c0_22 = arith.constant 0 : index
    %10 = vector.load %arg8[%c0_21, %c0_22] : memref<128x384xbf16, #tpu.memory_space<vmem>>, vector<128x384xbf16>
    %c0_23 = arith.constant 0 : index
    %c0_24 = arith.constant 0 : index
    %11 = vector.load %arg9[%c0_23, %c0_24] : memref<1x384xf32, #tpu.memory_space<vmem>>, vector<1x384xf32>
    %12 = vector.shape_cast %11 : vector<1x384xf32> to vector<384xf32>
    %c0_25 = arith.constant 0 : index
    %c0_26 = arith.constant 0 : index
    %13 = vector.load %arg10[%c0_25, %c0_26] : memref<128x384xbf16, #tpu.memory_space<vmem>>, vector<128x384xbf16>
    %c0_27 = arith.constant 0 : index
    %c0_28 = arith.constant 0 : index
    %14 = vector.load %arg11[%c0_27, %c0_28] : memref<128x512xbf16, #tpu.memory_space<vmem>>, vector<128x512xbf16>
    %c0_29 = arith.constant 0 : index
    %c0_30 = arith.constant 0 : index
    %15 = vector.load %arg12[%c0_29, %c0_30] : memref<1x512xf32, #tpu.memory_space<vmem>>, vector<1x512xf32>
    %16 = vector.shape_cast %15 : vector<1x512xf32> to vector<512xf32>
    %17 = vector.shape_cast %1 : vector<2x8x128xf32> to vector<16x128xf32>
    %cst = arith.constant dense<0.000000e+00> : vector<16xf32>
    %18 = vector.multi_reduction <add>, %17, %cst [1] : vector<16x128xf32> to vector<16xf32>
    %19 = vector.shape_cast %18 : vector<16xf32> to vector<16x1xf32>
    %cst_31 = arith.constant 1.280000e+02 : f32
    %20 = vector.broadcast %cst_31 : f32 to vector<16x1xf32>
    %21 = arith.divf %19, %20 : vector<16x1xf32>
    %22 = vector.broadcast %21 : vector<16x1xf32> to vector<16x128xf32>
    %23 = arith.subf %17, %22 : vector<16x128xf32>
    %24 = arith.mulf %23, %23 : vector<16x128xf32>
    %cst_32 = arith.constant dense<0.000000e+00> : vector<16xf32>
    %25 = vector.multi_reduction <add>, %24, %cst_32 [1] : vector<16x128xf32> to vector<16xf32>
    %26 = vector.shape_cast %25 : vector<16xf32> to vector<16x1xf32>
    %cst_33 = arith.constant 1.280000e+02 : f32
    %27 = vector.broadcast %cst_33 : f32 to vector<16x1xf32>
    %28 = arith.divf %26, %27 : vector<16x1xf32>
    %29 = vector.broadcast %21 : vector<16x1xf32> to vector<16x128xf32>
    %30 = arith.subf %17, %29 : vector<16x128xf32>
    %cst_34 = arith.constant 9.99999974E-6 : f32
    %31 = vector.broadcast %cst_34 : f32 to vector<16x1xf32>
    %32 = arith.addf %28, %31 : vector<16x1xf32>
    %33 = math.rsqrt %32 : vector<16x1xf32>
    %34 = vector.broadcast %33 : vector<16x1xf32> to vector<16x128xf32>
    %35 = arith.mulf %30, %34 : vector<16x128xf32>
    %36 = vector.shape_cast %7 : vector<128xf32> to vector<1x128xf32>
    %37 = vector.broadcast %36 : vector<1x128xf32> to vector<16x128xf32>
    %38 = arith.mulf %35, %37 : vector<16x128xf32>
    %39 = vector.shape_cast %9 : vector<128xf32> to vector<1x128xf32>
    %40 = vector.broadcast %39 : vector<1x128xf32> to vector<16x128xf32>
    %41 = arith.addf %38, %40 : vector<16x128xf32>
    %42 = arith.truncf %41 : vector<16x128xf32> to vector<16x128xbf16>
    %cst_35 = arith.constant dense<0.000000e+00> : vector<16x384xf32>
    %43 = tpu.matmul %42, %10, %cst_35 {dimension_numbers = #tpu.dot_dimension_numbers<[1], [0], [0], [1], [0, 0, 1, 1], [], []>} : vector<16x128xbf16>, vector<128x384xbf16>, vector<16x384xf32> -> vector<16x384xf32>
    %44 = vector.shape_cast %12 : vector<384xf32> to vector<1x384xf32>
    %45 = vector.broadcast %44 : vector<1x384xf32> to vector<16x384xf32>
    %46 = arith.addf %43, %45 : vector<16x384xf32>
    %47 = vector.extract_strided_slice %46 {offsets = [0, 0], sizes = [16, 128], strides = [1, 1]} : vector<16x384xf32> to vector<16x128xf32>
    %48 = vector.shape_cast %47 : vector<16x128xf32> to vector<2x8x128xf32>
    %49 = vector.extract_strided_slice %46 {offsets = [0, 128], sizes = [16, 128], strides = [1, 1]} : vector<16x384xf32> to vector<16x128xf32>
    %50 = vector.shape_cast %49 : vector<16x128xf32> to vector<2x8x128xf32>
    %51 = vector.extract_strided_slice %46 {offsets = [0, 256], sizes = [16, 128], strides = [1, 1]} : vector<16x384xf32> to vector<16x128xf32>
    %52 = vector.shape_cast %51 : vector<16x128xf32> to vector<2x8x128xf32>
    %53 = vector.shape_cast %50 : vector<2x8x128xf32> to vector<2x8x1x128xf32>
    %54 = arith.extf %4 : vector<2x8x8x128xbf16> to vector<2x8x8x128xf32>
    %55 = vector.broadcast %53 : vector<2x8x1x128xf32> to vector<2x8x8x128xf32>
    %56 = arith.addf %55, %54 : vector<2x8x8x128xf32>
    %57 = vector.shape_cast %52 : vector<2x8x128xf32> to vector<2x8x1x128xf32>
    %58 = arith.extf %5 : vector<2x8x8x128xbf16> to vector<2x8x8x128xf32>
    %59 = vector.broadcast %57 : vector<2x8x1x128xf32> to vector<2x8x8x128xf32>
    %60 = arith.addf %59, %58 : vector<2x8x8x128xf32>
    %61 = vector.shape_cast %48 : vector<2x8x128xf32> to vector<2x1x8x128xf32>
    %62 = vector.broadcast %61 : vector<2x1x8x128xf32> to vector<2x8x8x128xf32>
    %63 = arith.mulf %62, %56 : vector<2x8x8x128xf32>
    %64 = arith.truncf %63 : vector<2x8x8x128xf32> to vector<2x8x8x128xbf16>
    %65 = vector.shape_cast %64 : vector<2x8x8x128xbf16> to vector<128x128xbf16>
    %cst_36 = arith.constant dense<0.000000e+00> : vector<128x128xf32>
    %66 = tpu.matmul %65, %0, %cst_36 {dimension_numbers = #tpu.dot_dimension_numbers<[1], [0], [0], [1], [0, 0, 1, 1], [], []>} : vector<128x128xbf16>, vector<128x128xbf16>, vector<128x128xf32> -> vector<128x128xf32>
    %67 = vector.shape_cast %66 : vector<128x128xf32> to vector<2x8x8x128xf32>
    %68 = vector.shape_cast %2 : vector<2x8x8xf32> to vector<2x8x8x1xf32>
    %cst_37 = arith.constant 5.000000e-01 : f32
    %69 = vector.broadcast %cst_37 : f32 to vector<2x8x8x1xf32>
    %70 = arith.cmpf ogt, %68, %69 : vector<2x8x8x1xf32>
    %cst_38 = arith.constant -3.40282347E+38 : f32
    %71 = vector.shape_cast %70 : vector<2x8x8x1xi1> to vector<2x8x8x1xi1>
    %72 = vector.broadcast %71 : vector<2x8x8x1xi1> to vector<2x8x8x128xi1>
    %73 = vector.broadcast %cst_38 : f32 to vector<2x8x8x128xf32>
    %74 = arith.select %72, %67, %73 : vector<2x8x8x128xi1>, vector<2x8x8x128xf32>
    %cst_39 = arith.constant dense<0xFF800000> : vector<2x8x128xf32>
    %75 = vector.multi_reduction <maximumf>, %74, %cst_39 [1] : vector<2x8x8x128xf32> to vector<2x8x128xf32>
    %76 = vector.shape_cast %75 : vector<2x8x128xf32> to vector<2x1x8x128xf32>
    %77 = vector.broadcast %76 : vector<2x1x8x128xf32> to vector<2x8x8x128xf32>
    %78 = arith.subf %74, %77 : vector<2x8x8x128xf32>
    %79 = math.exp %78 : vector<2x8x8x128xf32>
    %cst_40 = arith.constant dense<0.000000e+00> : vector<2x8x128xf32>
    %80 = vector.multi_reduction <add>, %79, %cst_40 [1] : vector<2x8x8x128xf32> to vector<2x8x128xf32>
    %81 = vector.shape_cast %80 : vector<2x8x128xf32> to vector<2x1x8x128xf32>
    %82 = tpu.reciprocal %81 {approx = true} : vector<2x1x8x128xf32> -> vector<2x1x8x128xf32>
    %83 = vector.broadcast %82 : vector<2x1x8x128xf32> to vector<2x8x8x128xf32>
    %84 = arith.mulf %79, %83 : vector<2x8x8x128xf32>
    %85 = arith.mulf %84, %60 : vector<2x8x8x128xf32>
    %cst_41 = arith.constant dense<0.000000e+00> : vector<2x8x128xf32>
    %86 = vector.multi_reduction <add>, %85, %cst_41 [1] : vector<2x8x8x128xf32> to vector<2x8x128xf32>
    %87 = vector.shape_cast %86 : vector<2x8x128xf32> to vector<16x128xf32>
    %88 = arith.truncf %87 : vector<16x128xf32> to vector<16x128xbf16>
    %cst_42 = arith.constant dense<0.000000e+00> : vector<16x384xf32>
    %89 = tpu.matmul %88, %13, %cst_42 {dimension_numbers = #tpu.dot_dimension_numbers<[1], [0], [0], [1], [0, 0, 1, 1], [], []>} : vector<16x128xbf16>, vector<128x384xbf16>, vector<16x384xf32> -> vector<16x384xf32>
    %90 = arith.truncf %17 : vector<16x128xf32> to vector<16x128xbf16>
    %cst_43 = arith.constant dense<0.000000e+00> : vector<16x512xf32>
    %91 = tpu.matmul %90, %14, %cst_43 {dimension_numbers = #tpu.dot_dimension_numbers<[1], [0], [0], [1], [0, 0, 1, 1], [], []>} : vector<16x128xbf16>, vector<128x512xbf16>, vector<16x512xf32> -> vector<16x512xf32>
    %92 = vector.shape_cast %16 : vector<512xf32> to vector<1x512xf32>
    %93 = vector.broadcast %92 : vector<1x512xf32> to vector<16x512xf32>
    %94 = arith.addf %91, %93 : vector<16x512xf32>
    %95 = vector.extract_strided_slice %89 {offsets = [0, 0], sizes = [16, 128], strides = [1, 1]} : vector<16x384xf32> to vector<16x128xf32>
    %96 = vector.extract_strided_slice %94 {offsets = [0, 0], sizes = [16, 128], strides = [1, 1]} : vector<16x512xf32> to vector<16x128xf32>
    %97 = arith.addf %95, %96 : vector<16x128xf32>
    %98 = arith.negf %97 : vector<16x128xf32>
    %99 = math.exp %98 : vector<16x128xf32>
    %cst_44 = arith.constant 1.000000e+00 : f32
    %100 = vector.broadcast %cst_44 : f32 to vector<16x128xf32>
    %101 = arith.addf %100, %99 : vector<16x128xf32>
    %102 = arith.divf %100, %101 : vector<16x128xf32>
    %103 = vector.extract_strided_slice %89 {offsets = [0, 128], sizes = [16, 128], strides = [1, 1]} : vector<16x384xf32> to vector<16x128xf32>
    %104 = vector.extract_strided_slice %94 {offsets = [0, 128], sizes = [16, 128], strides = [1, 1]} : vector<16x512xf32> to vector<16x128xf32>
    %105 = arith.addf %103, %104 : vector<16x128xf32>
    %106 = arith.negf %105 : vector<16x128xf32>
    %107 = math.exp %106 : vector<16x128xf32>
    %cst_45 = arith.constant 1.000000e+00 : f32
    %108 = vector.broadcast %cst_45 : f32 to vector<16x128xf32>
    %109 = arith.addf %108, %107 : vector<16x128xf32>
    %110 = arith.divf %108, %109 : vector<16x128xf32>
    %111 = vector.extract_strided_slice %89 {offsets = [0, 256], sizes = [16, 128], strides = [1, 1]} : vector<16x384xf32> to vector<16x128xf32>
    %112 = vector.extract_strided_slice %94 {offsets = [0, 256], sizes = [16, 128], strides = [1, 1]} : vector<16x512xf32> to vector<16x128xf32>
    %113 = arith.addf %111, %112 : vector<16x128xf32>
    %cst_46 = arith.constant 1.000000e+00 : f32
    %114 = vector.broadcast %cst_46 : f32 to vector<16x128xf32>
    %115 = arith.subf %102, %114 : vector<16x128xf32>
    %116 = vector.extract_strided_slice %94 {offsets = [0, 384], sizes = [16, 128], strides = [1, 1]} : vector<16x512xf32> to vector<16x128xf32>
    %117 = arith.mulf %115, %116 : vector<16x128xf32>
    %118 = arith.addf %113, %117 : vector<16x128xf32>
    %119 = math.tanh %118 : vector<16x128xf32>
    %cst_47 = arith.constant 1.000000e+00 : f32
    %120 = vector.broadcast %cst_47 : f32 to vector<16x128xf32>
    %121 = arith.subf %120, %110 : vector<16x128xf32>
    %122 = arith.mulf %121, %119 : vector<16x128xf32>
    %123 = arith.mulf %110, %17 : vector<16x128xf32>
    %124 = arith.addf %122, %123 : vector<16x128xf32>
    %125 = vector.shape_cast %124 : vector<16x128xf32> to vector<2x8x128xf32>
    %cst_48 = arith.constant dense<0xFF800000> : vector<2x8xf32>
    %126 = vector.multi_reduction <maximumf>, %2, %cst_48 [1] : vector<2x8x8xf32> to vector<2x8xf32>
    %127 = vector.shape_cast %126 : vector<2x8xf32> to vector<2x8x1xf32>
    %cst_49 = arith.constant 5.000000e-01 : f32
    %128 = vector.broadcast %cst_49 : f32 to vector<2x8x1xf32>
    %129 = arith.cmpf ogt, %127, %128 : vector<2x8x1xf32>
    %130 = vector.shape_cast %129 : vector<2x8x1xi1> to vector<2x8x1xi1>
    %131 = vector.broadcast %130 : vector<2x8x1xi1> to vector<2x8x128xi1>
    %132 = arith.select %131, %125, %1 : vector<2x8x128xi1>, vector<2x8x128xf32>
    %c0_50 = arith.constant 0 : index
    %c0_51 = arith.constant 0 : index
    %c0_52 = arith.constant 0 : index
    %c256 = arith.constant 256 : index
    %133 = vector.load %arg2[%c0_50, %c0_51, %c0_52, %c256] : memref<2x8x8x512xbf16, #tpu.memory_space<vmem>>, vector<2x8x8x128xbf16>
    %c0_53 = arith.constant 0 : index
    %c0_54 = arith.constant 0 : index
    %c0_55 = arith.constant 0 : index
    %c384 = arith.constant 384 : index
    %134 = vector.load %arg2[%c0_53, %c0_54, %c0_55, %c384] : memref<2x8x8x512xbf16, #tpu.memory_space<vmem>>, vector<2x8x8x128xbf16>
    %c0_56 = arith.constant 0 : index
    %c0_57 = arith.constant 0 : index
    %135 = vector.load %arg13[%c0_56, %c0_57] : memref<1x128xf32, #tpu.memory_space<vmem>>, vector<1x128xf32>
    %136 = vector.shape_cast %135 : vector<1x128xf32> to vector<128xf32>
    %c0_58 = arith.constant 0 : index
    %c0_59 = arith.constant 0 : index
    %137 = vector.load %arg14[%c0_58, %c0_59] : memref<1x128xf32, #tpu.memory_space<vmem>>, vector<1x128xf32>
    %138 = vector.shape_cast %137 : vector<1x128xf32> to vector<128xf32>
    %c0_60 = arith.constant 0 : index
    %c0_61 = arith.constant 0 : index
    %139 = vector.load %arg15[%c0_60, %c0_61] : memref<128x384xbf16, #tpu.memory_space<vmem>>, vector<128x384xbf16>
    %c0_62 = arith.constant 0 : index
    %c0_63 = arith.constant 0 : index
    %140 = vector.load %arg16[%c0_62, %c0_63] : memref<1x384xf32, #tpu.memory_space<vmem>>, vector<1x384xf32>
    %141 = vector.shape_cast %140 : vector<1x384xf32> to vector<384xf32>
    %c0_64 = arith.constant 0 : index
    %c0_65 = arith.constant 0 : index
    %142 = vector.load %arg17[%c0_64, %c0_65] : memref<128x384xbf16, #tpu.memory_space<vmem>>, vector<128x384xbf16>
    %c0_66 = arith.constant 0 : index
    %c0_67 = arith.constant 0 : index
    %143 = vector.load %arg18[%c0_66, %c0_67] : memref<128x512xbf16, #tpu.memory_space<vmem>>, vector<128x512xbf16>
    %c0_68 = arith.constant 0 : index
    %c0_69 = arith.constant 0 : index
    %144 = vector.load %arg19[%c0_68, %c0_69] : memref<1x512xf32, #tpu.memory_space<vmem>>, vector<1x512xf32>
    %145 = vector.shape_cast %144 : vector<1x512xf32> to vector<512xf32>
    %146 = vector.shape_cast %132 : vector<2x8x128xf32> to vector<16x128xf32>
    %cst_70 = arith.constant dense<0.000000e+00> : vector<16xf32>
    %147 = vector.multi_reduction <add>, %146, %cst_70 [1] : vector<16x128xf32> to vector<16xf32>
    %148 = vector.shape_cast %147 : vector<16xf32> to vector<16x1xf32>
    %cst_71 = arith.constant 1.280000e+02 : f32
    %149 = vector.broadcast %cst_71 : f32 to vector<16x1xf32>
    %150 = arith.divf %148, %149 : vector<16x1xf32>
    %151 = vector.broadcast %150 : vector<16x1xf32> to vector<16x128xf32>
    %152 = arith.subf %146, %151 : vector<16x128xf32>
    %153 = arith.mulf %152, %152 : vector<16x128xf32>
    %cst_72 = arith.constant dense<0.000000e+00> : vector<16xf32>
    %154 = vector.multi_reduction <add>, %153, %cst_72 [1] : vector<16x128xf32> to vector<16xf32>
    %155 = vector.shape_cast %154 : vector<16xf32> to vector<16x1xf32>
    %cst_73 = arith.constant 1.280000e+02 : f32
    %156 = vector.broadcast %cst_73 : f32 to vector<16x1xf32>
    %157 = arith.divf %155, %156 : vector<16x1xf32>
    %158 = vector.broadcast %150 : vector<16x1xf32> to vector<16x128xf32>
    %159 = arith.subf %146, %158 : vector<16x128xf32>
    %cst_74 = arith.constant 9.99999974E-6 : f32
    %160 = vector.broadcast %cst_74 : f32 to vector<16x1xf32>
    %161 = arith.addf %157, %160 : vector<16x1xf32>
    %162 = math.rsqrt %161 : vector<16x1xf32>
    %163 = vector.broadcast %162 : vector<16x1xf32> to vector<16x128xf32>
    %164 = arith.mulf %159, %163 : vector<16x128xf32>
    %165 = vector.shape_cast %136 : vector<128xf32> to vector<1x128xf32>
    %166 = vector.broadcast %165 : vector<1x128xf32> to vector<16x128xf32>
    %167 = arith.mulf %164, %166 : vector<16x128xf32>
    %168 = vector.shape_cast %138 : vector<128xf32> to vector<1x128xf32>
    %169 = vector.broadcast %168 : vector<1x128xf32> to vector<16x128xf32>
    %170 = arith.addf %167, %169 : vector<16x128xf32>
    %171 = arith.truncf %170 : vector<16x128xf32> to vector<16x128xbf16>
    %cst_75 = arith.constant dense<0.000000e+00> : vector<16x384xf32>
    %172 = tpu.matmul %171, %139, %cst_75 {dimension_numbers = #tpu.dot_dimension_numbers<[1], [0], [0], [1], [0, 0, 1, 1], [], []>} : vector<16x128xbf16>, vector<128x384xbf16>, vector<16x384xf32> -> vector<16x384xf32>
    %173 = vector.shape_cast %141 : vector<384xf32> to vector<1x384xf32>
    %174 = vector.broadcast %173 : vector<1x384xf32> to vector<16x384xf32>
    %175 = arith.addf %172, %174 : vector<16x384xf32>
    %176 = vector.extract_strided_slice %175 {offsets = [0, 0], sizes = [16, 128], strides = [1, 1]} : vector<16x384xf32> to vector<16x128xf32>
    %177 = vector.shape_cast %176 : vector<16x128xf32> to vector<2x8x128xf32>
    %178 = vector.extract_strided_slice %175 {offsets = [0, 128], sizes = [16, 128], strides = [1, 1]} : vector<16x384xf32> to vector<16x128xf32>
    %179 = vector.shape_cast %178 : vector<16x128xf32> to vector<2x8x128xf32>
    %180 = vector.extract_strided_slice %175 {offsets = [0, 256], sizes = [16, 128], strides = [1, 1]} : vector<16x384xf32> to vector<16x128xf32>
    %181 = vector.shape_cast %180 : vector<16x128xf32> to vector<2x8x128xf32>
    %182 = vector.shape_cast %179 : vector<2x8x128xf32> to vector<2x8x1x128xf32>
    %183 = arith.extf %133 : vector<2x8x8x128xbf16> to vector<2x8x8x128xf32>
    %184 = vector.broadcast %182 : vector<2x8x1x128xf32> to vector<2x8x8x128xf32>
    %185 = arith.addf %184, %183 : vector<2x8x8x128xf32>
    %186 = vector.shape_cast %181 : vector<2x8x128xf32> to vector<2x8x1x128xf32>
    %187 = arith.extf %134 : vector<2x8x8x128xbf16> to vector<2x8x8x128xf32>
    %188 = vector.broadcast %186 : vector<2x8x1x128xf32> to vector<2x8x8x128xf32>
    %189 = arith.addf %188, %187 : vector<2x8x8x128xf32>
    %190 = vector.shape_cast %177 : vector<2x8x128xf32> to vector<2x1x8x128xf32>
    %191 = vector.broadcast %190 : vector<2x1x8x128xf32> to vector<2x8x8x128xf32>
    %192 = arith.mulf %191, %185 : vector<2x8x8x128xf32>
    %193 = arith.truncf %192 : vector<2x8x8x128xf32> to vector<2x8x8x128xbf16>
    %194 = vector.shape_cast %193 : vector<2x8x8x128xbf16> to vector<128x128xbf16>
    %cst_76 = arith.constant dense<0.000000e+00> : vector<128x128xf32>
    %195 = tpu.matmul %194, %0, %cst_76 {dimension_numbers = #tpu.dot_dimension_numbers<[1], [0], [0], [1], [0, 0, 1, 1], [], []>} : vector<128x128xbf16>, vector<128x128xbf16>, vector<128x128xf32> -> vector<128x128xf32>
    %196 = vector.shape_cast %195 : vector<128x128xf32> to vector<2x8x8x128xf32>
    %197 = vector.shape_cast %3 : vector<2x8x8xf32> to vector<2x8x8x1xf32>
    %cst_77 = arith.constant 5.000000e-01 : f32
    %198 = vector.broadcast %cst_77 : f32 to vector<2x8x8x1xf32>
    %199 = arith.cmpf ogt, %197, %198 : vector<2x8x8x1xf32>
    %cst_78 = arith.constant -3.40282347E+38 : f32
    %200 = vector.shape_cast %199 : vector<2x8x8x1xi1> to vector<2x8x8x1xi1>
    %201 = vector.broadcast %200 : vector<2x8x8x1xi1> to vector<2x8x8x128xi1>
    %202 = vector.broadcast %cst_78 : f32 to vector<2x8x8x128xf32>
    %203 = arith.select %201, %196, %202 : vector<2x8x8x128xi1>, vector<2x8x8x128xf32>
    %cst_79 = arith.constant dense<0xFF800000> : vector<2x8x128xf32>
    %204 = vector.multi_reduction <maximumf>, %203, %cst_79 [1] : vector<2x8x8x128xf32> to vector<2x8x128xf32>
    %205 = vector.shape_cast %204 : vector<2x8x128xf32> to vector<2x1x8x128xf32>
    %206 = vector.broadcast %205 : vector<2x1x8x128xf32> to vector<2x8x8x128xf32>
    %207 = arith.subf %203, %206 : vector<2x8x8x128xf32>
    %208 = math.exp %207 : vector<2x8x8x128xf32>
    %cst_80 = arith.constant dense<0.000000e+00> : vector<2x8x128xf32>
    %209 = vector.multi_reduction <add>, %208, %cst_80 [1] : vector<2x8x8x128xf32> to vector<2x8x128xf32>
    %210 = vector.shape_cast %209 : vector<2x8x128xf32> to vector<2x1x8x128xf32>
    %211 = tpu.reciprocal %210 {approx = true} : vector<2x1x8x128xf32> -> vector<2x1x8x128xf32>
    %212 = vector.broadcast %211 : vector<2x1x8x128xf32> to vector<2x8x8x128xf32>
    %213 = arith.mulf %208, %212 : vector<2x8x8x128xf32>
    %214 = arith.mulf %213, %189 : vector<2x8x8x128xf32>
    %cst_81 = arith.constant dense<0.000000e+00> : vector<2x8x128xf32>
    %215 = vector.multi_reduction <add>, %214, %cst_81 [1] : vector<2x8x8x128xf32> to vector<2x8x128xf32>
    %216 = vector.shape_cast %215 : vector<2x8x128xf32> to vector<16x128xf32>
    %217 = arith.truncf %216 : vector<16x128xf32> to vector<16x128xbf16>
    %cst_82 = arith.constant dense<0.000000e+00> : vector<16x384xf32>
    %218 = tpu.matmul %217, %142, %cst_82 {dimension_numbers = #tpu.dot_dimension_numbers<[1], [0], [0], [1], [0, 0, 1, 1], [], []>} : vector<16x128xbf16>, vector<128x384xbf16>, vector<16x384xf32> -> vector<16x384xf32>
    %219 = arith.truncf %146 : vector<16x128xf32> to vector<16x128xbf16>
    %cst_83 = arith.constant dense<0.000000e+00> : vector<16x512xf32>
    %220 = tpu.matmul %219, %143, %cst_83 {dimension_numbers = #tpu.dot_dimension_numbers<[1], [0], [0], [1], [0, 0, 1, 1], [], []>} : vector<16x128xbf16>, vector<128x512xbf16>, vector<16x512xf32> -> vector<16x512xf32>
    %221 = vector.shape_cast %145 : vector<512xf32> to vector<1x512xf32>
    %222 = vector.broadcast %221 : vector<1x512xf32> to vector<16x512xf32>
    %223 = arith.addf %220, %222 : vector<16x512xf32>
    %224 = vector.extract_strided_slice %218 {offsets = [0, 0], sizes = [16, 128], strides = [1, 1]} : vector<16x384xf32> to vector<16x128xf32>
    %225 = vector.extract_strided_slice %223 {offsets = [0, 0], sizes = [16, 128], strides = [1, 1]} : vector<16x512xf32> to vector<16x128xf32>
    %226 = arith.addf %224, %225 : vector<16x128xf32>
    %227 = arith.negf %226 : vector<16x128xf32>
    %228 = math.exp %227 : vector<16x128xf32>
    %cst_84 = arith.constant 1.000000e+00 : f32
    %229 = vector.broadcast %cst_84 : f32 to vector<16x128xf32>
    %230 = arith.addf %229, %228 : vector<16x128xf32>
    %231 = arith.divf %229, %230 : vector<16x128xf32>
    %232 = vector.extract_strided_slice %218 {offsets = [0, 128], sizes = [16, 128], strides = [1, 1]} : vector<16x384xf32> to vector<16x128xf32>
    %233 = vector.extract_strided_slice %223 {offsets = [0, 128], sizes = [16, 128], strides = [1, 1]} : vector<16x512xf32> to vector<16x128xf32>
    %234 = arith.addf %232, %233 : vector<16x128xf32>
    %235 = arith.negf %234 : vector<16x128xf32>
    %236 = math.exp %235 : vector<16x128xf32>
    %cst_85 = arith.constant 1.000000e+00 : f32
    %237 = vector.broadcast %cst_85 : f32 to vector<16x128xf32>
    %238 = arith.addf %237, %236 : vector<16x128xf32>
    %239 = arith.divf %237, %238 : vector<16x128xf32>
    %240 = vector.extract_strided_slice %218 {offsets = [0, 256], sizes = [16, 128], strides = [1, 1]} : vector<16x384xf32> to vector<16x128xf32>
    %241 = vector.extract_strided_slice %223 {offsets = [0, 256], sizes = [16, 128], strides = [1, 1]} : vector<16x512xf32> to vector<16x128xf32>
    %242 = arith.addf %240, %241 : vector<16x128xf32>
    %cst_86 = arith.constant 1.000000e+00 : f32
    %243 = vector.broadcast %cst_86 : f32 to vector<16x128xf32>
    %244 = arith.subf %231, %243 : vector<16x128xf32>
    %245 = vector.extract_strided_slice %223 {offsets = [0, 384], sizes = [16, 128], strides = [1, 1]} : vector<16x512xf32> to vector<16x128xf32>
    %246 = arith.mulf %244, %245 : vector<16x128xf32>
    %247 = arith.addf %242, %246 : vector<16x128xf32>
    %248 = math.tanh %247 : vector<16x128xf32>
    %cst_87 = arith.constant 1.000000e+00 : f32
    %249 = vector.broadcast %cst_87 : f32 to vector<16x128xf32>
    %250 = arith.subf %249, %239 : vector<16x128xf32>
    %251 = arith.mulf %250, %248 : vector<16x128xf32>
    %252 = arith.mulf %239, %146 : vector<16x128xf32>
    %253 = arith.addf %251, %252 : vector<16x128xf32>
    %254 = vector.shape_cast %253 : vector<16x128xf32> to vector<2x8x128xf32>
    %cst_88 = arith.constant dense<0xFF800000> : vector<2x8xf32>
    %255 = vector.multi_reduction <maximumf>, %3, %cst_88 [1] : vector<2x8x8xf32> to vector<2x8xf32>
    %256 = vector.shape_cast %255 : vector<2x8xf32> to vector<2x8x1xf32>
    %cst_89 = arith.constant 5.000000e-01 : f32
    %257 = vector.broadcast %cst_89 : f32 to vector<2x8x1xf32>
    %258 = arith.cmpf ogt, %256, %257 : vector<2x8x1xf32>
    %259 = vector.shape_cast %258 : vector<2x8x1xi1> to vector<2x8x1xi1>
    %260 = vector.broadcast %259 : vector<2x8x1xi1> to vector<2x8x128xi1>
    %261 = arith.select %260, %254, %132 : vector<2x8x128xi1>, vector<2x8x128xf32>
    %c0_90 = arith.constant 0 : index
    %c0_91 = arith.constant 0 : index
    %c0_92 = arith.constant 0 : index
    %262 = vector.load %arg20[%c0_90, %c0_91, %c0_92] : memref<2x8x128xf32, #tpu.memory_space<vmem>>, vector<2x8x128xf32>
    tpu.vector_store %arg20[%c0_90, %c0_91, %c0_92], %261 {strides = array<i32>} : memref<2x8x128xf32, #tpu.memory_space<vmem>>, vector<2x8x128xf32>,
    return
  }
  func.func @transform_0(%arg0: i32) -> (i32, i32, i32) {
    %c0_i32 = arith.constant 0 : i32
    %c0_i32_0 = arith.constant 0 : i32
    %c0_i32_1 = arith.constant 0 : i32
    return %arg0, %c0_i32, %c0_i32_0 : i32, i32, i32
  }
  func.func @transform_1(%arg0: i32) -> (i32, i32, i32, i32) {
    %c0_i32 = arith.constant 0 : i32
    %c0_i32_0 = arith.constant 0 : i32
    %c0_i32_1 = arith.constant 0 : i32
    %c0_i32_2 = arith.constant 0 : i32
    return %arg0, %c0_i32, %c0_i32_0, %c0_i32_1 : i32, i32, i32, i32
  }
  func.func @transform_2(%arg0: i32) -> (i32, i32, i32) {
    %c0_i32 = arith.constant 0 : i32
    %c0_i32_0 = arith.constant 0 : i32
    %c0_i32_1 = arith.constant 0 : i32
    return %arg0, %c0_i32, %c0_i32_0 : i32, i32, i32
  }
  func.func @transform_3(%arg0: i32) -> (i32, i32, i32) {
    %c0_i32 = arith.constant 0 : i32
    %c0_i32_0 = arith.constant 0 : i32
    %c0_i32_1 = arith.constant 0 : i32
    return %arg0, %c0_i32, %c0_i32_0 : i32, i32, i32
  }
  func.func @transform_4(%arg0: i32) -> (i32, i32) {
    %c0_i32 = arith.constant 0 : i32
    %c0_i32_0 = arith.constant 0 : i32
    %c0_i32_1 = arith.constant 0 : i32
    return %c0_i32, %c0_i32_0 : i32, i32
  }
  func.func @transform_5(%arg0: i32) -> (i32, i32) {
    %c0_i32 = arith.constant 0 : i32
    %c0_i32_0 = arith.constant 0 : i32
    %c0_i32_1 = arith.constant 0 : i32
    return %c0_i32, %c0_i32_0 : i32, i32
  }
  func.func @transform_6(%arg0: i32) -> (i32, i32) {
    %c0_i32 = arith.constant 0 : i32
    %c0_i32_0 = arith.constant 0 : i32
    %c0_i32_1 = arith.constant 0 : i32
    return %c0_i32, %c0_i32_0 : i32, i32
  }
  func.func @transform_7(%arg0: i32) -> (i32, i32) {
    %c0_i32 = arith.constant 0 : i32
    %c0_i32_0 = arith.constant 0 : i32
    %c0_i32_1 = arith.constant 0 : i32
    return %c0_i32, %c0_i32_0 : i32, i32
  }
  func.func @transform_8(%arg0: i32) -> (i32, i32) {
    %c0_i32 = arith.constant 0 : i32
    %c0_i32_0 = arith.constant 0 : i32
    %c0_i32_1 = arith.constant 0 : i32
    return %c0_i32, %c0_i32_0 : i32, i32
  }
  func.func @transform_9(%arg0: i32) -> (i32, i32) {
    %c0_i32 = arith.constant 0 : i32
    %c0_i32_0 = arith.constant 0 : i32
    %c0_i32_1 = arith.constant 0 : i32
    return %c0_i32, %c0_i32_0 : i32, i32
  }
  func.func @transform_10(%arg0: i32) -> (i32, i32) {
    %c0_i32 = arith.constant 0 : i32
    %c0_i32_0 = arith.constant 0 : i32
    %c0_i32_1 = arith.constant 0 : i32
    return %c0_i32, %c0_i32_0 : i32, i32
  }
  func.func @transform_11(%arg0: i32) -> (i32, i32) {
    %c0_i32 = arith.constant 0 : i32
    %c0_i32_0 = arith.constant 0 : i32
    %c0_i32_1 = arith.constant 0 : i32
    return %c0_i32, %c0_i32_0 : i32, i32
  }
  func.func @transform_12(%arg0: i32) -> (i32, i32) {
    %c0_i32 = arith.constant 0 : i32
    %c0_i32_0 = arith.constant 0 : i32
    %c0_i32_1 = arith.constant 0 : i32
    return %c0_i32, %c0_i32_0 : i32, i32
  }
  func.func @transform_13(%arg0: i32) -> (i32, i32) {
    %c0_i32 = arith.constant 0 : i32
    %c0_i32_0 = arith.constant 0 : i32
    %c0_i32_1 = arith.constant 0 : i32
    return %c0_i32, %c0_i32_0 : i32, i32
  }
  func.func @transform_14(%arg0: i32) -> (i32, i32) {
    %c0_i32 = arith.constant 0 : i32
    %c0_i32_0 = arith.constant 0 : i32
    %c0_i32_1 = arith.constant 0 : i32
    return %c0_i32, %c0_i32_0 : i32, i32
  }
  func.func @transform_15(%arg0: i32) -> (i32, i32) {
    %c0_i32 = arith.constant 0 : i32
    %c0_i32_0 = arith.constant 0 : i32
    %c0_i32_1 = arith.constant 0 : i32
    return %c0_i32, %c0_i32_0 : i32, i32
  }
  func.func @transform_16(%arg0: i32) -> (i32, i32) {
    %c0_i32 = arith.constant 0 : i32
    %c0_i32_0 = arith.constant 0 : i32
    %c0_i32_1 = arith.constant 0 : i32
    return %c0_i32, %c0_i32_0 : i32, i32
  }
  func.func @transform_17(%arg0: i32) -> (i32, i32) {
    %c0_i32 = arith.constant 0 : i32
    %c0_i32_0 = arith.constant 0 : i32
    %c0_i32_1 = arith.constant 0 : i32
    return %c0_i32, %c0_i32_0 : i32, i32
  }
  func.func @transform_18(%arg0: i32) -> (i32, i32) {
    %c0_i32 = arith.constant 0 : i32
    %c0_i32_0 = arith.constant 0 : i32
    %c0_i32_1 = arith.constant 0 : i32
    return %c0_i32, %c0_i32_0 : i32, i32
  }
  func.func @transform_19(%arg0: i32) -> (i32, i32, i32) {
    %c0_i32 = arith.constant 0 : i32
    %c0_i32_0 = arith.constant 0 : i32
    %c0_i32_1 = arith.constant 0 : i32
    return %arg0, %c0_i32, %c0_i32_0 : i32, i32, i32
  }
}

</mosaic_0001>

<bundles_post_ra>
// kernel: tpu_custom_call.1
= control target key start
LH: loop header
LB: loop body
LE: loop exit
PB: predicated region body
PF: predicated region fallthrough
CT: control target
= control target key end

     0   :  { %s6062_s0 = inlined_call_operand.hbm [shape: f32[2,8,128], index: 0, kind: input, shape index: {}]   ;;  %s6063_s1 = inlined_call_operand.hbm [shape: bf16[2,8,8,512], index: 1, kind: input, shape index: {}]   ;;  %s6064_s2 = inlined_call_operand.hbm [shape: f32[2,8,8], index: 2, kind: input, shape index: {}]   ;;  %s6065_s3 = inlined_call_operand.hbm [shape: f32[2,8,8], index: 3, kind: input, shape index: {}]   ;;  %s6066_s4 = inlined_call_operand.hbm [shape: bf16[128,128], index: 4, kind: input, shape index: {}]   ;;  %s6067_s5 = inlined_call_operand.hbm [shape: f32[1,128], index: 5, kind: input, shape index: {}]   ;;  %s6068_s6 = inlined_call_operand.hbm [shape: f32[1,128], index: 6, kind: input, shape index: {}]   ;;  %s6069_s7 = inlined_call_operand.hbm [shape: bf16[128,384], index: 7, kind: input, shape index: {}]   ;;  %s6070_s8 = inlined_call_operand.vmem [shape: f32[1,384], index: 8, kind: input, shape index: {}]   ;;  %s6071_s9 = inlined_call_operand.hbm [shape: bf16[128,384], index: 9, kind: input, shape index: {}]   ;;  %s6072_s10 = inlined_call_operand.hbm [shape: bf16[128,512], index: 10, kind: input, shape index: {}]   ;;  %s6073_s11 = inlined_call_operand.vmem [shape: f32[1,512], index: 11, kind: input, shape index: {}]   ;;  %s6074_s12 = inlined_call_operand.vmem [shape: f32[1,128], index: 12, kind: input, shape index: {}]   ;;  %s6075_s13 = inlined_call_operand.vmem [shape: f32[1,128], index: 13, kind: input, shape index: {}]   ;;  %s6076_s14 = inlined_call_operand.hbm [shape: bf16[128,384], index: 14, kind: input, shape index: {}]   ;;  %s6077_s15 = inlined_call_operand.vmem [shape: f32[1,384], index: 15, kind: input, shape index: {}]   ;;  %s6078_s16 = inlined_call_operand.hbm [shape: bf16[128,384], index: 16, kind: input, shape index: {}]   ;;  %s6079_s17 = inlined_call_operand.hbm [shape: bf16[128,512], index: 17, kind: input, shape index: {}]   ;;  %s6080_s18 = inlined_call_operand.vmem [shape: f32[1,512], index: 18, kind: input, shape index: {}]   ;;  %s6081_s19 = inlined_call_operand.hbm [shape: f32[2,8,128], index: 19, kind: output, shape index: {}]  }
   0x1   :  { %6091 = sst [smem:[#allocation34_spill]] %s6062_s0 }
   0x2   :  { %6092 = sst [smem:[#allocation35_spill]] %s6063_s1 }
   0x3   :  { %6093 = sst [smem:[#allocation36_spill]] %s6064_s2 }
   0x4   :  { %6094 = sst [smem:[#allocation37_spill]] %s6065_s3 }
   0x5   :  { %24 = vsyncpa [#allocation3], 0 }
   0x6   :  { %25 = vsyncpa [#allocation6], 0 }
   0x7   :  { %26 = vsyncpa [#allocation9], 0 }
   0x8   :  { %27 = vsyncpa [#allocation12], 0 }
   0x9   :  { %28 = vsyncpa [#allocation15], 0 }
   0xa   :  { %29 = vsyncpa [#allocation18], 0 }
   0xb   :  { %30 = vsyncpa [#allocation21], 0 }
   0xc   :  { %31 = vsyncpa [#allocation4], 0  ;;  %s5155_s0 = smov [#allocation5]  }
   0xd   :  { %s49_s30 = sshll.u32 %s5155_s0, 4  ;;  %s50_s30 = int_to_ptr.vmem [resolvable:$true] %s49_s30 }
   0xe   :  { %s4867_s20 = scalar_lea.vmem %s50_s30, 4096  ;;  %p4872_p1 = scmp.lt.s32.totalorder %s50_s30, %s50_s30 }
   0xf   :  { %p4868_p0 = scmp.ne.s32.totalorder %s50_s30, %s4867_s20  ;;  %p4873_p2 = scmp.lt.s32.totalorder %s4867_s20, %s4867_s20 }
  0x11   :  { %p4874_p3 = por %p4873_p2, %p4872_p1 }
  0x13   :  { %p4875_p4 = pnand %p4874_p3, %p4868_p0 }
  0x15   :  { %4878 = shalt.err (!%p4875_p4)
}
  0x16   :  { %s6082_s21 = smov 256   ;;  %s5157_s1 = smov 16  }
  0x17   :  { %s6095_s23 = sld [smem:[#allocation35_spill]]  ;;  %s5158_s24 = smov [#allocation8]  }
  0x18   :  { %s73_s25 = sshll.u32 %s5158_s24, 4  ;;  %s5159_s3 = smov [#allocation11]   ;;  %s74_s25 = int_to_ptr.vmem [resolvable:$true] %s73_s25 }
  0x19   :  { %s98_s26 = sshll.u32 %s5159_s3, 4  ;;  %s4887_s27 = scalar_lea.vmem %s74_s25, 256  ;;  %s99_s26 = int_to_ptr.vmem [resolvable:$true] %s98_s26 }
  0x1a   :  { %p4888_p5 = scmp.ne.s32.totalorder %s74_s25, %s4887_s27  ;;  %p4892_p6 = scmp.lt.s32.totalorder %s74_s25, %s74_s25 }
  0x1b   :  { %p4893_p7 = scmp.lt.s32.totalorder %s4887_s27, %s4887_s27 }
  0x1d   :  { %55 = dma.hbm_to_vmem [thread:$0]  %s6095_s23, 4096, %s50_s30, [#allocation6], %s6082_s21, %s6082_s21, %s5157_s1  }
  0x1e   :  { %p4894_p8 = por %p4893_p7, %p4892_p6 }
  0x20   :  { %p4895_p9 = pnand %p4894_p8, %p4888_p5 }
  0x22   :  { %4898 = shalt.err (!%p4895_p9)
}
  0x23   :  { %s5160_s28 = smov 128   ;;  %s5161_s29 = smov 8  }
  0x24   :  { %s6096_s30 = sld [smem:[#allocation37_spill]]  ;;  %s4907_s22 = scalar_lea.vmem %s99_s26, 16 }
  0x25   :  { %p4908_p10 = scmp.ne.s32.totalorder %s99_s26, %s4907_s22  ;;  %s4911_s2 = scalar_lea.vmem %s99_s26, 32 }
  0x26   :  { %p4912_p11 = scmp.lt.s32.totalorder %s99_s26, %s99_s26  ;;  %p4913_p12 = scmp.lt.s32.totalorder %s4911_s2, %s4907_s22 }
  0x28   :  { %p4914_p13 = por %p4913_p12, %p4912_p11 }
  0x2a   :  { %79 = dma.hbm_to_vmem [thread:$0]  %s6096_s30, 256, %s74_s25, [#allocation9], %s5160_s28, %s5160_s28, %s5161_s29  }
  0x2b   :  { %p4915_p0 = pnand %p4914_p13, %p4908_p10 }
  0x2d   :  { %4918 = shalt.err (!%p4915_p0)
}
  0x2e   :  { %101 = dma.hbm_to_vmem [thread:$0]  %s6067_s5, 16, %s99_s26, [#allocation12]  }
  0x2f   :  { %s5162_s3 = smov [#allocation14]  }
  0x30   :  { %s117_s27 = sshll.u32 %s5162_s3, 4  ;;  %s118_s27 = int_to_ptr.vmem [resolvable:$true] %s117_s27 }
  0x31   :  { %s4927_s21 = scalar_lea.vmem %s118_s27, 3072  ;;  %p4932_p2 = scmp.lt.s32.totalorder %s118_s27, %s118_s27 }
  0x32   :  { %p4928_p1 = scmp.ne.s32.totalorder %s118_s27, %s4927_s21  ;;  %p4933_p3 = scmp.lt.s32.totalorder %s4927_s21, %s4927_s21 }
  0x34   :  { %p4934_p4 = por %p4933_p3, %p4932_p2 }
  0x36   :  { %p4935_p5 = pnand %p4934_p4, %p4928_p1 }
  0x38   :  { %4938 = shalt.err (!%p4935_p5)
}
  0x39   :  { %s5163_s25 = smov 192   ;;  %s5164_s0 = smov 12  }
  0x3a   :  { %123 = dma.hbm_to_vmem [thread:$0]  %s6069_s7, 3072, %s118_s27, [#allocation15], %s5163_s25, %s5163_s25, %s5164_s0  }
  0x3b   :  { %s5165_s5 = smov [#allocation17]   ;;  %s5166_s22 = smov [#allocation20]  }
  0x3c   :  { %s143_s26 = sshll.u32 %s5165_s5, 4  ;;  %s175_s2 = sshll.u32 %s5166_s22, 4  ;;  %s144_s26 = int_to_ptr.vmem [resolvable:$true] %s143_s26  ;;  %s176_s2 = int_to_ptr.vmem [resolvable:$true] %s175_s2 }
  0x3d   :  { %s4947_s23 = scalar_lea.vmem %s144_s26, 4096  ;;  %p4952_p7 = scmp.lt.s32.totalorder %s144_s26, %s144_s26 }
  0x3e   :  { %p4948_p6 = scmp.ne.s32.totalorder %s144_s26, %s4947_s23  ;;  %p4953_p8 = scmp.lt.s32.totalorder %s4947_s23, %s4947_s23 }
  0x40   :  { %p4954_p9 = por %p4953_p8, %p4952_p7 }
  0x42   :  { %p4955_p10 = pnand %p4954_p9, %p4948_p6 }
  0x44   :  { %4958 = shalt.err (!%p4955_p10)
}
  0x45   :  { %s6097_s21 = smov 256   ;;  %s4967_s7 = scalar_lea.vmem %s176_s2, 3072 }
  0x46   :  { %149 = dma.hbm_to_vmem [thread:$0]  %s6072_s10, 4096, %s144_s26, [#allocation18], %s6097_s21, %s6097_s21, %s5157_s1  }
  0x47   :  { %p4968_p11 = scmp.ne.s32.totalorder %s176_s2, %s4967_s7  ;;  %p4972_p12 = scmp.lt.s32.totalorder %s176_s2, %s176_s2 }
  0x48   :  { %p4973_p13 = scmp.lt.s32.totalorder %s4967_s7, %s4967_s7 }
  0x4a   :  { %p4974_p0 = por %p4973_p13, %p4972_p12 }
  0x4c   :  { %p4975_p1 = pnand %p4974_p0, %p4968_p11 }
  0x4e   :  { %4978 = shalt.err (!%p4975_p1)
}
  0x4f   :  { %181 = dma.hbm_to_vmem [thread:$0]  %s6078_s16, 3072, %s176_s2, [#allocation21], %s5163_s25, %s5163_s25, %s5164_s0  }
  0x50   :  { %s5167_s30 = smov [#allocation2]   ;;  %s5168_s22 = smov [#allocation7]  }
  0x51   :  { %s37_s5 = sshll.u32 %s5167_s30, 4  ;;  %s61_s23 = sshll.u32 %s5168_s22, 4  ;;  %s38_s5 = int_to_ptr.vmem [resolvable:$true] %s37_s5  ;;  %s62_s23 = int_to_ptr.vmem [resolvable:$true] %s61_s23 }
  0x52   :  { %s4987_s10 = scalar_lea.vmem %s38_s5, 256  ;;  %p4992_p3 = scmp.lt.s32.totalorder %s38_s5, %s38_s5 }
  0x53   :  { %p4988_p2 = scmp.ne.s32.totalorder %s38_s5, %s4987_s10  ;;  %p4993_p4 = scmp.lt.s32.totalorder %s4987_s10, %s4987_s10 }
  0x55   :  { %p4994_p5 = por %p4993_p4, %p4992_p3 }
  0x57   :  { %p4995_p6 = pnand %p4994_p5, %p4988_p2 }
  0x59   :  { %4998 = shalt.err (!%p4995_p6)
}
  0x5a   :  { %s6098_s3 = sld [smem:[#allocation34_spill]]  ;;  %s5007_s16 = scalar_lea.vmem %s62_s23, 256 }
  0x5b   :  { %p5008_p7 = scmp.ne.s32.totalorder %s62_s23, %s5007_s16  ;;  %p5012_p8 = scmp.lt.s32.totalorder %s62_s23, %s62_s23 }
  0x5c   :  { %p5013_p9 = scmp.lt.s32.totalorder %s5007_s16, %s5007_s16 }
  0x5e   :  { %p5014_p10 = por %p5013_p9, %p5012_p8 }
  0x60   :  { %43 = dma.hbm_to_vmem [thread:$0]  %s6098_s3, 256, %s38_s5, [#allocation3], %s5160_s28, %s5160_s28, %s5161_s29  }
  0x61   :  { %p5015_p11 = pnand %p5014_p10, %p5008_p7 }
  0x63   :  { %5018 = shalt.err (!%p5015_p11)
}
  0x64   :  { %s6099_s27 = sld [smem:[#allocation36_spill]]  ;;  %s5169_s20 = smov [#allocation10]  }
  0x65   :  { %s85_s30 = sshll.u32 %s5169_s20, 4  ;;  %s86_s30 = int_to_ptr.vmem [resolvable:$true] %s85_s30 }
  0x66   :  { %s5027_s22 = scalar_lea.vmem %s86_s30, 1024  ;;  %p5032_p13 = scmp.lt.s32.totalorder %s86_s30, %s86_s30 }
  0x67   :  { %p5028_p12 = scmp.ne.s32.totalorder %s86_s30, %s5027_s22  ;;  %p5033_p0 = scmp.lt.s32.totalorder %s5027_s22, %s5027_s22 }
  0x69   :  { %p5034_p1 = por %p5033_p0, %p5032_p13 }
  0x6a   :  { %67 = dma.hbm_to_vmem [thread:$0]  %s6099_s27, 256, %s62_s23, [#allocation6], %s5160_s28, %s5160_s28, %s5161_s29  }
  0x6b   :  { %p5035_p2 = pnand %p5034_p1, %p5028_p12 }
  0x6d   :  { %5038 = shalt.err (!%p5035_p2)
}
  0x6e   :  { %s5170_s5 = smov 64   ;;  %s5171_s10 = smov 4  }
  0x6f   :  { %91 = dma.hbm_to_vmem [thread:$0]  %s6066_s4, 1024, %s86_s30, [#allocation9], %s5170_s5, %s5170_s5, %s5171_s10  }
  0x70   :  { %s5172_s3 = smov [#allocation13]   ;;  %s5173_s23 = smov [#allocation16]  }
  0x71   :  { %s108_s16 = sshll.u32 %s5172_s3, 4  ;;  %s131_s2 = sshll.u32 %s5173_s23, 4  ;;  %s109_s16 = int_to_ptr.vmem [resolvable:$true] %s108_s16  ;;  %s132_s2 = int_to_ptr.vmem [resolvable:$true] %s131_s2 }
  0x72   :  { %s5047_s7 = scalar_lea.vmem %s109_s16, 16  ;;  %s5051_s27 = scalar_lea.vmem %s109_s16, 32 }
  0x73   :  { %p5048_p3 = scmp.ne.s32.totalorder %s109_s16, %s5047_s7  ;;  %p5052_p4 = scmp.lt.s32.totalorder %s109_s16, %s109_s16 }
  0x74   :  { %p5053_p5 = scmp.lt.s32.totalorder %s5051_s27, %s5047_s7 }
  0x76   :  { %p5054_p6 = por %p5053_p5, %p5052_p4 }
  0x78   :  { %p5055_p7 = pnand %p5054_p6, %p5048_p3 }
  0x7a   :  { %5058 = shalt.err (!%p5055_p7)
}
  0x7b   :  { %111 = dma.hbm_to_vmem [thread:$0]  %s6068_s6, 16, %s109_s16, [#allocation12]  }
  0x7c   :  { %s5067_s26 = scalar_lea.vmem %s132_s2, 3072  ;;  %p5072_p9 = scmp.lt.s32.totalorder %s132_s2, %s132_s2 }
  0x7d   :  { %p5068_p8 = scmp.ne.s32.totalorder %s132_s2, %s5067_s26  ;;  %p5073_p10 = scmp.lt.s32.totalorder %s5067_s26, %s5067_s26 }
  0x7f   :  { %p5074_p11 = por %p5073_p10, %p5072_p9 }
  0x81   :  { %p5075_p12 = pnand %p5074_p11, %p5068_p8 }
  0x83   :  { %5078 = shalt.err (!%p5075_p12)
}
  0x84   :  { %137 = dma.hbm_to_vmem [thread:$0]  %s6071_s9, 3072, %s132_s2, [#allocation15], %s5163_s25, %s5163_s25, %s5164_s0  }
  0x85   :  { %s5174_s5 = smov [#allocation19]   ;;  %s5175_s24 = smov [#allocation22]  }
  0x86   :  { %s161_s10 = sshll.u32 %s5174_s5, 4  ;;  %s187_s6 = sshll.u32 %s5175_s24, 4  ;;  %s162_s10 = int_to_ptr.vmem [resolvable:$true] %s161_s10  ;;  %s188_s6 = int_to_ptr.vmem [resolvable:$true] %s187_s6 }
  0x87   :  { %s5087_s3 = scalar_lea.vmem %s162_s10, 3072  ;;  %p5092_p0 = scmp.lt.s32.totalorder %s162_s10, %s162_s10 }
  0x88   :  { %p5088_p13 = scmp.ne.s32.totalorder %s162_s10, %s5087_s3  ;;  %p5093_p1 = scmp.lt.s32.totalorder %s5087_s3, %s5087_s3 }
  0x8a   :  { %p5094_p2 = por %p5093_p1, %p5092_p0 }
  0x8c   :  { %p5095_p3 = pnand %p5094_p2, %p5088_p13 }
  0x8e   :  { %5098 = shalt.err (!%p5095_p3)
}
  0x8f   :  { %167 = dma.hbm_to_vmem [thread:$0]  %s6076_s14, 3072, %s162_s10, [#allocation18], %s5163_s25, %s5163_s25, %s5164_s0  }
  0x90   :  { %s5107_s9 = scalar_lea.vmem %s188_s6, 4096  ;;  %p5112_p5 = scmp.lt.s32.totalorder %s188_s6, %s188_s6 }
  0x91   :  { %p5108_p4 = scmp.ne.s32.totalorder %s188_s6, %s5107_s9  ;;  %p5113_p6 = scmp.lt.s32.totalorder %s5107_s9, %s5107_s9 }
  0x93   :  { %p5114_p7 = por %p5113_p6, %p5112_p5 }
  0x95   :  { %p5115_p8 = pnand %p5114_p7, %p5108_p4 }
  0x97   :  { %5118 = shalt.err (!%p5115_p8)
}
  0x98   :  { %193 = dma.hbm_to_vmem [thread:$0]  %s6079_s17, 4096, %s188_s6, [#allocation21], %s6097_s21, %s6097_s21, %s5157_s1  }
  0x99   :  { %5139 = dma.done.wait [#allocation3], 256  }
  0x9a   :  { %5140 = vsyncadd [#allocation3], 4294967040 }
  0x9b   :  { %5141 = dma.done.wait [#allocation6], 4352  }
  0x9c   :  { %5142 = vsyncadd [#allocation6], 4294962944 }
  0x9d   :  { %5143 = dma.done.wait [#allocation9], 1280  }
  0x9e   :  { %5144 = vsyncadd [#allocation9], 4294966016 }
  0x9f   :  { %5145 = dma.done.wait [#allocation12], 32  }
  0xa0   :  { %5146 = vsyncadd [#allocation12], 4294967264 }
  0xa1   :  { %5147 = dma.done.wait [#allocation15], 6144  }
  0xa2   :  { %5148 = vsyncadd [#allocation15], 4294961152 }
  0xa3   :  { %5149 = dma.done.wait [#allocation18], 7168  }
  0xa4   :  { %5150 = vsyncadd [#allocation18], 4294960128 }
  0xa5   :  { %5151 = dma.done.wait [#allocation21], 7168  }
  0xa6   :  { %5152 = vsyncadd [#allocation21], 4294960128  ;;  %v252_v0 = vld [vmem:[#allocation2] sm:$0xff]  ;;  %v253_v1 = vld [vmem:[#allocation2 + $0x8] sm:$0xff]  ;;  %v6086_v4 = vmov 0.0   ;;  %v6084_v27 = vmov 0   ;;  %v431_v61 = vlaneseq }
  0xa7   :  { %390 = vadd.xlane.f32.xlu0 %v252_v0  ;;  %v4497_v2 = vld [vmem:[#allocation14 + $0xac] ss:$12 sps:$4 sm:$0xff]   ;;  %v4499_v3 = vld [vmem:[#allocation14 + $0xa8] ss:$12 sps:$4 sm:$0xff]   ;;  %4327 = vmatprep.subr.bf16.mxu1 %v6086_v4  ;;  %v4500_v5 = vld [vmem:[#allocation14 + $0xb0] ss:$12 sps:$4 sm:$0xff]  }
  0xa8   :  { %574 = vmatprep.subr.bf16.mxu0 %v4497_v2  ;;  %4328 = vmatpush3.bf16.msra.mxu1 %v4500_v5  ;;  %v4501_v14 = vld [vmem:[#allocation14 + $0x94] ss:$12 sps:$4 sm:$0xff]   ;;  %v4503_v15 = vld [vmem:[#allocation14 + $0x90] ss:$12 sps:$4 sm:$0xff]   ;;  %v4504_v16 = vld [vmem:[#allocation14 + $0x98] ss:$12 sps:$4 sm:$0xff]  }
  0xa9   :  { %575 = vmatpush1.bf16.msra.mxu0 %v4499_v3  ;;  %4329 = vmatprep.subr.bf16.mxu1 %v6086_v4  ;;  %v4505_v17 = vld [vmem:[#allocation14 + $0x7c] ss:$12 sps:$4 sm:$0xff]   ;;  %v4507_v18 = vld [vmem:[#allocation14 + $0x78] ss:$12 sps:$4 sm:$0xff]   ;;  %v4508_v19 = vld [vmem:[#allocation14 + $0x80] ss:$12 sps:$4 sm:$0xff]  }
  0xaa   :  { %576 = vmatprep.subr.bf16.mxu0 %v4501_v14  ;;  %v4509_v20 = vld [vmem:[#allocation14 + $0x64] ss:$12 sps:$4 sm:$0xff]   ;;  %v4511_v21 = vld [vmem:[#allocation14 + $0x60] ss:$12 sps:$4 sm:$0xff]   ;;  %v4512_v22 = vld [vmem:[#allocation14 + $0x68] ss:$12 sps:$4 sm:$0xff]   ;;  %606 = vmatprep.mubr.bf16.mxu0 %v6084_v27 }
  0xab   :  { %392 = vadd.xlane.f32.xlu0 %v253_v1  ;;  %v4513_v23 = vld [vmem:[#allocation14 + $0x4c] ss:$12 sps:$4 sm:$0xff]   ;;  %v4515_v24 = vld [vmem:[#allocation14 + $0x48] ss:$12 sps:$4 sm:$0xff]   ;;  %v4516_v25 = vld [vmem:[#allocation14 + $0x50] ss:$12 sps:$4 sm:$0xff]  }
  0xac   :  { %4330 = vmatpush3.bf16.msra.mxu1 %v4504_v16  ;;  %v4517_v26 = vld [vmem:[#allocation14 + $0x34] ss:$12 sps:$4 sm:$0xff]   ;;  %vm5178_vm0 = vmmov 0   ;;  %v4519_v28 = vld [vmem:[#allocation14 + $0x30] ss:$12 sps:$4 sm:$0xff]   ;;  %v4531_v55 = vld [vmem:[#allocation10 + $0x28] sm:$0xff]  }
  0xad   :  { %577 = vmatpush1.bf16.msra.mxu0 %v4503_v15  ;;  %4331 = vmatprep.subr.bf16.mxu1 %v6086_v4  ;;  %v4520_v29 = vld [vmem:[#allocation14 + $0x38] ss:$12 sps:$4 sm:$0xff]   ;;  %v4521_v30 = vld [vmem:[#allocation14 + $0x1c] ss:$12 sps:$4 sm:$0xff]   ;;  %v4524_v32 = vld [vmem:[#allocation14 + $0x20] ss:$12 sps:$4 sm:$0xff]  }
  0xae   :  { %578 = vmatprep.subr.bf16.mxu0 %v4505_v17  ;;  %4343 = vmatprep.mubr.msk.bf16.mxu1 %vm5178_vm0, %v6086_v4  ;;  %v4523_v31 = vld [vmem:[#allocation14 + $0x18] ss:$12 sps:$4 sm:$0xff]   ;;  %v4527_v34 = vld [vmem:[#allocation14] ss:$12 sps:$4 sm:$0xff]   ;;  %v4528_v35 = vld [vmem:[#allocation14 + $0x8] ss:$12 sps:$4 sm:$0xff]  }
  0xaf   :  { %v4525_v33 = vld [vmem:[#allocation14 + $0x4] ss:$12 sps:$4 sm:$0xff]   ;;  %v4529_v36 = vld [vmem:[#allocation10 + $0x38] sm:$0xff]   ;;  %v4043_v45 = vld [vmem:[#allocation11] ss:$0 sm:$0xff]  ;;  %v432_v62 = vshrl.u32 %v431_v61, 7 }
  0xb0   :  { %4332 = vmatpush3.bf16.msra.mxu1 %v4508_v19  ;;  %v4044_v49 = vld [vmem:[#allocation13] ss:$0 sm:$0xff]  ;;  %v4530_v54 = vld [vmem:[#allocation10 + $0x30] sm:$0xff]   ;;  %v4533_v57 = vld [vmem:[#allocation10 + $0x18] sm:$0xff]   ;;  %vm2134_vm5 = vcmask 64512  }
  0xb1   :  { %579 = vmatpush1.bf16.msra.mxu0 %v4507_v18  ;;  %4333 = vmatprep.subr.bf16.mxu1 %v6086_v4  ;;  %v4532_v56 = vld [vmem:[#allocation10 + $0x20] sm:$0xff]   ;;  %v4534_v58 = vld [vmem:[#allocation10 + $0x10] sm:$0xff]   ;;  %v4535_v59 = vld [vmem:[#allocation10 + $0x8] sm:$0xff]   ;;  %v5373_v63 = vsub.s32 0, %v432_v62  ;;  %v5381_v3 = vsub.s32 2, %v432_v62  ;;  %v5407_v17 = vsub.s32 5, %v432_v62 }
  0xb2   :  { %580 = vmatprep.subr.bf16.mxu0 %v4509_v20  ;;  %v4536_v60 = vld [vmem:[#allocation10] sm:$0xff]   ;;  %v5379_v2 = vld [vmem:[#allocation7 + $0x8] sm:$0xff]  ;;  %v5409_v18 = vsub.s32 6, %v432_v62 }
  0xb4   :  { %4334 = vmatpush3.bf16.msra.mxu1 %v4512_v22  ;;  %v5417_v22 = vsub.s32 7, %v432_v62 }
  0xb5   :  { %581 = vmatpush1.bf16.msra.mxu0 %v4511_v21  ;;  %4335 = vmatprep.subr.bf16.mxu1 %v6086_v4  ;;  %v1401_v21 = vrot.slane %v5379_v2, %v5407_v17 }
  0xb6   :  { %582 = vmatprep.subr.bf16.mxu0 %v4513_v23  ;;  %6101 = vst [vmem:[#allocation33_spill] sm:$0xff] %v5417_v22  ;;  %v1408_v23 = vrot.slane %v5379_v2, %v5409_v18 }
  0xb8   :  { %4336 = vmatpush3.bf16.msra.mxu1 %v4516_v25  ;;  %v1415_v25 = vrot.slane %v5379_v2, %v5417_v22 }
  0xb9   :  { %583 = vmatpush1.bf16.msra.mxu0 %v4515_v24  ;;  %4337 = vmatprep.subr.bf16.mxu1 %v6086_v4 }
  0xba   :  { %584 = vmatprep.subr.bf16.mxu0 %v4517_v26  ;;  %v5179_v26 = vmov 1966171168  }
  0xbc   :  { %4338 = vmatpush3.bf16.msra.mxu1 %v4520_v29  ;;  %v324_v29 = vld [vmem:[%s6070_s8] sm:$0x7] }
  0xbd   :  { %585 = vmatpush1.bf16.msra.mxu0 %v4519_v28  ;;  %4339 = vmatprep.subr.bf16.mxu1 %v6086_v4  ;;  %v662_v28 = vunpack.c.l.s4 %v5179_v26 }
  0xbe   :  { %586 = vmatprep.subr.bf16.mxu0 %v4521_v30 }
  0xbf   :  { %v663_v30 = vunpack.c.0.s8 %v662_v28 }
  0xc0   :  { %4340 = vmatpush3.bf16.msra.mxu1 %v4524_v32  ;;  %v5431_v32 = vrot.slane %v324_v29, %v5381_v3 }
  0xc1   :  { %587 = vmatpush1.bf16.msra.mxu0 %v4523_v31  ;;  %4341 = vmatprep.subr.bf16.mxu1 %v6086_v4  ;;  %v5428_v31 = vld [vmem:[#allocation5] sm:$0xff]  }
  0xc2   :  { %588 = vmatprep.subr.bf16.mxu0 %v4525_v33  ;;  %v5433_v33 = vld [vmem:[#allocation5 + $0x10] sm:$0xff]  }
  0xc4   :  { %4342 = vmatpush3.bf16.msra.mxu1 %v4528_v35  ;;  %v5437_v35 = vld [vmem:[#allocation5 + $0x30] sm:$0xff]  }
  0xc5   :  { %589 = vmatpush1.bf16.msra.mxu0 %v4527_v34  ;;  %v5435_v34 = vld [vmem:[#allocation5 + $0x20] sm:$0xff]  }
  0xc6   :  { %4347 = vmatprep.subr.bf16.mxu0 %v4529_v36 }
 0x130   :  { %v391_v6 = vpop.xlane.xlu0 %390 }
 0x131   :  { %v395_v7 = vmul.f32 0.0078125, %v391_v6 }
 0x133   :  { %v5352_v8 = vsub.f32 %v252_v0, %v395_v7  ;;  %v5375_v0 = vsub.s32 1, %v432_v62 }
 0x134   :  { %v393_v9 = vpop.xlane.xlu0 %392 }
 0x135   :  { %v396_v10 = vmul.f32 0.0078125, %v393_v9  ;;  %v399_v11 = vmul.f32 %v5352_v8, %v5352_v8  ;;  %v5391_v9 = vsub.s32 3, %v432_v62 }
 0x137   :  { %v5356_v12 = vsub.f32 %v253_v1, %v396_v10  ;;  %401 = vadd.xlane.f32.xlu1 %v399_v11  ;;  %v5377_v1 = vld [vmem:[#allocation7] sm:$0xff]  ;;  %6100 = vst [vmem:[#allocation32_spill] sm:$0xff] %v5391_v9  ;;  %v1380_v11 = vrot.slane %v5379_v2, %v5381_v3  ;;  %v1387_v15 = vrot.slane %v5379_v2, %v5391_v9 }
 0x138   :  { %v1317_v5 = vrot.slane %v5377_v1, %v5375_v0  ;;  %v1310_v6 = vrot.slane %v5377_v1, %v5373_v63  ;;  %v1324_v7 = vrot.slane %v5377_v1, %v5381_v3  ;;  %v1331_v10 = vrot.slane %v5377_v1, %v5391_v9 }
 0x139   :  { %v400_v13 = vmul.f32 %v5356_v12, %v5356_v12  ;;  %v1345_v19 = vrot.slane %v5377_v1, %v5407_v17  ;;  %v1352_v20 = vrot.slane %v5377_v1, %v5409_v18  ;;  %v1359_v24 = vrot.slane %v5377_v1, %v5417_v22 }
 0x13a   :  { %1312 = vbcast.lane.b32.xlu0 %v1310_v6, 256  ;;  %v5478_v6 = vld [vmem:[#allocation5 + $0xe0] sm:$0xff]  }
 0x13b   :  { %403 = vadd.xlane.f32.xlu1 %v400_v13  ;;  %v1373_v13 = vrot.slane %v5379_v2, %v5375_v0 }
 0x14c   :  { %1319 = vbcast.lane.b32.xlu1 %v1317_v5, 256  ;;  %v5476_v5 = vld [vmem:[#allocation5 + $0xd0] sm:$0xff]  }
 0x150   :  { %1326 = vbcast.lane.b32.xlu1 %v1324_v7, 256 }
 0x154   :  { %1333 = vbcast.lane.b32.xlu1 %v1331_v10, 256 }
 0x158   :  { %1375 = vbcast.lane.b32.xlu1 %v1373_v13, 256 }
 0x15c   :  { %1389 = vbcast.lane.b32.xlu1 %v1387_v15, 256 }
 0x160   :  { %1347 = vbcast.lane.b32.xlu1 %v1345_v19, 256 }
 0x164   :  { %1403 = vbcast.lane.b32.xlu1 %v1401_v21, 256 }
 0x168   :  { %1361 = vbcast.lane.b32.xlu1 %v1359_v24, 256 }
 0x16c   :  { %1417 = vbcast.lane.b32.xlu1 %v1415_v25, 256 }
 0x1c0   :  { %v402_v37 = vpop.xlane.xlu1 %401 }
 0x1c1   :  { %v405_v38 = vmul.f32 0.0078125, %v402_v37  ;;  %v5441_v37 = vld [vmem:[#allocation5 + $0x50] sm:$0xff]  }
 0x1c3   :  { %v407_v39 = vadd.f32 1e-05, %v405_v38  ;;  %v5443_v38 = vld [vmem:[#allocation5 + $0x60] sm:$0xff]  }
 0x1c4   :  { %v404_v40 = vpop.xlane.xlu1 %403 }
 0x1c5   :  { %4729 = vrsqrt.f32 %v407_v39  ;;  %v406_v41 = vmul.f32 0.0078125, %v404_v40  ;;  %v5445_v39 = vsub.s32 %v663_v30, %v432_v62  ;;  %v5448_v40 = vrot.slane %v324_v29, %v5375_v0 }
 0x1c7   :  { %v408_v42 = vadd.f32 1e-05, %v406_v41  ;;  %v5451_v41 = vrot.slane %v324_v29, %v5373_v63 }
 0x1c9   :  { %4731 = vrsqrt.f32 %v408_v42 }
 0x1d2   :  { %v4730_v43 = vpop.eup %4729 }
 0x1d3   :  { %v411_v44 = vmul.f32 %v4730_v43, %v5352_v8  ;;  %v1366_v8 = vrot.slane %v5379_v2, %v5373_v63 }
 0x1d5   :  { %v419_v48 = vmul.f32 %v4043_v45, %v411_v44  ;;  %1368 = vbcast.lane.b32.xlu0 %v1366_v8, 256  ;;  %v5455_v44 = vld [vmem:[#allocation5 + $0x80] sm:$0xff]  }
 0x1d6   :  { %v4732_v46 = vpop.eup %4731  ;;  %v978_v8 = vunpack.c.h.bf16 %v5455_v44 }
 0x1d7   :  { %v412_v47 = vmul.f32 %v4732_v46, %v5356_v12  ;;  %v427_v51 = vadd.f32 %v4044_v49, %v419_v48  ;;  %v5397_v12 = vsub.s32 4, %v432_v62  ;;  %v970_v46 = vunpack.c.h.bf16 %v5428_v31  ;;  %v5474_v62 = vld [vmem:[#allocation5 + $0xb0] sm:$0xff]  }
 0x1d8   :  { %v972_v48 = vunpack.c.h.bf16 %v5435_v34 }
 0x1d9   :  { %v420_v50 = vmul.f32 %v4043_v45, %v412_v47  ;;  %1382 = vbcast.lane.b32.xlu0 %v1380_v11, 256  ;;  %v1338_v14 = vrot.slane %v5377_v1, %v5397_v12  ;;  %v1394_v16 = vrot.slane %v5379_v2, %v5397_v12  ;;  %v971_v47 = vunpack.c.h.bf16 %v5433_v33 }
 0x1db   :  { %v428_v52 = vadd.f32 %v4044_v49, %v420_v50  ;;  %v5461_v49 = vld [vmem:[#allocation5 + $0x90] sm:$0xff]   ;;  %v5463_v50 = vld [vmem:[#allocation5 + $0xa0] sm:$0xff]  }
 0x1dc   :  { %v979_v10 = vunpack.c.h.bf16 %v5461_v49  ;;  %v980_v11 = vunpack.c.h.bf16 %v5463_v50 }
 0x1dd   :  { %v429_v53 = vpack.c.bf16 %v428_v52, %v427_v51  ;;  %1340 = vbcast.lane.b32.xlu0 %v1338_v14, 256  ;;  %v5465_v51 = vld [vmem:[#allocation5 + $0xc0] sm:$0xff]   ;;  %v973_v52 = vunpack.c.h.bf16 %v5437_v35 }
 0x1df   :  { %607 = vmatmul.mubr.bf16.vlgmr.msra.gmra.mxu0 %v429_v53  ;;  %4344 = vmatmul.mubr.bf16.vlgmr.msra.gmra.mxu1 %v429_v53 }
 0x1e0   :  { %4348 = vmatpush3.bf16.msra.mxu0 %v4529_v36  ;;  %1768 = vmatprep.mubr.bf16.mxu1 %v6084_v27  ;;  %v5439_v36 = vld [vmem:[#allocation5 + $0x40] sm:$0xff]  }
 0x1e1   :  { %4349 = vmatprep.subr.bf16.mxu0 %v4530_v54  ;;  %1396 = vbcast.lane.b32.xlu0 %v1394_v16, 256  ;;  %v974_v53 = vunpack.c.h.bf16 %v5439_v36 }
 0x1e4   :  { %4350 = vmatpush3.bf16.msra.mxu0 %v4530_v54  ;;  %v975_v54 = vunpack.c.h.bf16 %v5441_v37 }
 0x1e5   :  { %4351 = vmatprep.subr.bf16.mxu0 %v4531_v55  ;;  %1354 = vbcast.lane.b32.xlu0 %v1352_v20, 256 }
 0x1e8   :  { %4352 = vmatpush3.bf16.msra.mxu0 %v4531_v55  ;;  %v976_v55 = vunpack.c.h.bf16 %v5443_v38 }
 0x1e9   :  { %4353 = vmatprep.subr.bf16.mxu0 %v4532_v56  ;;  %1410 = vbcast.lane.b32.xlu0 %v1408_v23, 256 }
 0x1ec   :  { %4354 = vmatpush3.bf16.msra.mxu0 %v4532_v56 }
 0x1ed   :  { %4355 = vmatprep.subr.bf16.mxu0 %v4533_v57 }
 0x1f0   :  { %4356 = vmatpush3.bf16.msra.mxu0 %v4533_v57 }
 0x1f1   :  { %4357 = vmatprep.subr.bf16.mxu0 %v4534_v58 }
 0x1f4   :  { %4358 = vmatpush3.bf16.msra.mxu0 %v4534_v58 }
 0x1f5   :  { %4359 = vmatprep.subr.bf16.mxu0 %v4535_v59 }
 0x1f8   :  { %4360 = vmatpush3.bf16.msra.mxu0 %v4535_v59 }
 0x1f9   :  { %4361 = vmatprep.subr.bf16.mxu0 %v4536_v60 }
 0x1fc   :  { %4362 = vmatpush3.bf16.msra.mxu0 %v4536_v60 }
 0x1fd   :  { %4379 = vmatprep.subr.bf16.mxu0 %v6086_v4 }
 0x29f   :  { %v5453_v42 = vpop.f32.mrf.mxu0  ;;  %v651_v43 = vpop.f32.mrf.mxu1 }
 0x2a0   :  { %v652_v45 = vadd.f32 %v651_v43, %v5431_v32 }
 0x2a1   :  { %v610_v56 = vpop.f32.mrf.mxu0  ;;  %v4345_v57 = vpop.f32.mrf.mxu1 }
 0x2a2   :  { %v872_v58 = vcombine.high %v652_v45, %v652_v45  ;;  %v879_v59 = vrot.slane %v652_v45, %v5445_v39  ;;  %v611_v60 = vadd.f32 %v610_v56, %v5448_v40  ;;  %v758_v57 = vunpack.c.l.bf16 %v5428_v31 }
 0x2a3   :  { %v654_v7 = vpop.f32.mrf.mxu1  ;;  %v5504_v4 = vpop.f32.mrf.mxu0 }
 0x2a4   :  { %v886_v14 = vrot.slane %v872_v58, %v5445_v39  ;;  %v887_v15 = vcombine.high %v879_v59, %v879_v59  ;;  %v895_v16 = vrot.slane %v879_v59, %v5445_v39  ;;  %v660_v19 = vcombine.high %v611_v60, %v611_v60 }
 0x2a5   :  { %v667_v20 = vrot.slane %v611_v60, %v5445_v39  ;;  %v4346_v25 = vpop.f32.mrf.mxu1  ;;  %v655_v61 = vadd.f32 %v654_v7, %v5431_v32  ;;  %v614_v7 = vpop.f32.mrf.mxu0 }
 0x2a6   :  { %v888_v26 = vcombine.high %v886_v14, %v886_v14  ;;  %v902_v28 = vrot.slane %v886_v14, %v5445_v39  ;;  %v909_v29 = vrot.slane %v887_v15, %v5445_v39  ;;  %v917_v30 = vcombine.high %v895_v16, %v895_v16 }
 0x2a7   :  { %v989_v43 = vrot.slane %v895_v16, %v5373_v63  ;;  %v674_v45 = vrot.slane %v660_v19, %v5445_v39  ;;  %v675_v56 = vcombine.high %v667_v20, %v667_v20  ;;  %v683_v16 = vrot.slane %v667_v20, %v5445_v39 }
 0x2a8   :  { %v5496_v58 = vrot.slane %v888_v26, %v5445_v39  ;;  %v918_v59 = vcombine.high %v902_v28, %v902_v28  ;;  %v919_v60 = vcombine.high %v909_v29, %v909_v29  ;;  %v993_v25 = vrot.slane %v909_v29, %v5373_v63 }
 0x2a9   :  { %v997_v27 = vrot.slane %v917_v30, %v5373_v63  ;;  %v1005_v14 = vrot.slane %v902_v28, %v5373_v63  ;;  %v5501_v15 = vadd.f32 %v989_v43, %v970_v46  ;;  %v676_v46 = vcombine.high %v674_v45, %v674_v45 }
 0x2aa   :  { %v1001_v19 = vrot.slane %v919_v60, %v5373_v63  ;;  %v1009_v31 = vrot.slane %v5496_v58, %v5373_v63  ;;  %v1013_v26 = vrot.slane %v918_v59, %v5373_v63  ;;  %v5511_v29 = vadd.f32 %v993_v25, %v971_v47 }
 0x2ab   :  { %v5513_v30 = vadd.f32 %v997_v27, %v972_v48  ;;  %v5515_v28 = vadd.f32 %v1005_v14, %v974_v53  ;;  %v759_v60 = vunpack.c.l.bf16 %v5433_v33  ;;  %v5525_v23 = vrot.slane %v674_v45, %v5445_v39 }
 0x2ac   :  { %v5517_v43 = vadd.f32 %v1001_v19, %v973_v52  ;;  %v5519_v20 = vadd.f32 %v1009_v31, %v975_v54  ;;  %v5521_v24 = vadd.f32 %v1013_v26, %v976_v55  ;;  %v697_v32 = vrot.slane %v675_v56, %v5445_v39 }
 0x2ad   :  { %v705_v47 = vcombine.high %v683_v16, %v683_v16  ;;  %v762_v27 = vunpack.c.l.bf16 %v5439_v36  ;;  %v921_v48 = vcombine.high %v655_v61, %v655_v61  ;;  %v928_v53 = vrot.slane %v655_v61, %v5445_v39 }
 0x2ae   :  { %v761_v52 = vunpack.c.l.bf16 %v5437_v35  ;;  %v763_v54 = vunpack.c.l.bf16 %v5441_v37  ;;  %v5534_v55 = vadd.f32 %v5453_v42, %v5451_v41  ;;  %v5537_v33 = vrot.slane %v676_v46, %v5445_v39 }
 0x2af   :  { %v707_v45 = vcombine.high %v697_v32, %v697_v32  ;;  %v777_v56 = vrot.slane %v683_v16, %v5373_v63  ;;  %v935_v59 = vrot.slane %v921_v48, %v5445_v39  ;;  %v936_v36 = vcombine.high %v928_v53, %v928_v53 }
 0x2b0   :  { %v944_v25 = vrot.slane %v928_v53, %v5445_v39  ;;  %v615_v61 = vadd.f32 %v614_v7, %v5448_v40  ;;  %v706_v35 = vcombine.high %v5525_v23, %v5525_v23  ;;  %v781_v37 = vrot.slane %v697_v32, %v5373_v63 }
 0x2b1   :  { %v785_v42 = vrot.slane %v705_v47, %v5373_v63  ;;  %v789_v14 = vrot.slane %v707_v45, %v5373_v63  ;;  %v937_v19 = vcombine.high %v935_v59, %v935_v59  ;;  %v951_v31 = vrot.slane %v935_v59, %v5445_v39 }
 0x2b2   :  { %v958_v16 = vrot.slane %v936_v36, %v5445_v39  ;;  %v966_v26 = vcombine.high %v944_v25, %v944_v25  ;;  %v1021_v46 = vrot.slane %v944_v25, %v5373_v63  ;;  %v709_v48 = vcombine.high %v615_v61, %v615_v61 }
 0x2b3   :  { %v716_v40 = vrot.slane %v615_v61, %v5445_v39  ;;  %v854_v7 = vadd.f32 %v777_v56, %v758_v57  ;;  %v5553_v53 = vrot.slane %v937_v19, %v5445_v39  ;;  %v967_v32 = vcombine.high %v951_v31, %v951_v31 }
 0x2b4   :  { %v968_v21 = vcombine.high %v958_v16, %v958_v16  ;;  %v1025_v47 = vrot.slane %v958_v16, %v5373_v63  ;;  %v1029_v45 = vrot.slane %v966_v26, %v5373_v63  ;;  %v1037_v59 = vrot.slane %v951_v31, %v5373_v63 }
 0x2b5   :  { %v5560_v36 = vadd.f32 %v1021_v46, %v978_v8  ;;  %v855_v25 = vadd.f32 %v781_v37, %v759_v60  ;;  %v1041_v57 = vrot.slane %v5553_v53, %v5373_v63  ;;  %v1045_v56 = vrot.slane %v967_v32, %v5373_v63 }
 0x2b6   :  { %v1033_v13 = vrot.slane %v968_v21, %v5373_v63  ;;  %v723_v61 = vrot.slane %v709_v48, %v5445_v39  ;;  %v5569_v19 = vadd.f32 %v1025_v47, %v979_v10  ;;  %v5573_v31 = vadd.f32 %v1029_v45, %v980_v11 }
 0x2b7   :  { %v6102_v8 = vunpack.c.h.bf16 %v5465_v51  ;;  %v724_v21 = vcombine.high %v716_v40, %v716_v40  ;;  %v793_v37 = vrot.slane %v5525_v23, %v5373_v63  ;;  %v6103_v16 = vunpack.c.h.bf16 %v5474_v62 }
 0x2b8   :  { %v6104_v46 = vunpack.c.h.bf16 %v5476_v5  ;;  %v6105_v48 = vunpack.c.h.bf16 %v5478_v6  ;;  %v708_v32 = vcombine.high %v5537_v33, %v5537_v33  ;;  %v6106_v47 = vunpack.c.l.bf16 %v5435_v34 }
 0x2b9   :  { %v5577_v60 = vadd.f32 %v1037_v59, %v6102_v8  ;;  %v5583_v26 = vadd.f32 %v1033_v13, %v6103_v16  ;;  %v746_v23 = vrot.slane %v724_v21, %v5445_v39  ;;  %v1082_v59 = vmul.f32 %v854_v7, %v5534_v55  ;;  %v265_v13 = vld [vmem:[#allocation5 + $0x70] sm:$0xf] }
 0x2ba   :  { %v5587_v10 = vadd.f32 %v1041_v57, %v6104_v46  ;;  %v5591_v11 = vadd.f32 %v1045_v56, %v6105_v48  ;;  %v856_v45 = vadd.f32 %v785_v42, %v6106_v47  ;;  %v732_v8 = vrot.slane %v716_v40, %v5445_v39 }
 0x2bb   :  { %v1083_v57 = vmul.f32 %v855_v25, %v5534_v55  ;;  %v857_v16 = vadd.f32 %v789_v14, %v761_v52  ;;  %v797_v56 = vrot.slane %v5537_v33, %v5373_v63  ;;  %v725_v46 = vcombine.high %v723_v61, %v723_v61 }
 0x2bc   :  { %v764_v48 = vunpack.c.l.bf16 %v5443_v38  ;;  %v813_v22 = vrot.slane %v746_v23, %v5373_v63  ;;  %v765_v42 = vunpack.c.l.bf16 %v265_v13  ;;  %v767_v21 = vunpack.c.l.bf16 %v5461_v49 }
 0x2bd   :  { %v4243_v34 = vpack.c.bf16 %v1083_v57, %v1082_v59  ;;  %v1084_v7 = vmul.f32 %v856_v45, %v5534_v55  ;;  %v1085_v47 = vmul.f32 %v857_v16, %v5534_v55  ;;  %v858_v40 = vadd.f32 %v793_v37, %v762_v27 }
 0x2be   :  { %v766_v25 = vunpack.c.l.bf16 %v5455_v44  ;;  %v809_v52 = vrot.slane %v732_v8, %v5373_v63  ;;  %v859_v33 = vadd.f32 %v797_v56, %v763_v54  ;;  %v801_v14 = vrot.slane %v706_v35, %v5373_v63 }
 0x2bf   :  { %4363 = vmatprep.mubr.bf16.mxu0 %v4243_v34  ;;  %v805_v38 = vrot.slane %v708_v32, %v5373_v63  ;;  %v753_v59 = vrot.slane %v725_v46, %v5445_v39  ;;  %v756_v13 = vcombine.high %v746_v23, %v746_v23  ;;  %v4244_v57 = vpack.c.bf16 %v1085_v47, %v1084_v7 }
 0x2c0   :  { %v1086_v49 = vmul.f32 %v858_v40, %v5534_v55  ;;  %v1087_v45 = vmul.f32 %v859_v33, %v5534_v55  ;;  %v863_v27 = vadd.f32 %v813_v22, %v767_v21  ;;  %v754_v37 = vcombine.high %v732_v8, %v732_v8  ;;  %v273_v33 = vld [vmem:[#allocation5 + $0xf0] sm:$0xf] }
 0x2c1   :  { %v861_v16 = vadd.f32 %v805_v38, %v765_v42  ;;  %4364 = vmatmul.mubr.bf16.vlgmr.msra.gmra.mxu0 %v4244_v57  ;;  %v860_v44 = vadd.f32 %v801_v14, %v764_v48  ;;  %v613_v54 = vadd.f32 %v5504_v4, %v5451_v41  ;;  %v739_v35 = vrot.slane %v723_v61, %v5445_v39 }
 0x2c2   :  { %v4245_v56 = vpack.c.bf16 %v1087_v45, %v1086_v49  ;;  %v862_v32 = vadd.f32 %v809_v52, %v766_v25  ;;  %v769_v23 = vunpack.c.l.bf16 %v5474_v62  ;;  %v821_v34 = vrot.slane %v756_v13, %v5373_v63 }
 0x2c3   :  { %v1089_v46 = vmul.f32 %v861_v16, %v5534_v55  ;;  %v1091_v7 = vmul.f32 %v863_v27, %v613_v54  ;;  %v771_v22 = vunpack.c.l.bf16 %v5476_v5  ;;  %v829_v8 = vrot.slane %v753_v59, %v5373_v63 }
 0x2c4   :  { %4367 = vmatprep.mubr.bf16.mxu0 %v4245_v56  ;;  %v817_v48 = vrot.slane %v754_v37, %v5373_v63  ;;  %v1088_v4 = vmul.f32 %v860_v44, %v5534_v55  ;;  %v768_v41 = vunpack.c.l.bf16 %v5463_v50  ;;  %v825_v61 = vrot.slane %v739_v35, %v5373_v63 }
 0x2c5   :  { %v1090_v42 = vmul.f32 %v862_v32, %v613_v54  ;;  %v770_v21 = vunpack.c.l.bf16 %v5465_v51  ;;  %v757_v62 = vcombine.high %v753_v59, %v753_v59  ;;  %v865_v40 = vadd.f32 %v821_v34, %v769_v23  ;;  %v4539_v23 = vld [vmem:[#allocation16 + $0xac] ss:$12 sps:$4 sm:$0xff]   ;;  %v4537_v34 = vld [vmem:[#allocation16 + $0xa8] ss:$12 sps:$4 sm:$0xff]  }
 0x2c6   :  { %v4246_v47 = vpack.c.bf16 %v1089_v46, %v1088_v4  ;;  %v867_v52 = vadd.f32 %v829_v8, %v771_v22  ;;  %v755_v5 = vcombine.high %v739_v35, %v739_v35  ;;  %v864_v14 = vadd.f32 %v817_v48, %v768_v41  ;;  %1736 = vmatprep.subr.bf16.mxu1 %v4539_v23  ;;  %v4541_v22 = vld [vmem:[#allocation16 + $0x90] ss:$12 sps:$4 sm:$0xff]   ;;  %v4544_v8 = vld [vmem:[#allocation16 + $0x98] ss:$12 sps:$4 sm:$0xff]   ;;  %v4548_v4 = vld [vmem:[#allocation16 + $0x80] ss:$12 sps:$4 sm:$0xff]  }
 0x2c7   :  { %v4247_v25 = vpack.c.bf16 %v1091_v7, %v1090_v42  ;;  %v866_v38 = vadd.f32 %v825_v61, %v770_v21  ;;  %v1093_v13 = vmul.f32 %v865_v40, %v613_v54  ;;  %v773_v55 = vunpack.c.l.bf16 %v273_v33  ;;  %v4540_v7 = vld [vmem:[#allocation16 + $0xb0] ss:$12 sps:$4 sm:$0xff]   ;;  %1737 = vmatpush1.bf16.msra.mxu1 %v4537_v34  ;;  %v4545_v48 = vld [vmem:[#allocation16 + $0x78] ss:$12 sps:$4 sm:$0xff]   ;;  %v4549_v61 = vld [vmem:[#allocation16 + $0x60] ss:$12 sps:$4 sm:$0xff]  }
 0x2c8   :  { %v837_v50 = vrot.slane %v757_v62, %v5373_v63  ;;  %v1095_v57 = vmul.f32 %v867_v52, %v613_v54  ;;  %v1092_v49 = vmul.f32 %v864_v14, %v613_v54  ;;  %v772_v45 = vunpack.c.l.bf16 %v5478_v6  ;;  %4380 = vmatpush3.bf16.msra.mxu0 %v4540_v7  ;;  %v4543_v6 = vld [vmem:[#allocation16 + $0x94] ss:$12 sps:$4 sm:$0xff]   ;;  %v4551_v41 = vld [vmem:[#allocation16 + $0x64] ss:$12 sps:$4 sm:$0xff]   ;;  %v4555_v21 = vld [vmem:[#allocation16 + $0x4c] ss:$12 sps:$4 sm:$0xff]  }
 0x2c9   :  { %4368 = vmatmul.mubr.bf16.gmra.mxu0 %v4246_v47  ;;  %v833_v51 = vrot.slane %v755_v5, %v5373_v63  ;;  %v1094_v59 = vmul.f32 %v866_v38, %v613_v54  ;;  %v6107_v46 = vmov 0.0   ;;  %1738 = vmatprep.subr.bf16.mxu1 %v4543_v6  ;;  %v4552_v42 = vld [vmem:[#allocation16 + $0x68] ss:$12 sps:$4 sm:$0xff]   ;;  %v4556_v47 = vld [vmem:[#allocation16 + $0x50] ss:$12 sps:$4 sm:$0xff]   ;;  %v1320_v5 = vpop.permute.xlu1 %1319 }
 0x2ca   :  { %4371 = vmatprep.mubr.bf16.mxu0 %v4247_v25  ;;  %v4248_v16 = vpack.c.bf16 %v1093_v13, %v1092_v49  ;;  %v869_v27 = vadd.f32 %v837_v50, %v773_v55  ;;  %4381 = vmatprep.subr.bf16.mxu0 %v6107_v46  ;;  %v4553_v62 = vld [vmem:[#allocation16 + $0x48] ss:$12 sps:$4 sm:$0xff]   ;;  %v4557_v25 = vld [vmem:[#allocation16 + $0x30] ss:$12 sps:$4 sm:$0xff]   ;;  %v4560_v52 = vld [vmem:[#allocation16 + $0x38] ss:$12 sps:$4 sm:$0xff]  }
 0x2cb   :  { %v4249_v37 = vpack.c.bf16 %v1095_v57, %v1094_v59  ;;  %v868_v44 = vadd.f32 %v833_v51, %v772_v45  ;;  %1739 = vmatpush1.bf16.msra.mxu1 %v4541_v22  ;;  %v4559_v40 = vld [vmem:[#allocation16 + $0x34] ss:$12 sps:$4 sm:$0xff]   ;;  %v4563_v33 = vld [vmem:[#allocation16 + $0x1c] ss:$12 sps:$4 sm:$0xff]   ;;  %v4561_v14 = vld [vmem:[#allocation16 + $0x18] ss:$12 sps:$4 sm:$0xff]   ;;  %v1313_v51 = vpop.permute.xlu0 %1312 }
 0x2cc   :  { %v1097_v35 = vmul.f32 %v869_v27, %v613_v54  ;;  %4382 = vmatpush3.bf16.msra.mxu0 %v4544_v8  ;;  %v4564_v38 = vld [vmem:[#allocation16 + $0x20] ss:$12 sps:$4 sm:$0xff]   ;;  %v4567_v13 = vld [vmem:[#allocation16 + $0x4] ss:$12 sps:$4 sm:$0xff]   ;;  %v4568_v57 = vld [vmem:[#allocation16 + $0x8] ss:$12 sps:$4 sm:$0xff]  }
 0x2cd   :  { %v1096_v56 = vmul.f32 %v868_v44, %v613_v54  ;;  %v4547_v54 = vld [vmem:[#allocation16 + $0x7c] ss:$12 sps:$4 sm:$0xff]   ;;  %4383 = vmatprep.subr.bf16.mxu0 %v6107_v46  ;;  %v1327_v55 = vpop.permute.xlu1 %1326  ;;  %v4565_v50 = vld [vmem:[#allocation16] ss:$12 sps:$4 sm:$0xff]   ;;  %v4571_v49 = vld [vmem:[#allocation17 + $0xe4] ss:$16 sps:$4 sm:$0xff]  }
 0x2ce   :  { %1740 = vmatprep.subr.bf16.mxu1 %v4547_v54  ;;  %v4574_v45 = vld [vmem:[#allocation17 + $0xec] ss:$16 sps:$4 sm:$0xff]   ;;  %vm1419_vm1 = vcmp.gt.f32.partialorder %v1313_v51, 0.5  ;;  %vm1421_vm2 = vcmp.gt.f32.partialorder %v1327_v55, 0.5  ;;  %vm1420_vm4 = vcmp.gt.f32.partialorder %v1320_v5, 0.5 }
 0x2cf   :  { %v4250_v32 = vpack.c.bf16 %v1097_v35, %v1096_v56  ;;  %1741 = vmatpush1.bf16.msra.mxu1 %v4545_v48 }
 0x2d0   :  { %4384 = vmatpush3.bf16.msra.mxu0 %v4548_v4  ;;  %1742 = vmatprep.subr.bf16.mxu1 %v4551_v41  ;;  %v2135_v41 = vsel %vm2134_vm5, %v5377_v1, -inf }
 0x2d1   :  { %4372 = vmatmul.mubr.bf16.gmra.mxu0 %v4248_v16  ;;  %4385 = vmatprep.subr.bf16.mxu0 %v6107_v46  ;;  %v1334_v59 = vpop.permute.xlu1 %1333  ;;  %v5640_v16 = vpop.permute.xlu0 %1368 }
 0x2d2   :  { %4375 = vmatprep.mubr.bf16.mxu0 %v4249_v37  ;;  %vm1422_vm6 = vcmp.gt.f32.partialorder %v1334_v59, 0.5  ;;  %vm1427_vm11 = vcmp.gt.f32.partialorder %v5640_v16, 0.5 }
 0x2d3   :  { %1743 = vmatpush1.bf16.msra.mxu1 %v4549_v61  ;;  %v2142_v61 = vsel %vm2134_vm5, %v5379_v2, -inf }
 0x2d4   :  { %4386 = vmatpush3.bf16.msra.mxu0 %v4552_v42  ;;  %1744 = vmatprep.subr.bf16.mxu1 %v4555_v21 }
 0x2d5   :  { %4387 = vmatprep.subr.bf16.mxu0 %v6107_v46  ;;  %v5642_v27 = vpop.permute.xlu1 %1375  ;;  %v5644_v37 = vpop.permute.xlu0 %1382 }
 0x2d6   :  { %vm1429_vm10 = vcmp.gt.f32.partialorder %v5644_v37, 0.5  ;;  %vm1428_vm12 = vcmp.gt.f32.partialorder %v5642_v27, 0.5 }
 0x2d7   :  { %1745 = vmatpush1.bf16.msra.mxu1 %v4553_v62 }
 0x2d8   :  { %4388 = vmatpush3.bf16.msra.mxu0 %v4556_v47  ;;  %1746 = vmatprep.subr.bf16.mxu1 %v4559_v40  ;;  %v2136_v40 = vrot.slane %v2135_v41, 4 }
 0x2d9   :  { %4376 = vmatmul.mubr.bf16.gmra.mxu0 %v4250_v32  ;;  %4389 = vmatprep.subr.bf16.mxu0 %v6107_v46  ;;  %v5646_v44 = vpop.permute.xlu1 %1389  ;;  %v1341_v35 = vpop.permute.xlu0 %1340 }
 0x2da   :  { %4395 = vmatprep.mubr.msk.bf16.mxu0 %vm5178_vm0, %v6107_v46  ;;  %vm1423_vm3 = vcmp.gt.f32.partialorder %v1341_v35, 0.5  ;;  %vm1430_vm14 = vcmp.gt.f32.partialorder %v5646_v44, 0.5 }
 0x2db   :  { %1747 = vmatpush1.bf16.msra.mxu1 %v4557_v25  ;;  %v2143_v25 = vrot.slane %v2142_v61, 4 }
 0x2dc   :  { %4390 = vmatpush3.bf16.msra.mxu0 %v4560_v52  ;;  %1748 = vmatprep.subr.bf16.mxu1 %v4563_v33 }
 0x2dd   :  { %4391 = vmatprep.subr.bf16.mxu0 %v6107_v46  ;;  %v1348_v56 = vpop.permute.xlu1 %1347  ;;  %v5648_v7 = vpop.permute.xlu0 %1396 }
 0x2de   :  { %vm1424_vm7 = vcmp.gt.f32.partialorder %v1348_v56, 0.5  ;;  %vm1431_vm13 = vcmp.gt.f32.partialorder %v5648_v7, 0.5 }
 0x2df   :  { %1749 = vmatpush1.bf16.msra.mxu1 %v4561_v14  ;;  %v2137_v14 = vmax.f32 %v2135_v41, %v2136_v40 }
 0x2e0   :  { %4392 = vmatpush3.bf16.msra.mxu0 %v4564_v38  ;;  %1750 = vmatprep.subr.bf16.mxu1 %v4567_v13  ;;  %v2144_v38 = vmax.f32 %v2142_v61, %v2143_v25 }
 0x2e1   :  { %4393 = vmatprep.subr.bf16.mxu0 %v6107_v46  ;;  %v5650_v6 = vpop.permute.xlu1 %1403  ;;  %v1355_v21 = vpop.permute.xlu0 %1354 }
 0x2e2   :  { %vm1425_vm8 = vcmp.gt.f32.partialorder %v1355_v21, 0.5  ;;  %vm1432_vm15 = vcmp.gt.f32.partialorder %v5650_v6, 0.5 }
 0x2e3   :  { %1751 = vmatpush1.bf16.msra.mxu1 %v4565_v50  ;;  %v2138_v50 = vrot.slane %v2137_v14, 2 }
 0x2e4   :  { %4394 = vmatpush3.bf16.msra.mxu0 %v4568_v57  ;;  %2002 = vmatprep.subr.bf16.mxu1 %v4571_v49  ;;  %v2145_v57 = vrot.slane %v2144_v38, 2 }
 0x2e5   :  { %2045 = vmatprep.subr.bf16.mxu0 %v4574_v45  ;;  %v1362_v47 = vpop.permute.xlu1 %1361  ;;  %v2139_v35 = vmax.f32 %v2137_v14, %v2138_v50 }
 0x2e6   :  { %vm1426_vm9 = vcmp.gt.f32.partialorder %v1362_v47, 0.5  ;;  %v2146_v56 = vmax.f32 %v2144_v38, %v2145_v57  ;;  %v1411_v57 = vpop.permute.xlu0 %1410 }
 0x381   :  { %v4365_v32 = vpop.f32.mrf.mxu0 }
 0x382   :  { %v1469_v48 = vsel %vm1421_vm2, %v4365_v32, -3.4028235e+38 }
 0x383   :  { %v1244_v23 = vpop.f32.mrf.mxu0 }
 0x384   :  { %v1467_v54 = vsel %vm1419_vm1, %v1244_v23, -3.4028235e+38  ;;  %vm1433_vm1 = vcmp.gt.f32.partialorder %v1411_v57, 0.5 }
 0x385   :  { %v4366_v34 = vpop.f32.mrf.mxu0  ;;  %v1483_v52 = vmax.f32 %v1467_v54, %v1469_v48 }
 0x386   :  { %v1470_v5 = vsel %vm1422_vm6, %v4366_v34, -3.4028235e+38 }
 0x387   :  { %v1247_v22 = vpop.f32.mrf.mxu0 }
 0x388   :  { %v1468_v42 = vsel %vm1420_vm4, %v1247_v22, -3.4028235e+38  ;;  %v2140_v22 = vrot.slane %v2139_v35, 1 }
 0x389   :  { %v4369_v8 = vpop.f32.mrf.mxu0  ;;  %v1484_v13 = vmax.f32 %v1468_v42, %v1470_v5 }
 0x38a   :  { %v1473_v51 = vsel %vm1425_vm8, %v4369_v8, -3.4028235e+38  ;;  %v2141_v21 = vmax.f32 %v2139_v35, %v2140_v22 }
 0x38b   :  { %v1260_v4 = vpop.f32.mrf.mxu0 }
 0x38c   :  { %v5656_v62 = vsel %vm1423_vm3, %v1260_v4, -3.4028235e+38  ;;  %v2147_v4 = vrot.slane %v2146_v56, 1  ;;  %2150 = vbcast.lane.b32.xlu0 %v2141_v21, 256 }
 0x38d   :  { %v4370_v33 = vpop.f32.mrf.mxu0  ;;  %v1485_v1 = vmax.f32 %v1483_v52, %v5656_v62 }
 0x38e   :  { %v5659_v59 = vsel %vm1426_vm9, %v4370_v33, -3.4028235e+38  ;;  %v2148_v8 = vmax.f32 %v2146_v56, %v2147_v4 }
 0x38f   :  { %v1263_v55 = vpop.f32.mrf.mxu0  ;;  %v1487_v32 = vmax.f32 %v1485_v1, %v1473_v51 }
 0x390   :  { %v1472_v2 = vsel %vm1424_vm7, %v1263_v55, -3.4028235e+38  ;;  %2153 = vbcast.lane.b32.xlu1 %v2148_v8, 256 }
 0x391   :  { %v1486_v49 = vmax.f32 %v1484_v13, %v1472_v2  ;;  %v4373_v45 = vpop.f32.mrf.mxu0 }
 0x393   :  { %v1488_v23 = vmax.f32 %v1486_v49, %v5659_v59  ;;  %v1276_v34 = vpop.f32.mrf.mxu0  ;;  %v1418_v49 = vpop.permute.xlu1 %1417 }
 0x394   :  { %v1475_v50 = vsel %vm1427_vm11, %v1276_v34, -3.4028235e+38  ;;  %vm1434_vm2 = vcmp.gt.f32.partialorder %v1418_v49, 0.5 }
 0x395   :  { %v1489_v41 = vmax.f32 %v1487_v32, %v1488_v23  ;;  %v4374_v61 = vpop.f32.mrf.mxu0 }
 0x396   :  { %v1478_v56 = vsel %vm1430_vm14, %v4374_v61, -3.4028235e+38 }
 0x397   :  { %v1497_v47 = vsub.f32 %v1467_v54, %v1489_v41  ;;  %v1498_v40 = vsub.f32 %v1468_v42, %v1489_v41  ;;  %v1499_v25 = vsub.f32 %v1469_v48, %v1489_v41  ;;  %v1500_v52 = vsub.f32 %v1470_v5, %v1489_v41  ;;  %v1279_v13 = vpop.f32.mrf.mxu0 }
 0x398   :  { %v1501_v1 = vsub.f32 %v5656_v62, %v1489_v41  ;;  %v1477_v48 = vsel %vm1429_vm10, %v4373_v45, -3.4028235e+38  ;;  %v1502_v37 = vsub.f32 %v1472_v2, %v1489_v41  ;;  %v1476_v5 = vsel %vm1428_vm12, %v1279_v13, -3.4028235e+38 }
 0x399   :  { %v1513_v33 = vmul.f32 1.442695, %v1497_v47  ;;  %v1515_v14 = vmul.f32 1.442695, %v1498_v40  ;;  %v4377_v38 = vpop.f32.mrf.mxu0  ;;  %v1517_v55 = vmul.f32 1.442695, %v1499_v25  ;;  %v1490_v27 = vmax.f32 %v1475_v50, %v1477_v48 }
 0x39a   :  { %v1519_v54 = vmul.f32 1.442695, %v1500_v52  ;;  %v1503_v35 = vsub.f32 %v1473_v51, %v1489_v41  ;;  %v1521_v7 = vmul.f32 1.442695, %v1501_v1  ;;  %v1491_v32 = vmax.f32 %v1476_v5, %v1478_v56 }
 0x39b   :  { %4733 = vpow2.f32 %v1513_v33  ;;  %v1292_v42 = vpop.f32.mrf.mxu0  ;;  %v1504_v23 = vsub.f32 %v5659_v59, %v1489_v41  ;;  %v1523_v34 = vmul.f32 1.442695, %v1502_v37  ;;  %v1481_v6 = vsel %vm1433_vm1, %v4377_v38, -3.4028235e+38 }
 0x39c   :  { %4735 = vpow2.f32 %v1515_v14  ;;  %v1479_v16 = vsel %vm1431_vm13, %v1292_v42, -3.4028235e+38  ;;  %v1525_v44 = vmul.f32 1.442695, %v1503_v35 }
 0x39d   :  { %v4378_v62 = vpop.f32.mrf.mxu0  ;;  %4737 = vpow2.f32 %v1517_v55  ;;  %v1492_v45 = vmax.f32 %v1490_v27, %v1479_v16  ;;  %v1527_v40 = vmul.f32 1.442695, %v1504_v23 }
 0x39e   :  { %4739 = vpow2.f32 %v1519_v54  ;;  %v1482_v21 = vsel %vm1434_vm2, %v4378_v62, -3.4028235e+38 }
 0x39f   :  { %v1295_v2 = vpop.f32.mrf.mxu0  ;;  %4741 = vpow2.f32 %v1521_v7  ;;  %v1494_v47 = vmax.f32 %v1492_v45, %v1481_v6 }
 0x3a0   :  { %v1480_v22 = vsel %vm1432_vm15, %v1295_v2, -3.4028235e+38  ;;  %4743 = vpow2.f32 %v1523_v34 }
 0x3a1   :  { %v1493_v4 = vmax.f32 %v1491_v32, %v1480_v22  ;;  %4745 = vpow2.f32 %v1525_v44 }
 0x3a2   :  { %4747 = vpow2.f32 %v1527_v40 }
 0x3a3   :  { %v1495_v51 = vmax.f32 %v1493_v4, %v1482_v21 }
 0x3a5   :  { %v1496_v61 = vmax.f32 %v1494_v47, %v1495_v51 }
 0x3a7   :  { %v1505_v25 = vsub.f32 %v1475_v50, %v1496_v61  ;;  %v1506_v52 = vsub.f32 %v1476_v5, %v1496_v61  ;;  %v1507_v13 = vsub.f32 %v1477_v48, %v1496_v61  ;;  %v1508_v59 = vsub.f32 %v1478_v56, %v1496_v61 }
 0x3a8   :  { %v4734_v8 = vpop.eup %4733  ;;  %v1509_v55 = vsub.f32 %v1479_v16, %v1496_v61  ;;  %v1510_v37 = vsub.f32 %v1480_v22, %v1496_v61  ;;  %v1511_v50 = vsub.f32 %v1481_v6, %v1496_v61  ;;  %v1512_v62 = vsub.f32 %v1482_v21, %v1496_v61 }
 0x3a9   :  { %v4736_v41 = vpop.eup %4735  ;;  %v1529_v33 = vmul.f32 1.442695, %v1505_v25  ;;  %v1531_v14 = vmul.f32 1.442695, %v1506_v52  ;;  %v1533_v54 = vmul.f32 1.442695, %v1507_v13 }
 0x3aa   :  { %v1545_v1 = vadd.f32 %v4736_v41, %v4734_v8  ;;  %v4738_v38 = vpop.eup %4737  ;;  %v1535_v57 = vmul.f32 1.442695, %v1508_v59  ;;  %v1537_v48 = vmul.f32 1.442695, %v1509_v55  ;;  %v1539_v7 = vmul.f32 1.442695, %v1510_v37 }
 0x3ab   :  { %4749 = vpow2.f32 %v1529_v33  ;;  %v4740_v49 = vpop.eup %4739  ;;  %v1541_v16 = vmul.f32 1.442695, %v1511_v50  ;;  %v1543_v2 = vmul.f32 1.442695, %v1512_v62 }
 0x3ac   :  { %v1546_v42 = vadd.f32 %v4738_v38, %v1545_v1  ;;  %4751 = vpow2.f32 %v1531_v14  ;;  %v4742_v5 = vpop.eup %4741 }
 0x3ad   :  { %4753 = vpow2.f32 %v1533_v54  ;;  %v4744_v56 = vpop.eup %4743 }
 0x3ae   :  { %v1547_v27 = vadd.f32 %v4740_v49, %v1546_v42  ;;  %4755 = vpow2.f32 %v1535_v57  ;;  %v4746_v45 = vpop.eup %4745 }
 0x3af   :  { %4757 = vpow2.f32 %v1537_v48  ;;  %v4748_v34 = vpop.eup %4747 }
 0x3b0   :  { %v1548_v35 = vadd.f32 %v4742_v5, %v1547_v27  ;;  %4759 = vpow2.f32 %v1539_v7 }
 0x3b1   :  { %4761 = vpow2.f32 %v1541_v16 }
 0x3b2   :  { %v1549_v32 = vadd.f32 %v4744_v56, %v1548_v35  ;;  %4763 = vpow2.f32 %v1543_v2  ;;  %v920_v2 = vcombine.high %v5496_v58, %v5496_v58 }
 0x3b4   :  { %v1550_v23 = vadd.f32 %v4746_v45, %v1549_v32 }
 0x3b6   :  { %v1551_v22 = vadd.f32 %v4748_v34, %v1550_v23 }
 0x3b8   :  { %v4750_v4 = vpop.eup %4749  ;;  %4765 = vrcp.f32 %v1551_v22 }
 0x3b9   :  { %v4752_v44 = vpop.eup %4751 }
 0x3ba   :  { %v1552_v6 = vadd.f32 %v4752_v44, %v4750_v4  ;;  %v4754_v21 = vpop.eup %4753 }
 0x3bb   :  { %v4756_v51 = vpop.eup %4755 }
 0x3bc   :  { %v1553_v47 = vadd.f32 %v4754_v21, %v1552_v6  ;;  %v4758_v61 = vpop.eup %4757 }
 0x3bd   :  { %v4760_v52 = vpop.eup %4759 }
 0x3be   :  { %v1554_v40 = vadd.f32 %v4756_v51, %v1553_v47  ;;  %v4762_v59 = vpop.eup %4761 }
 0x3bf   :  { %v4764_v33 = vpop.eup %4763 }
 0x3c0   :  { %v1555_v25 = vadd.f32 %v4758_v61, %v1554_v40 }
 0x3c2   :  { %v1556_v13 = vadd.f32 %v4760_v52, %v1555_v25 }
 0x3c4   :  { %v1557_v14 = vadd.f32 %v4762_v59, %v1556_v13 }
 0x3c5   :  { %v4766_v1 = vpop.eup %4765 }
 0x3c6   :  { %v1558_v55 = vadd.f32 %v4764_v33, %v1557_v14  ;;  %v1561_v54 = vmul.f32 %v4766_v1, %v4734_v8  ;;  %v1562_v42 = vmul.f32 %v4766_v1, %v4736_v41  ;;  %v1563_v37 = vmul.f32 %v4766_v1, %v4738_v38 }
 0x3c7   :  { %v1564_v57 = vmul.f32 %v4766_v1, %v4740_v49  ;;  %v1565_v48 = vmul.f32 %v4766_v1, %v4742_v5  ;;  %v1566_v7 = vmul.f32 %v4766_v1, %v4744_v56  ;;  %v1567_v8 = vmul.f32 %v4766_v1, %v4746_v45  ;;  %v281_v49 = vld [vmem:[#allocation5 + $0x74] sm:$0xf] }
 0x3c8   :  { %4767 = vrcp.f32 %v1558_v55  ;;  %v1577_v27 = vmul.f32 %v1561_v54, %v5501_v15  ;;  %v1578_v50 = vmul.f32 %v1562_v42, %v5511_v29  ;;  %v1579_v62 = vmul.f32 %v1563_v37, %v5513_v30  ;;  %v289_v55 = vld [vmem:[#allocation5 + $0xf4] sm:$0xf] }
 0x3c9   :  { %v1580_v32 = vmul.f32 %v1564_v57, %v5517_v43  ;;  %v1581_v41 = vmul.f32 %v1565_v48, %v5515_v28  ;;  %v1582_v15 = vmul.f32 %v1566_v7, %v5519_v20  ;;  %v1017_v29 = vrot.slane %v920_v2, %v5373_v63  ;;  %v4581_v2 = vld [vmem:[#allocation17 + $0xa0] ss:$16 sps:$4 sm:$0xff]  }
 0x3ca   :  { %v1593_v35 = vadd.f32 %v1578_v50, %v1577_v27  ;;  %v977_v5 = vunpack.c.l.bf16 %v281_v49  ;;  %v1583_v30 = vmul.f32 %v1567_v8, %v5521_v24  ;;  %v1568_v22 = vmul.f32 %v4766_v1, %v4748_v34  ;;  %v4584_v8 = vld [vmem:[#allocation17 + $0xa8] ss:$16 sps:$4 sm:$0xff]   ;;  %v4587_v49 = vld [vmem:[#allocation17 + $0x80] ss:$16 sps:$4 sm:$0xff]  }
 0x3cb   :  { %v969_v14 = vcombine.high %v5553_v53, %v5553_v53 }
 0x3cc   :  { %v1594_v16 = vadd.f32 %v1593_v35, %v1579_v62  ;;  %v1073_v47 = vadd.f32 %v1017_v29, %v977_v5  ;;  %v4572_v35 = vld [vmem:[#allocation17 + $0xe8] ss:$16 sps:$4 sm:$0xff]   ;;  %v4598_v29 = vld [vmem:[#allocation17 + $0x6c] ss:$16 sps:$4 sm:$0xff]   ;;  %v4593_v5 = vld [vmem:[#allocation17 + $0x60] ss:$16 sps:$4 sm:$0xff]  }
 0x3ce   :  { %v1595_v38 = vadd.f32 %v1594_v16, %v1580_v32  ;;  %v1584_v28 = vmul.f32 %v1568_v22, %v1073_v47  ;;  %v4577_v32 = vld [vmem:[#allocation17 + $0xc4] ss:$16 sps:$4 sm:$0xff]   ;;  %v4580_v16 = vld [vmem:[#allocation17 + $0xcc] ss:$16 sps:$4 sm:$0xff]  }
 0x3cf   :  { %v4604_v22 = vld [vmem:[#allocation17 + $0x4c] ss:$16 sps:$4 sm:$0xff]   ;;  %v4607_v47 = vld [vmem:[#allocation17 + $0x24] ss:$16 sps:$4 sm:$0xff]  }
 0x3d0   :  { %v1596_v23 = vadd.f32 %v1595_v38, %v1581_v41  ;;  %v4589_v41 = vld [vmem:[#allocation17 + $0x84] ss:$16 sps:$4 sm:$0xff]   ;;  %v4592_v38 = vld [vmem:[#allocation17 + $0x8c] ss:$16 sps:$4 sm:$0xff]  }
 0x3d2   :  { %v1597_v56 = vadd.f32 %v1596_v23, %v1582_v15  ;;  %v4590_v15 = vld [vmem:[#allocation17 + $0x88] ss:$16 sps:$4 sm:$0xff]   ;;  %v4595_v23 = vld [vmem:[#allocation17 + $0x64] ss:$16 sps:$4 sm:$0xff]  }
 0x3d4   :  { %v1598_v43 = vadd.f32 %v1597_v56, %v1583_v30  ;;  %v4596_v30 = vld [vmem:[#allocation17 + $0x68] ss:$16 sps:$4 sm:$0xff]   ;;  %v4601_v56 = vld [vmem:[#allocation17 + $0x44] ss:$16 sps:$4 sm:$0xff]  }
 0x3d5   :  { %v4768_v6 = vpop.eup %4767 }
 0x3d6   :  { %v1569_v40 = vmul.f32 %v4768_v6, %v4750_v4  ;;  %v1570_v58 = vmul.f32 %v4768_v6, %v4752_v44  ;;  %v1571_v45 = vmul.f32 %v4768_v6, %v4754_v21  ;;  %v1572_v25 = vmul.f32 %v4768_v6, %v4756_v51 }
 0x3d7   :  { %v1573_v54 = vmul.f32 %v4768_v6, %v4758_v61  ;;  %v1599_v34 = vadd.f32 %v1598_v43, %v1584_v28  ;;  %v1574_v42 = vmul.f32 %v4768_v6, %v4760_v52  ;;  %v985_v21 = vunpack.c.l.bf16 %v289_v55  ;;  %v4599_v43 = vld [vmem:[#allocation17 + $0x40] ss:$16 sps:$4 sm:$0xff]   ;;  %v4616_v28 = vld [vmem:[#allocation17 + $0xc] ss:$16 sps:$4 sm:$0xff]   ;;  %v5694_v55 = vld [vmem:[#allocation2 + $0x8] sm:$0xff] }
 0x3d8   :  { %v1585_v13 = vmul.f32 %v1569_v40, %v5560_v36  ;;  %v1586_v20 = vmul.f32 %v1570_v58, %v5569_v19  ;;  %v1587_v24 = vmul.f32 %v1571_v45, %v5573_v31  ;;  %v1588_v4 = vmul.f32 %v1572_v25, %v5583_v26  ;;  %v4569_v26 = vld [vmem:[#allocation17 + $0xe0] ss:$16 sps:$4 sm:$0xff]   ;;  %v4610_v40 = vld [vmem:[#allocation17 + $0x2c] ss:$16 sps:$4 sm:$0xff]   ;;  %v4608_v45 = vld [vmem:[#allocation17 + $0x28] ss:$16 sps:$4 sm:$0xff]  }
 0x3d9   :  { %v1049_v51 = vrot.slane %v969_v14, %v5373_v63  ;;  %v1575_v37 = vmul.f32 %v4768_v6, %v4762_v59  ;;  %v1589_v36 = vmul.f32 %v1573_v54, %v5577_v60  ;;  %v1576_v57 = vmul.f32 %v4768_v6, %v4764_v33  ;;  %v4575_v60 = vld [vmem:[#allocation17 + $0xc0] ss:$16 sps:$4 sm:$0xff]   ;;  %v4578_v59 = vld [vmem:[#allocation17 + $0xc8] ss:$16 sps:$4 sm:$0xff]   ;;  %v4586_v33 = vld [vmem:[#allocation17 + $0xac] ss:$16 sps:$4 sm:$0xff]  }
 0x3da   :  { %v1600_v1 = vadd.f32 %v1586_v20, %v1585_v13  ;;  %v1590_v53 = vmul.f32 %v1574_v42, %v5587_v10  ;;  %v4583_v10 = vld [vmem:[#allocation17 + $0xa4] ss:$16 sps:$4 sm:$0xff]   ;;  %v4602_v6 = vld [vmem:[#allocation17 + $0x48] ss:$16 sps:$4 sm:$0xff]   ;;  %v4605_v58 = vld [vmem:[#allocation17 + $0x20] ss:$16 sps:$4 sm:$0xff]  }
 0x3db   :  { %v1081_v61 = vadd.f32 %v1049_v51, %v985_v21  ;;  %v1591_v31 = vmul.f32 %v1575_v37, %v5591_v11  ;;  %v6108_v11 = vmov 0   ;;  %v4613_v25 = vld [vmem:[#allocation17 + $0x4] ss:$16 sps:$4 sm:$0xff]   ;;  %v4611_v13 = vld [vmem:[#allocation17] ss:$16 sps:$4 sm:$0xff]  }
 0x3dc   :  { %v1601_v44 = vadd.f32 %v1600_v1, %v1587_v24  ;;  %v4614_v20 = vld [vmem:[#allocation17 + $0x8] ss:$16 sps:$4 sm:$0xff]   ;;  %v5692_v14 = vld [vmem:[#allocation2] sm:$0xff] }
 0x3dd   :  { %v1592_v48 = vmul.f32 %v1576_v57, %v1081_v61  ;;  %v1820_v54 = vpack.c.bf16 %v5694_v55, %v5692_v14  ;;  %v389_v51 = vld [vmem:[%s6073_s11] sm:$0xf] }
 0x3de   :  { %v1602_v19 = vadd.f32 %v1601_v44, %v1588_v4  ;;  %v1825_v37 = vrot.slane %v389_v51, %v5373_v63  ;;  %v1829_v61 = vrot.slane %v389_v51, %v5375_v0 }
 0x3e0   :  { %v1603_v27 = vadd.f32 %v1602_v19, %v1589_v36 }
 0x3e2   :  { %v1604_v50 = vadd.f32 %v1603_v27, %v1590_v53 }
 0x3e4   :  { %v1605_v52 = vadd.f32 %v1604_v50, %v1591_v31 }
 0x3e6   :  { %v1606_v62 = vadd.f32 %v1605_v52, %v1592_v48 }
 0x3e8   :  { %v1607_v7 = vpack.c.bf16 %v1606_v62, %v1599_v34 }
 0x3ea   :  { %1769 = vmatmul.mubr.bf16.vlgmr.msra.gmra.mxu1 %v1607_v7  ;;  %4396 = vmatmul.mubr.bf16.vlgmr.msra.gmra.mxu0 %v1607_v7 }
 0x3eb   :  { %2003 = vmatpush1.bf16.msra.mxu1 %v4569_v26  ;;  %2046 = vmatpush1.bf16.msra.mxu0 %v4572_v35 }
 0x3ec   :  { %2004 = vmatprep.subr.bf16.mxu1 %v4577_v32  ;;  %2047 = vmatprep.subr.bf16.mxu0 %v4580_v16 }
 0x3ed   :  { %2034 = vmatprep.mubr.bf16.mxu1 %v6108_v11  ;;  %2077 = vmatprep.mubr.bf16.mxu0 %v6108_v11 }
 0x3ef   :  { %2005 = vmatpush1.bf16.msra.mxu1 %v4575_v60  ;;  %2048 = vmatpush1.bf16.msra.mxu0 %v4578_v59 }
 0x3f0   :  { %2006 = vmatprep.subr.bf16.mxu1 %v4583_v10  ;;  %2049 = vmatprep.subr.bf16.mxu0 %v4586_v33 }
 0x3f3   :  { %2007 = vmatpush1.bf16.msra.mxu1 %v4581_v2  ;;  %2050 = vmatpush1.bf16.msra.mxu0 %v4584_v8 }
 0x3f4   :  { %2008 = vmatprep.subr.bf16.mxu1 %v4589_v41  ;;  %2051 = vmatprep.subr.bf16.mxu0 %v4592_v38  ;;  %v1833_v38 = vrot.slane %v389_v51, %v5381_v3 }
 0x3f7   :  { %2009 = vmatpush1.bf16.msra.mxu1 %v4587_v49  ;;  %2052 = vmatpush1.bf16.msra.mxu0 %v4590_v15 }
 0x3f8   :  { %2010 = vmatprep.subr.bf16.mxu1 %v4595_v23  ;;  %2053 = vmatprep.subr.bf16.mxu0 %v4598_v29  ;;  %v1837_v23 = vrot.slane %v389_v51, %v5391_v9 }
 0x3fb   :  { %2011 = vmatpush1.bf16.msra.mxu1 %v4593_v5  ;;  %2054 = vmatpush1.bf16.msra.mxu0 %v4596_v30 }
 0x3fc   :  { %2012 = vmatprep.subr.bf16.mxu1 %v4601_v56  ;;  %2055 = vmatprep.subr.bf16.mxu0 %v4604_v22 }
 0x3fe   :  { %v2151_v51 = vpop.permute.xlu0 %2150 }
 0x3ff   :  { %2013 = vmatpush1.bf16.msra.mxu1 %v4599_v43  ;;  %2056 = vmatpush1.bf16.msra.mxu0 %v4602_v6  ;;  %vm2155_vm3 = vcmp.gt.f32.partialorder %v2151_v51, 0.5 }
 0x400   :  { %2014 = vmatprep.subr.bf16.mxu1 %v4607_v47  ;;  %2057 = vmatprep.subr.bf16.mxu0 %v4610_v40 }
 0x403   :  { %2015 = vmatpush1.bf16.msra.mxu1 %v4605_v58  ;;  %2058 = vmatpush1.bf16.msra.mxu0 %v4608_v45 }
 0x404   :  { %2016 = vmatprep.subr.bf16.mxu1 %v4613_v25  ;;  %2059 = vmatprep.subr.bf16.mxu0 %v4616_v28 }
 0x407   :  { %2017 = vmatpush1.bf16.msra.mxu1 %v4611_v13  ;;  %2060 = vmatpush1.bf16.msra.mxu0 %v4614_v20 }
 0x408   :  { %4399 = vmatprep.subr.bf16.mxu0 %v6107_v46 }
 0x40a   :  { %2035 = vmatmul.mubr.bf16.vlgmr.msra.gmra.mxu1 %v1820_v54  ;;  %2078 = vmatmul.mubr.bf16.vlgmr.msra.gmra.mxu0 %v1820_v54 }
 0x40b   :  { %2510 = vmatprep.mubr.bf16.mxu1 %v6108_v11  ;;  %4415 = vmatprep.mubr.msk.bf16.mxu0 %vm5178_vm0, %v6107_v46 }
 0x4aa   :  { %v1813_v24 = vpop.f32.mrf.mxu0  ;;  %v1770_v4 = vpop.f32.mrf.mxu1 }
 0x4ac   :  { %v4397_v34 = vpop.f32.mrf.mxu0  ;;  %v1772_v44 = vpop.f32.mrf.mxu1 }
 0x4ae   :  { %v1816_v1 = vpop.f32.mrf.mxu0  ;;  %v1774_v21 = vpop.f32.mrf.mxu1 }
 0x4b0   :  { %v4398_v42 = vpop.f32.mrf.mxu0  ;;  %v1776_v36 = vpop.f32.mrf.mxu1 }
 0x4ca   :  { %v2036_v19 = vpop.f32.mrf.mxu1  ;;  %v2079_v41 = vpop.f32.mrf.mxu0 }
 0x4cb   :  { %v2037_v57 = vadd.f32 %v2036_v19, %v1825_v37  ;;  %v2080_v5 = vadd.f32 %v2079_v41, %v1833_v38  ;;  %v4625_v41 = vld [vmem:[#allocation19 + $0x78] ss:$12 sps:$4 sm:$0xff]  }
 0x4cc   :  { %v2038_v53 = vpop.f32.mrf.mxu1  ;;  %v2081_v15 = vpop.f32.mrf.mxu0 }
 0x4cd   :  { %v2088_v27 = vadd.f32 %v2037_v57, %v1770_v4  ;;  %v2039_v52 = vadd.f32 %v2038_v53, %v1829_v61  ;;  %v2082_v43 = vadd.f32 %v2081_v15, %v1837_v23  ;;  %v2116_v58 = vadd.f32 %v2080_v5, %v1813_v24  ;;  %v2154_v53 = vpop.permute.xlu1 %2153  ;;  %v4631_v15 = vld [vmem:[#allocation19 + $0x64] ss:$12 sps:$4 sm:$0xff]   ;;  %v4635_v5 = vld [vmem:[#allocation19 + $0x4c] ss:$12 sps:$4 sm:$0xff]  }
 0x4ce   :  { %v2040_v31 = vpop.f32.mrf.mxu1  ;;  %v2083_v22 = vpop.f32.mrf.mxu0  ;;  %vm2156_vm4 = vcmp.gt.f32.partialorder %v2154_v53, 0.5 }
 0x4cf   :  { %v4141_v50 = vmul.f32 -1.442695, %v2088_v27  ;;  %v2041_v48 = vadd.f32 %v2040_v31, %v1825_v37  ;;  %v2102_v32 = vadd.f32 %v2039_v52, %v1772_v44  ;;  %v2084_v25 = vadd.f32 %v2083_v22, %v1833_v38  ;;  %v4627_v38 = vld [vmem:[#allocation19 + $0x7c] ss:$12 sps:$4 sm:$0xff]   ;;  %v4639_v22 = vld [vmem:[#allocation19 + $0x34] ss:$12 sps:$4 sm:$0xff]  }
 0x4d0   :  { %v2042_v26 = vpop.f32.mrf.mxu1  ;;  %v2085_v40 = vpop.f32.mrf.mxu0 }
 0x4d1   :  { %4769 = vpow2.f32 %v4141_v50  ;;  %v2089_v62 = vadd.f32 %v2041_v48, %v1774_v21  ;;  %v2043_v7 = vadd.f32 %v2042_v26, %v1829_v61  ;;  %v4143_v60 = vmul.f32 -1.442695, %v2102_v32  ;;  %v4619_v26 = vld [vmem:[#allocation19 + $0xac] ss:$12 sps:$4 sm:$0xff]  }
 0x4d2   :  { %v2086_v20 = vadd.f32 %v2085_v40, %v1837_v23  ;;  %v2117_v34 = vadd.f32 %v2084_v25, %v1816_v1  ;;  %2478 = vmatprep.subr.bf16.mxu1 %v4619_v26  ;;  %v4632_v23 = vld [vmem:[#allocation19 + $0x68] ss:$12 sps:$4 sm:$0xff]   ;;  %v4644_v40 = vld [vmem:[#allocation19 + $0x20] ss:$12 sps:$4 sm:$0xff]  }
 0x4d3   :  { %v4142_v35 = vmul.f32 -1.442695, %v2089_v62  ;;  %v2103_v16 = vadd.f32 %v2043_v7, %v1776_v36  ;;  %v4617_v62 = vld [vmem:[#allocation19 + $0xa8] ss:$12 sps:$4 sm:$0xff]  }
 0x4d4   :  { %2479 = vmatpush1.bf16.msra.mxu1 %v4617_v62  ;;  %v4648_v25 = vld [vmem:[#allocation19 + $0x8] ss:$12 sps:$4 sm:$0xff]   ;;  %v4854_v62 = vld [vmem:[#allocation10 + $0x20] sm:$0xff]  }
 0x4d5   :  { %4771 = vpow2.f32 %v4142_v35  ;;  %v4144_v59 = vmul.f32 -1.442695, %v2103_v16  ;;  %v4620_v35 = vld [vmem:[#allocation19 + $0xb0] ss:$12 sps:$4 sm:$0xff]   ;;  %v4855_v26 = vld [vmem:[#allocation10 + $0x18] sm:$0xff]  }
 0x4d6   :  { %4773 = vpow2.f32 %v4143_v60  ;;  %4400 = vmatpush3.bf16.msra.mxu0 %v4620_v35  ;;  %v4856_v35 = vld [vmem:[#allocation10 + $0x10] sm:$0xff]  }
 0x4d7   :  { %4775 = vpow2.f32 %v4144_v59  ;;  %4401 = vmatprep.subr.bf16.mxu0 %v6107_v46 }
 0x4de   :  { %v4770_v10 = vpop.eup %4769 }
 0x4df   :  { %v2096_v33 = vadd.f32 1.0, %v4770_v10 }
 0x4e1   :  { %4777 = vrcp.f32 %v2096_v33  ;;  %v4621_v33 = vld [vmem:[#allocation19 + $0x90] ss:$12 sps:$4 sm:$0xff]  }
 0x4e2   :  { %v4772_v2 = vpop.eup %4771 }
 0x4e3   :  { %v2097_v8 = vadd.f32 1.0, %v4772_v2  ;;  %v4774_v49 = vpop.eup %4773  ;;  %v4623_v2 = vld [vmem:[#allocation19 + $0x94] ss:$12 sps:$4 sm:$0xff]  }
 0x4e4   :  { %v4776_v29 = vpop.eup %4775  ;;  %v2110_v30 = vadd.f32 1.0, %v4774_v49  ;;  %2480 = vmatprep.subr.bf16.mxu1 %v4623_v2  ;;  %v4628_v49 = vld [vmem:[#allocation19 + $0x80] ss:$12 sps:$4 sm:$0xff]  }
 0x4e5   :  { %4779 = vrcp.f32 %v2097_v8  ;;  %v2111_v47 = vadd.f32 1.0, %v4776_v29  ;;  %v4624_v8 = vld [vmem:[#allocation19 + $0x98] ss:$12 sps:$4 sm:$0xff]   ;;  %2481 = vmatpush1.bf16.msra.mxu1 %v4621_v33  ;;  %v4629_v29 = vld [vmem:[#allocation19 + $0x60] ss:$12 sps:$4 sm:$0xff]  }
 0x4e6   :  { %4781 = vrcp.f32 %v2110_v30  ;;  %4402 = vmatpush3.bf16.msra.mxu0 %v4624_v8  ;;  %2482 = vmatprep.subr.bf16.mxu1 %v4627_v38  ;;  %v4636_v30 = vld [vmem:[#allocation19 + $0x50] ss:$12 sps:$4 sm:$0xff]  }
 0x4e7   :  { %4783 = vrcp.f32 %v2111_v47  ;;  %4403 = vmatprep.subr.bf16.mxu0 %v6107_v46  ;;  %v4643_v47 = vld [vmem:[#allocation19 + $0x1c] ss:$12 sps:$4 sm:$0xff]  }
 0x4e9   :  { %2483 = vmatpush1.bf16.msra.mxu1 %v4625_v41 }
 0x4ea   :  { %4404 = vmatpush3.bf16.msra.mxu0 %v4628_v49  ;;  %2484 = vmatprep.subr.bf16.mxu1 %v4631_v15 }
 0x4eb   :  { %4405 = vmatprep.subr.bf16.mxu0 %v6107_v46 }
 0x4ed   :  { %2485 = vmatpush1.bf16.msra.mxu1 %v4629_v29 }
 0x4ee   :  { %v4778_v56 = vpop.eup %4777  ;;  %4406 = vmatpush3.bf16.msra.mxu0 %v4632_v23  ;;  %2486 = vmatprep.subr.bf16.mxu1 %v4635_v5 }
 0x4ef   :  { %v4145_v6 = vadd.f32 -1.0, %v4778_v56  ;;  %v4633_v56 = vld [vmem:[#allocation19 + $0x48] ss:$12 sps:$4 sm:$0xff]   ;;  %4407 = vmatprep.subr.bf16.mxu0 %v6107_v46 }
 0x4f1   :  { %v2120_v45 = vmul.f32 %v4145_v6, %v2082_v43  ;;  %v4640_v43 = vld [vmem:[#allocation19 + $0x38] ss:$12 sps:$4 sm:$0xff]   ;;  %2487 = vmatpush1.bf16.msra.mxu1 %v4633_v56  ;;  %v4637_v6 = vld [vmem:[#allocation19 + $0x30] ss:$12 sps:$4 sm:$0xff]  }
 0x4f2   :  { %v4780_v28 = vpop.eup %4779  ;;  %4408 = vmatpush3.bf16.msra.mxu0 %v4636_v30  ;;  %2488 = vmatprep.subr.bf16.mxu1 %v4639_v22  ;;  %v6109_v30 = vld [vmem:[#allocation33_spill] sm:$0xff]  ;;  %v2229_v22 = vld [vmem:[%s6077_s15] sm:$0x7] }
 0x4f3   :  { %v2122_v13 = vadd.f32 %v2120_v45, %v2116_v58  ;;  %v4146_v54 = vadd.f32 -1.0, %v4780_v28  ;;  %v4782_v44 = vpop.eup %4781  ;;  %4409 = vmatprep.subr.bf16.mxu0 %v6107_v46  ;;  %v4641_v58 = vld [vmem:[#allocation19 + $0x18] ss:$12 sps:$4 sm:$0xff]   ;;  %v4645_v28 = vld [vmem:[#allocation19] ss:$12 sps:$4 sm:$0xff]  }
 0x4f4   :  { %v4784_v21 = vpop.eup %4783  ;;  %v2126_v37 = vsub.f32 1.0, %v4782_v44  ;;  %v2130_v24 = vmul.f32 %v5692_v14, %v4782_v44  ;;  %v4647_v45 = vld [vmem:[#allocation19 + $0x4] ss:$12 sps:$4 sm:$0xff]  }
 0x4f5   :  { %4785 = vtanh.f32 %v2122_v13  ;;  %v2121_v42 = vmul.f32 %v4146_v54, %v2086_v20  ;;  %v2127_v27 = vsub.f32 1.0, %v4784_v21  ;;  %v2131_v50 = vmul.f32 %v5694_v55, %v4784_v21  ;;  %2489 = vmatpush1.bf16.msra.mxu1 %v4637_v6  ;;  %v4851_v13 = vld [vmem:[#allocation10 + $0x38] sm:$0xff]   ;;  %v5792_v6 = vld [vmem:[#allocation5 + $0x28] sm:$0xff]  }
 0x4f6   :  { %4410 = vmatpush3.bf16.msra.mxu0 %v4640_v43  ;;  %2490 = vmatprep.subr.bf16.mxu1 %v4643_v47  ;;  %v5785_v43 = vld [vmem:[#allocation5 + $0x8] sm:$0xff]   ;;  %v5794_v47 = vld [vmem:[#allocation5 + $0x38] sm:$0xff]  }
 0x4f7   :  { %v2123_v4 = vadd.f32 %v2121_v42, %v2117_v34  ;;  %4411 = vmatprep.subr.bf16.mxu0 %v6107_v46 }
 0x4f9   :  { %4787 = vtanh.f32 %v2123_v4  ;;  %2491 = vmatpush1.bf16.msra.mxu1 %v4641_v58  ;;  %v5798_v58 = vld [vmem:[#allocation5 + $0x58] sm:$0xff]  }
 0x4fa   :  { %4412 = vmatpush3.bf16.msra.mxu0 %v4644_v40  ;;  %2492 = vmatprep.subr.bf16.mxu1 %v4647_v45  ;;  %v5796_v40 = vld [vmem:[#allocation5 + $0x48] sm:$0xff]  }
 0x4fb   :  { %4413 = vmatprep.subr.bf16.mxu0 %v6107_v46  ;;  %v5800_v45 = vld [vmem:[#allocation5 + $0x68] sm:$0xff]  }
 0x4fd   :  { %2493 = vmatpush1.bf16.msra.mxu1 %v4645_v28  ;;  %v5806_v28 = vrot.slane %v2229_v22, %v5373_v63 }
 0x4fe   :  { %4414 = vmatpush3.bf16.msra.mxu0 %v4648_v25  ;;  %4419 = vmatprep.subr.bf16.mxu1 %v4851_v13  ;;  %v5803_v25 = vrot.slane %v2229_v22, %v5375_v0 }
 0x502   :  { %v4786_v36 = vpop.eup %4785 }
 0x503   :  { %v2128_v19 = vmul.f32 %v4786_v36, %v2126_v37  ;;  %v4147_v37 = vld [vmem:[%s6074_s12] ss:$0 sm:$0xff] }
 0x505   :  { %v2132_v57 = vadd.f32 %v2130_v24, %v2128_v19 }
 0x506   :  { %v4788_v61 = vpop.eup %4787 }
 0x507   :  { %v5711_v31 = vsel %vm2155_vm3, %v2132_v57, %v5692_v14  ;;  %v2129_v1 = vmul.f32 %v4788_v61, %v2127_v27  ;;  %v4148_v57 = vld [vmem:[%s6075_s13] ss:$0 sm:$0xff] }
 0x508   :  { %2295 = vadd.xlane.f32.xlu0 %v5711_v31 }
 0x509   :  { %v2133_v48 = vadd.f32 %v2131_v50, %v2129_v1  ;;  %v4852_v50 = vld [vmem:[#allocation10 + $0x30] sm:$0xff]  }
 0x50b   :  { %v5716_v52 = vsel %vm2156_vm4, %v2133_v48, %v5694_v55  ;;  %v4853_v48 = vld [vmem:[#allocation10 + $0x28] sm:$0xff]  }
 0x50c   :  { %2297 = vadd.xlane.f32.xlu1 %v5716_v52 }
 0x591   :  { %v2296_v14 = vpop.xlane.xlu0 %2295 }
 0x592   :  { %v2299_v7 = vmul.f32 0.0078125, %v2296_v14  ;;  %v4857_v14 = vld [vmem:[#allocation10 + $0x8] sm:$0xff]  }
 0x594   :  { %v5721_v32 = vsub.f32 %v5711_v31, %v2299_v7  ;;  %v4858_v7 = vld [vmem:[#allocation10] sm:$0xff]  }
 0x595   :  { %v2298_v16 = vpop.xlane.xlu1 %2297 }
 0x596   :  { %v2300_v60 = vmul.f32 0.0078125, %v2298_v16  ;;  %v2303_v55 = vmul.f32 %v5721_v32, %v5721_v32  ;;  %v5748_v16 = vld [vmem:[#allocation8 + $0x8] sm:$0xff] }
 0x597   :  { %v3236_v2 = vrot.slane %v5748_v16, %v5381_v3  ;;  %v3229_v8 = vrot.slane %v5748_v16, %v5375_v0  ;;  %v3243_v38 = vrot.slane %v5748_v16, %v5391_v9  ;;  %v3250_v49 = vrot.slane %v5748_v16, %v5397_v12 }
 0x598   :  { %v5726_v59 = vsub.f32 %v5716_v52, %v2300_v60  ;;  %2305 = vadd.xlane.f32.xlu0 %v2303_v55  ;;  %v3257_v29 = vrot.slane %v5748_v16, %v5407_v17  ;;  %v3264_v5 = vrot.slane %v5748_v16, %v5409_v18  ;;  %v3271_v56 = vrot.slane %v5748_v16, %v6109_v30 }
 0x59a   :  { %v2304_v10 = vmul.f32 %v5726_v59, %v5726_v59 }
 0x59c   :  { %2307 = vadd.xlane.f32.xlu0 %v2304_v10  ;;  %v3222_v10 = vrot.slane %v5748_v16, %v5373_v63 }
 0x621   :  { %v2306_v20 = vpop.xlane.xlu0 %2305 }
 0x622   :  { %v2309_v54 = vmul.f32 0.0078125, %v2306_v20 }
 0x624   :  { %v2311_v34 = vadd.f32 1e-05, %v2309_v54  ;;  %v5810_v54 = vld [vmem:[#allocation5 + $0x88] sm:$0xff]  }
 0x625   :  { %v2308_v42 = vpop.xlane.xlu0 %2307 }
 0x626   :  { %4789 = vrsqrt.f32 %v2311_v34  ;;  %v2310_v4 = vmul.f32 0.0078125, %v2308_v42  ;;  %v2874_v42 = vunpack.c.h.bf16 %v5785_v43 }
 0x628   :  { %v2312_v44 = vadd.f32 1e-05, %v2310_v4 }
 0x62a   :  { %4791 = vrsqrt.f32 %v2312_v44  ;;  %v2876_v44 = vunpack.c.h.bf16 %v5792_v6 }
 0x633   :  { %v4790_v21 = vpop.eup %4789 }
 0x634   :  { %v2315_v51 = vmul.f32 %v4790_v21, %v5721_v32  ;;  %v5746_v32 = vld [vmem:[#allocation8] sm:$0xff]  ;;  %v5816_v21 = vld [vmem:[#allocation5 + $0x98] sm:$0xff]  }
 0x635   :  { %v3173_v60 = vrot.slane %v5746_v32, %v5375_v0  ;;  %v3166_v55 = vrot.slane %v5746_v32, %v5373_v63  ;;  %v3187_v33 = vrot.slane %v5746_v32, %v5391_v9  ;;  %v3194_v41 = vrot.slane %v5746_v32, %v5397_v12 }
 0x636   :  { %v2323_v24 = vmul.f32 %v4147_v37, %v2315_v51  ;;  %v3201_v15 = vrot.slane %v5746_v32, %v5407_v17  ;;  %v3208_v23 = vrot.slane %v5746_v32, %v5409_v18  ;;  %v3215_v12 = vrot.slane %v5746_v32, %v6109_v30  ;;  %v5790_v18 = vld [vmem:[#allocation5 + $0x18] sm:$0xff]   ;;  %v5818_v51 = vld [vmem:[#allocation5 + $0xa8] sm:$0xff]  }
 0x637   :  { %v4792_v36 = vpop.eup %4791  ;;  %3175 = vbcast.lane.b32.xlu1 %v3173_v60, 256  ;;  %3168 = vbcast.lane.b32.xlu0 %v3166_v55, 256  ;;  %v5788_v17 = vrot.slane %v2229_v22, %v5381_v3  ;;  %v2875_v4 = vunpack.c.h.bf16 %v5790_v18  ;;  %v2883_v60 = vunpack.c.h.bf16 %v5816_v21  ;;  %v2884_v55 = vunpack.c.h.bf16 %v5818_v51 }
 0x638   :  { %v2316_v19 = vmul.f32 %v4792_v36, %v5726_v59  ;;  %v2331_v27 = vadd.f32 %v4148_v57, %v2323_v24  ;;  %v3180_v59 = vrot.slane %v5746_v32, %v5381_v3  ;;  %v2877_v36 = vunpack.c.h.bf16 %v5794_v47 }
 0x639   :  { %v2879_v24 = vunpack.c.h.bf16 %v5798_v58 }
 0x63a   :  { %v2324_v53 = vmul.f32 %v4147_v37, %v2316_v19  ;;  %v5820_v37 = vld [vmem:[#allocation5 + $0xc8] sm:$0xff]   ;;  %v2878_v19 = vunpack.c.h.bf16 %v5796_v40 }
 0x63b   :  { %3182 = vbcast.lane.b32.xlu1 %v3180_v59, 256  ;;  %3224 = vbcast.lane.b32.xlu0 %v3222_v10, 256 }
 0x63c   :  { %v2332_v61 = vadd.f32 %v4148_v57, %v2324_v53  ;;  %v2880_v57 = vunpack.c.h.bf16 %v5800_v45 }
 0x63e   :  { %v2333_v1 = vpack.c.bf16 %v2332_v61, %v2331_v27 }
 0x63f   :  { %3189 = vbcast.lane.b32.xlu1 %v3187_v33, 256  ;;  %3238 = vbcast.lane.b32.xlu0 %v3236_v2, 256 }
 0x640   :  { %2511 = vmatmul.mubr.bf16.vlgmr.msra.gmra.mxu1 %v2333_v1  ;;  %4416 = vmatmul.mubr.bf16.vlgmr.msra.gmra.mxu0 %v2333_v1 }
 0x641   :  { %4420 = vmatpush3.bf16.msra.mxu1 %v4851_v13  ;;  %3624 = vmatprep.mubr.bf16.mxu0 %v6108_v11 }
 0x642   :  { %4421 = vmatprep.subr.bf16.mxu1 %v4852_v50 }
 0x643   :  { %3231 = vbcast.lane.b32.xlu1 %v3229_v8, 256  ;;  %3196 = vbcast.lane.b32.xlu0 %v3194_v41, 256 }
 0x645   :  { %4422 = vmatpush3.bf16.msra.mxu1 %v4852_v50 }
 0x646   :  { %4423 = vmatprep.subr.bf16.mxu1 %v4853_v48 }
 0x647   :  { %3245 = vbcast.lane.b32.xlu1 %v3243_v38, 256  ;;  %3252 = vbcast.lane.b32.xlu0 %v3250_v49, 256 }
 0x649   :  { %4424 = vmatpush3.bf16.msra.mxu1 %v4853_v48 }
 0x64a   :  { %4425 = vmatprep.subr.bf16.mxu1 %v4854_v62 }
 0x64b   :  { %3203 = vbcast.lane.b32.xlu1 %v3201_v15, 256  ;;  %3210 = vbcast.lane.b32.xlu0 %v3208_v23, 256 }
 0x64d   :  { %4426 = vmatpush3.bf16.msra.mxu1 %v4854_v62  ;;  %v5829_v62 = vld [vmem:[#allocation5 + $0xb8] sm:$0xff]  }
 0x64e   :  { %4427 = vmatprep.subr.bf16.mxu1 %v4855_v26 }
 0x64f   :  { %3259 = vbcast.lane.b32.xlu1 %v3257_v29, 256  ;;  %3266 = vbcast.lane.b32.xlu0 %v3264_v5, 256 }
 0x651   :  { %4428 = vmatpush3.bf16.msra.mxu1 %v4855_v26  ;;  %v5831_v26 = vld [vmem:[#allocation5 + $0xd8] sm:$0xff]  }
 0x652   :  { %4429 = vmatprep.subr.bf16.mxu1 %v4856_v35 }
 0x653   :  { %3217 = vbcast.lane.b32.xlu1 %v3215_v12, 256 }
 0x655   :  { %4430 = vmatpush3.bf16.msra.mxu1 %v4856_v35  ;;  %v5833_v35 = vld [vmem:[#allocation5 + $0xe8] sm:$0xff]  }
 0x656   :  { %4431 = vmatprep.subr.bf16.mxu1 %v4857_v14 }
 0x657   :  { %3273 = vbcast.lane.b32.xlu1 %v3271_v56, 256 }
 0x659   :  { %4432 = vmatpush3.bf16.msra.mxu1 %v4857_v14 }
 0x65a   :  { %4433 = vmatprep.subr.bf16.mxu1 %v4858_v7 }
 0x65d   :  { %4434 = vmatpush3.bf16.msra.mxu1 %v4858_v7  ;;  %v2882_v7 = vunpack.c.h.bf16 %v5810_v54 }
 0x65e   :  { %4451 = vmatprep.subr.bf16.mxu1 %v6107_v46 }
 0x700   :  { %v5808_v13 = vpop.f32.mrf.mxu1  ;;  %v2555_v20 = vpop.f32.mrf.mxu0 }
 0x701   :  { %v2556_v34 = vadd.f32 %v2555_v20, %v5788_v17 }
 0x702   :  { %v2514_v53 = vpop.f32.mrf.mxu1  ;;  %v4417_v27 = vpop.f32.mrf.mxu0 }
 0x703   :  { %v2776_v61 = vcombine.high %v2556_v34, %v2556_v34  ;;  %v2783_v1 = vrot.slane %v2556_v34, %v5445_v39  ;;  %v2515_v50 = vadd.f32 %v2514_v53, %v5803_v25  ;;  %v2662_v34 = vunpack.c.l.bf16 %v5785_v43 }
 0x704   :  { %v2558_v14 = vpop.f32.mrf.mxu0 }
 0x705   :  { %v2790_v10 = vrot.slane %v2776_v61, %v5445_v39  ;;  %v2791_v33 = vcombine.high %v2783_v1, %v2783_v1  ;;  %v2799_v2 = vrot.slane %v2783_v1, %v5445_v39  ;;  %v2564_v8 = vcombine.high %v2515_v50, %v2515_v50 }
 0x706   :  { %v2571_v41 = vrot.slane %v2515_v50, %v5445_v39  ;;  %v4418_v23 = vpop.f32.mrf.mxu0  ;;  %v2559_v48 = vadd.f32 %v2558_v14, %v5788_v17 }
 0x707   :  { %v2792_v29 = vcombine.high %v2790_v10, %v2790_v10  ;;  %v2806_v5 = vrot.slane %v2790_v10, %v5445_v39  ;;  %v2813_v30 = vrot.slane %v2791_v33, %v5445_v39  ;;  %v2821_v12 = vcombine.high %v2799_v2, %v2799_v2  ;;  %v5859_v23 = vpop.f32.mrf.mxu1 }
 0x708   :  { %v2893_v56 = vrot.slane %v2799_v2, %v5373_v63  ;;  %v2578_v22 = vrot.slane %v2564_v8, %v5445_v39  ;;  %v2579_v20 = vcombine.high %v2571_v41, %v2571_v41  ;;  %v2587_v2 = vrot.slane %v2571_v41, %v5445_v39 }
 0x709   :  { %v5851_v53 = vrot.slane %v2792_v29, %v5445_v39  ;;  %v2822_v27 = vcombine.high %v2806_v5, %v2806_v5  ;;  %v2823_v61 = vcombine.high %v2813_v30, %v2813_v30  ;;  %v2897_v1 = vrot.slane %v2813_v30, %v5373_v63  ;;  %v2518_v14 = vpop.f32.mrf.mxu1 }
 0x70a   :  { %v2901_v50 = vrot.slane %v2821_v12, %v5373_v63  ;;  %v2909_v10 = vrot.slane %v2806_v5, %v5373_v63  ;;  %v5856_v33 = vadd.f32 %v2893_v56, %v2874_v42  ;;  %v2580_v42 = vcombine.high %v2578_v22, %v2578_v22 }
 0x70b   :  { %v2905_v8 = vrot.slane %v2823_v61, %v5373_v63  ;;  %v2913_v43 = vrot.slane %v5851_v53, %v5373_v63  ;;  %v2917_v29 = vrot.slane %v2822_v27, %v5373_v63  ;;  %v5866_v30 = vadd.f32 %v2897_v1, %v2875_v4 }
 0x70c   :  { %v5868_v12 = vadd.f32 %v2901_v50, %v2876_v44  ;;  %v5870_v5 = vadd.f32 %v2909_v10, %v2878_v19  ;;  %v2663_v61 = vunpack.c.l.bf16 %v5790_v18  ;;  %v5880_v49 = vrot.slane %v2578_v22, %v5445_v39 }
 0x70d   :  { %v5872_v56 = vadd.f32 %v2905_v8, %v2877_v36  ;;  %v5874_v41 = vadd.f32 %v2913_v43, %v2879_v24  ;;  %v5876_v15 = vadd.f32 %v2917_v29, %v2880_v57  ;;  %v2601_v17 = vrot.slane %v2579_v20, %v5445_v39 }
 0x70e   :  { %v2609_v4 = vcombine.high %v2587_v2, %v2587_v2  ;;  %v2666_v44 = vunpack.c.l.bf16 %v5796_v40  ;;  %v2825_v19 = vcombine.high %v2559_v48, %v2559_v48  ;;  %v2832_v27 = vrot.slane %v2559_v48, %v5445_v39 }
 0x70f   :  { %v2665_v36 = vunpack.c.l.bf16 %v5794_v47  ;;  %v2667_v24 = vunpack.c.l.bf16 %v5798_v58  ;;  %v5889_v57 = vadd.f32 %v5808_v13, %v5806_v28  ;;  %v5892_v18 = vrot.slane %v2580_v42, %v5445_v39 }
 0x710   :  { %v2611_v22 = vcombine.high %v2601_v17, %v2601_v17  ;;  %v2681_v20 = vrot.slane %v2587_v2, %v5373_v63  ;;  %v2839_v1 = vrot.slane %v2825_v19, %v5445_v39  ;;  %v2840_v40 = vcombine.high %v2832_v27, %v2832_v27 }
 0x711   :  { %v2848_v50 = vrot.slane %v2832_v27, %v5445_v39  ;;  %v2519_v48 = vadd.f32 %v2518_v14, %v5803_v25  ;;  %v2610_v47 = vcombine.high %v5880_v49, %v5880_v49  ;;  %v2685_v58 = vrot.slane %v2601_v17, %v5373_v63 }
 0x712   :  { %v2689_v13 = vrot.slane %v2609_v4, %v5373_v63  ;;  %v2693_v10 = vrot.slane %v2611_v22, %v5373_v63  ;;  %v2841_v8 = vcombine.high %v2839_v1, %v2839_v1  ;;  %v2855_v43 = vrot.slane %v2839_v1, %v5445_v39 }
 0x713   :  { %v2862_v2 = vrot.slane %v2840_v40, %v5445_v39  ;;  %v2870_v29 = vcombine.high %v2848_v50, %v2848_v50  ;;  %v2925_v42 = vrot.slane %v2848_v50, %v5373_v63  ;;  %v2613_v19 = vcombine.high %v2519_v48, %v2519_v48 }
 0x714   :  { %v2620_v25 = vrot.slane %v2519_v48, %v5445_v39  ;;  %v2758_v14 = vadd.f32 %v2681_v20, %v2662_v34  ;;  %v5908_v27 = vrot.slane %v2841_v8, %v5445_v39  ;;  %v2871_v17 = vcombine.high %v2855_v43, %v2855_v43 }
 0x715   :  { %v2872_v38 = vcombine.high %v2862_v2, %v2862_v2  ;;  %v2929_v4 = vrot.slane %v2862_v2, %v5373_v63  ;;  %v2933_v22 = vrot.slane %v2870_v29, %v5373_v63  ;;  %v2941_v1 = vrot.slane %v2855_v43, %v5373_v63 }
 0x716   :  { %v5915_v40 = vadd.f32 %v2925_v42, %v2882_v7  ;;  %v2759_v50 = vadd.f32 %v2685_v58, %v2663_v61  ;;  %v2945_v34 = vrot.slane %v5908_v27, %v5373_v63  ;;  %v2949_v20 = vrot.slane %v2871_v17, %v5373_v63 }
 0x717   :  { %v2937_v59 = vrot.slane %v2872_v38, %v5373_v63  ;;  %v2627_v48 = vrot.slane %v2613_v19, %v5445_v39  ;;  %v5924_v8 = vadd.f32 %v2929_v4, %v2883_v60  ;;  %v5928_v43 = vadd.f32 %v2933_v22, %v2884_v55 }
 0x718   :  { %v6110_v7 = vunpack.c.h.bf16 %v5820_v37  ;;  %v2628_v38 = vcombine.high %v2620_v25, %v2620_v25  ;;  %v2697_v58 = vrot.slane %v5880_v49, %v5373_v63  ;;  %v6111_v2 = vunpack.c.h.bf16 %v5829_v62 }
 0x719   :  { %v6112_v42 = vunpack.c.h.bf16 %v5831_v26  ;;  %v6113_v19 = vunpack.c.h.bf16 %v5833_v35  ;;  %v2612_v17 = vcombine.high %v5892_v18, %v5892_v18  ;;  %v6114_v4 = vunpack.c.l.bf16 %v5792_v6 }
 0x71a   :  { %v5932_v61 = vadd.f32 %v2941_v1, %v6110_v7  ;;  %v5938_v29 = vadd.f32 %v2937_v59, %v6111_v2  ;;  %v2650_v49 = vrot.slane %v2628_v38, %v5445_v39  ;;  %v2986_v1 = vmul.f32 %v2758_v14, %v5889_v57  ;;  %v2170_v59 = vld [vmem:[#allocation5 + $0x78] sm:$0xf] }
 0x71b   :  { %v5942_v60 = vadd.f32 %v2945_v34, %v6112_v42  ;;  %v5946_v55 = vadd.f32 %v2949_v20, %v6113_v19  ;;  %v2760_v22 = vadd.f32 %v2689_v13, %v6114_v4  ;;  %v2636_v7 = vrot.slane %v2620_v25, %v5445_v39 }
 0x71c   :  { %v2987_v34 = vmul.f32 %v2759_v50, %v5889_v57  ;;  %v2761_v2 = vadd.f32 %v2693_v10, %v2665_v36  ;;  %v2701_v20 = vrot.slane %v5892_v18, %v5373_v63  ;;  %v2629_v42 = vcombine.high %v2627_v48, %v2627_v48 }
 0x71d   :  { %v2668_v19 = vunpack.c.l.bf16 %v5800_v45  ;;  %v2717_v9 = vrot.slane %v2650_v49, %v5373_v63  ;;  %v2669_v13 = vunpack.c.l.bf16 %v2170_v59  ;;  %v2671_v38 = vunpack.c.l.bf16 %v5816_v21 }
 0x71e   :  { %v4251_v6 = vpack.c.bf16 %v2987_v34, %v2986_v1  ;;  %v2988_v14 = vmul.f32 %v2760_v22, %v5889_v57  ;;  %v2989_v4 = vmul.f32 %v2761_v2, %v5889_v57  ;;  %v2762_v25 = vadd.f32 %v2697_v58, %v2666_v44 }
 0x71f   :  { %v2670_v50 = vunpack.c.l.bf16 %v5810_v54  ;;  %v2713_v36 = vrot.slane %v2636_v7, %v5373_v63  ;;  %v2763_v18 = vadd.f32 %v2701_v20, %v2667_v24  ;;  %v2705_v10 = vrot.slane %v2610_v47, %v5373_v63 }
 0x720   :  { %4435 = vmatprep.mubr.bf16.mxu1 %v4251_v6  ;;  %v2709_v45 = vrot.slane %v2612_v17, %v5373_v63  ;;  %v2657_v1 = vrot.slane %v2629_v42, %v5445_v39  ;;  %v2660_v59 = vcombine.high %v2650_v49, %v2650_v49  ;;  %v4252_v34 = vpack.c.bf16 %v2989_v4, %v2988_v14 }
 0x721   :  { %v2990_v21 = vmul.f32 %v2762_v25, %v5889_v57  ;;  %v2991_v22 = vmul.f32 %v2763_v18, %v5889_v57  ;;  %v2767_v44 = vadd.f32 %v2717_v9, %v2671_v38  ;;  %v2658_v58 = vcombine.high %v2636_v7, %v2636_v7 }
 0x722   :  { %v2765_v2 = vadd.f32 %v2709_v45, %v2669_v13  ;;  %4436 = vmatmul.mubr.bf16.vlgmr.msra.gmra.mxu1 %v4252_v34  ;;  %v2764_v54 = vadd.f32 %v2705_v10, %v2668_v19  ;;  %v2517_v24 = vadd.f32 %v5859_v23, %v5806_v28  ;;  %v2643_v47 = vrot.slane %v2627_v48, %v5445_v39 }
 0x723   :  { %v4253_v20 = vpack.c.bf16 %v2991_v22, %v2990_v21  ;;  %v2766_v17 = vadd.f32 %v2713_v36, %v2670_v50  ;;  %v2673_v49 = vunpack.c.l.bf16 %v5829_v62  ;;  %v2725_v6 = vrot.slane %v2660_v59, %v5373_v63  ;;  %v2178_v36 = vld [vmem:[#allocation5 + $0xf8] sm:$0xf] }
 0x724   :  { %v2993_v42 = vmul.f32 %v2765_v2, %v5889_v57  ;;  %v2995_v14 = vmul.f32 %v2767_v44, %v2517_v24  ;;  %v2675_v9 = vunpack.c.l.bf16 %v5831_v26  ;;  %v2733_v7 = vrot.slane %v2657_v1, %v5373_v63 }
 0x725   :  { %4439 = vmatprep.mubr.bf16.mxu1 %v4253_v20  ;;  %v2721_v19 = vrot.slane %v2658_v58, %v5373_v63  ;;  %v2992_v28 = vmul.f32 %v2764_v54, %v5889_v57  ;;  %v2672_v39 = vunpack.c.l.bf16 %v5818_v51  ;;  %v2729_v23 = vrot.slane %v2643_v47, %v5373_v63 }
 0x726   :  { %v2994_v48 = vmul.f32 %v2766_v17, %v2517_v24  ;;  %v2674_v13 = vunpack.c.l.bf16 %v5820_v37  ;;  %v2661_v62 = vcombine.high %v2657_v1, %v2657_v1  ;;  %v2769_v4 = vadd.f32 %v2725_v6, %v2673_v49  ;;  %v4651_v17 = vld [vmem:[#allocation20 + $0xac] ss:$12 sps:$4 sm:$0xff]   ;;  %v4652_v49 = vld [vmem:[#allocation20 + $0xb0] ss:$12 sps:$4 sm:$0xff]  }
 0x727   :  { %v4254_v38 = vpack.c.bf16 %v2993_v42, %v2992_v28  ;;  %v2771_v50 = vadd.f32 %v2733_v7, %v2675_v9  ;;  %v2659_v26 = vcombine.high %v2643_v47, %v2643_v47  ;;  %v2768_v18 = vadd.f32 %v2721_v19, %v2672_v39  ;;  %v4649_v42 = vld [vmem:[#allocation20 + $0xa8] ss:$12 sps:$4 sm:$0xff]   ;;  %3592 = vmatprep.subr.bf16.mxu0 %v4651_v17  ;;  %v4653_v6 = vld [vmem:[#allocation20 + $0x90] ss:$12 sps:$4 sm:$0xff]   ;;  %v4657_v9 = vld [vmem:[#allocation20 + $0x78] ss:$12 sps:$4 sm:$0xff]  }
 0x728   :  { %v4255_v25 = vpack.c.bf16 %v2995_v14, %v2994_v48  ;;  %v2770_v10 = vadd.f32 %v2729_v23, %v2674_v13  ;;  %v2997_v45 = vmul.f32 %v2769_v4, %v2517_v24  ;;  %v2677_v57 = vunpack.c.l.bf16 %v2178_v36  ;;  %3593 = vmatpush1.bf16.msra.mxu0 %v4649_v42  ;;  %4452 = vmatpush3.bf16.msra.mxu1 %v4652_v49  ;;  %v4656_v14 = vld [vmem:[#allocation20 + $0x98] ss:$12 sps:$4 sm:$0xff]   ;;  %v4660_v7 = vld [vmem:[#allocation20 + $0x80] ss:$12 sps:$4 sm:$0xff]   ;;  %v4664_v39 = vld [vmem:[#allocation20 + $0x68] ss:$12 sps:$4 sm:$0xff]  }
 0x729   :  { %v2741_v51 = vrot.slane %v2661_v62, %v5373_v63  ;;  %v2999_v59 = vmul.f32 %v2771_v50, %v2517_v24  ;;  %v2996_v34 = vmul.f32 %v2768_v18, %v2517_v24  ;;  %v2676_v21 = vunpack.c.l.bf16 %v5833_v35  ;;  %v4655_v35 = vld [vmem:[#allocation20 + $0x94] ss:$12 sps:$4 sm:$0xff]   ;;  %4453 = vmatprep.subr.bf16.mxu1 %v6107_v46  ;;  %v4663_v19 = vld [vmem:[#allocation20 + $0x64] ss:$12 sps:$4 sm:$0xff]   ;;  %v4667_v23 = vld [vmem:[#allocation20 + $0x4c] ss:$12 sps:$4 sm:$0xff]  }
 0x72a   :  { %4440 = vmatmul.mubr.bf16.gmra.mxu1 %v4254_v38  ;;  %v2737_v37 = vrot.slane %v2659_v26, %v5373_v63  ;;  %v2998_v1 = vmul.f32 %v2770_v10, %v2517_v24  ;;  %3594 = vmatprep.subr.bf16.mxu0 %v4655_v35  ;;  %v4661_v28 = vld [vmem:[#allocation20 + $0x60] ss:$12 sps:$4 sm:$0xff]   ;;  %v4665_v48 = vld [vmem:[#allocation20 + $0x48] ss:$12 sps:$4 sm:$0xff]   ;;  %v4668_v13 = vld [vmem:[#allocation20 + $0x50] ss:$12 sps:$4 sm:$0xff]  }
 0x72b   :  { %4443 = vmatprep.mubr.bf16.mxu1 %v4255_v25  ;;  %v4256_v22 = vpack.c.bf16 %v2997_v45, %v2996_v34  ;;  %v2773_v2 = vadd.f32 %v2741_v51, %v2677_v57  ;;  %v4671_v62 = vld [vmem:[#allocation20 + $0x34] ss:$12 sps:$4 sm:$0xff]   ;;  %v4669_v38 = vld [vmem:[#allocation20 + $0x30] ss:$12 sps:$4 sm:$0xff]   ;;  %v4672_v4 = vld [vmem:[#allocation20 + $0x38] ss:$12 sps:$4 sm:$0xff]   ;;  %v3176_v25 = vpop.permute.xlu1 %3175  ;;  %v3169_v34 = vpop.permute.xlu0 %3168 }
 0x72c   :  { %v4257_v44 = vpack.c.bf16 %v2999_v59, %v2998_v1  ;;  %v2772_v58 = vadd.f32 %v2737_v37, %v2676_v21  ;;  %3595 = vmatpush1.bf16.msra.mxu0 %v4653_v6  ;;  %4454 = vmatpush3.bf16.msra.mxu1 %v4656_v14  ;;  %v4675_v50 = vld [vmem:[#allocation20 + $0x1c] ss:$12 sps:$4 sm:$0xff]   ;;  %v4673_v36 = vld [vmem:[#allocation20 + $0x18] ss:$12 sps:$4 sm:$0xff]   ;;  %v4676_v26 = vld [vmem:[#allocation20 + $0x20] ss:$12 sps:$4 sm:$0xff]  }
 0x72d   :  { %v3001_v54 = vmul.f32 %v2773_v2, %v2517_v24  ;;  %4455 = vmatprep.subr.bf16.mxu1 %v6107_v46  ;;  %v4679_v18 = vld [vmem:[#allocation20 + $0x4] ss:$12 sps:$4 sm:$0xff]   ;;  %v4677_v45 = vld [vmem:[#allocation20] ss:$12 sps:$4 sm:$0xff]   ;;  %v4680_v57 = vld [vmem:[#allocation20 + $0x8] ss:$12 sps:$4 sm:$0xff]  }
 0x72e   :  { %v3000_v47 = vmul.f32 %v2772_v58, %v2517_v24  ;;  %v4659_v24 = vld [vmem:[#allocation20 + $0x7c] ss:$12 sps:$4 sm:$0xff]   ;;  %v4683_v51 = vld [vmem:[#allocation22 + $0xe4] ss:$16 sps:$4 sm:$0xff]   ;;  %v3990_v14 = vsel %vm2134_vm5, %v5746_v32, -inf  ;;  %vm3276_vm8 = vcmp.gt.f32.partialorder %v3176_v25, 0.5 }
 0x72f   :  { %3596 = vmatprep.subr.bf16.mxu0 %v4659_v24  ;;  %v3183_v10 = vpop.permute.xlu1 %3182  ;;  %v4686_v59 = vld [vmem:[#allocation22 + $0xec] ss:$16 sps:$4 sm:$0xff]   ;;  %v5995_v37 = vpop.permute.xlu0 %3224  ;;  %v3997_v24 = vsel %vm2134_vm5, %v5748_v16, -inf }
 0x730   :  { %v4258_v20 = vpack.c.bf16 %v3001_v54, %v3000_v47  ;;  %3597 = vmatpush1.bf16.msra.mxu0 %v4657_v9  ;;  %4456 = vmatpush3.bf16.msra.mxu1 %v4660_v7  ;;  %vm3277_vm6 = vcmp.gt.f32.partialorder %v3183_v10, 0.5  ;;  %vm3283_vm13 = vcmp.gt.f32.partialorder %v5995_v37, 0.5 }
 0x731   :  { %3598 = vmatprep.subr.bf16.mxu0 %v4663_v19  ;;  %4457 = vmatprep.subr.bf16.mxu1 %v6107_v46  ;;  %v3991_v19 = vrot.slane %v3990_v14, 4 }
 0x732   :  { %4444 = vmatmul.mubr.bf16.gmra.mxu1 %v4256_v22 }
 0x733   :  { %4447 = vmatprep.mubr.bf16.mxu1 %v4257_v44  ;;  %v3190_v21 = vpop.permute.xlu1 %3189  ;;  %v5999_v22 = vpop.permute.xlu0 %3238 }
 0x734   :  { %3599 = vmatpush1.bf16.msra.mxu0 %v4661_v28  ;;  %4458 = vmatpush3.bf16.msra.mxu1 %v4664_v39  ;;  %vm3278_vm9 = vcmp.gt.f32.partialorder %v3190_v21, 0.5  ;;  %v3998_v28 = vrot.slane %v3997_v24, 4  ;;  %vm3285_vm5 = vcmp.gt.f32.partialorder %v5999_v22, 0.5 }
 0x735   :  { %3600 = vmatprep.subr.bf16.mxu0 %v4667_v23  ;;  %4459 = vmatprep.subr.bf16.mxu1 %v6107_v46 }
 0x737   :  { %v5997_v1 = vpop.permute.xlu1 %3231  ;;  %v3197_v44 = vpop.permute.xlu0 %3196 }
 0x738   :  { %3601 = vmatpush1.bf16.msra.mxu0 %v4665_v48  ;;  %4460 = vmatpush3.bf16.msra.mxu1 %v4668_v13  ;;  %vm3279_vm7 = vcmp.gt.f32.partialorder %v3197_v44, 0.5  ;;  %vm3284_vm14 = vcmp.gt.f32.partialorder %v5997_v1, 0.5 }
 0x739   :  { %3602 = vmatprep.subr.bf16.mxu0 %v4671_v62  ;;  %4461 = vmatprep.subr.bf16.mxu1 %v6107_v46 }
 0x73a   :  { %4448 = vmatmul.mubr.bf16.gmra.mxu1 %v4258_v20 }
 0x73b   :  { %4467 = vmatprep.mubr.msk.bf16.mxu1 %vm5178_vm0, %v6107_v46  ;;  %v6001_v2 = vpop.permute.xlu1 %3245  ;;  %v6003_v47 = vpop.permute.xlu0 %3252  ;;  %vm3275_vm0 = vcmp.gt.f32.partialorder %v3169_v34, 0.5 }
 0x73c   :  { %3603 = vmatpush1.bf16.msra.mxu0 %v4669_v38  ;;  %4462 = vmatpush3.bf16.msra.mxu1 %v4672_v4  ;;  %v3992_v38 = vmax.f32 %v3990_v14, %v3991_v19  ;;  %v3999_v4 = vmax.f32 %v3997_v24, %v3998_v28  ;;  %vm3287_vm15 = vcmp.gt.f32.partialorder %v6003_v47, 0.5  ;;  %vm3286_vm1 = vcmp.gt.f32.partialorder %v6001_v2, 0.5 }
 0x73d   :  { %3604 = vmatprep.subr.bf16.mxu0 %v4675_v50  ;;  %4463 = vmatprep.subr.bf16.mxu1 %v6107_v46 }
 0x73f   :  { %v3204_v58 = vpop.permute.xlu1 %3203  ;;  %v3211_v6 = vpop.permute.xlu0 %3210 }
 0x740   :  { %3605 = vmatpush1.bf16.msra.mxu0 %v4673_v36  ;;  %4464 = vmatpush3.bf16.msra.mxu1 %v4676_v26  ;;  %vm3280_vm10 = vcmp.gt.f32.partialorder %v3204_v58, 0.5  ;;  %vm3281_vm11 = vcmp.gt.f32.partialorder %v3211_v6, 0.5  ;;  %v3993_v36 = vrot.slane %v3992_v38, 2  ;;  %v4000_v26 = vrot.slane %v3999_v4, 2 }
 0x741   :  { %3606 = vmatprep.subr.bf16.mxu0 %v4679_v18  ;;  %4465 = vmatprep.subr.bf16.mxu1 %v6107_v46 }
 0x743   :  { %v6005_v17 = vpop.permute.xlu1 %3259 }
 0x744   :  { %3607 = vmatpush1.bf16.msra.mxu0 %v4677_v45  ;;  %4466 = vmatpush3.bf16.msra.mxu1 %v4680_v57  ;;  %v3994_v57 = vmax.f32 %v3992_v38, %v3993_v36  ;;  %vm3288_vm2 = vcmp.gt.f32.partialorder %v6005_v17, 0.5 }
 0x745   :  { %3858 = vmatprep.subr.bf16.mxu0 %v4683_v51  ;;  %3901 = vmatprep.subr.bf16.mxu1 %v4686_v59  ;;  %v4001_v51 = vmax.f32 %v3999_v4, %v4000_v26 }
 0x747   :  { %v3218_v7 = vpop.permute.xlu1 %3217 }
 0x748   :  { %vm3282_vm12 = vcmp.gt.f32.partialorder %v3218_v7, 0.5 }
 0x7e2   :  { %v4437_v54 = vpop.f32.mrf.mxu1 }
 0x7e3   :  { %v3325_v39 = vsel %vm3277_vm6, %v4437_v54, -3.4028235e+38  ;;  %v3995_v54 = vrot.slane %v3994_v57, 1 }
 0x7e4   :  { %v3100_v46 = vpop.f32.mrf.mxu1 }
 0x7e5   :  { %v3323_v35 = vsel %vm3275_vm0, %v3100_v46, -3.4028235e+38  ;;  %v4002_v46 = vrot.slane %v4001_v51, 1  ;;  %v3996_v6 = vmax.f32 %v3994_v57, %v3995_v54 }
 0x7e6   :  { %v4438_v20 = vpop.f32.mrf.mxu1  ;;  %v3339_v13 = vmax.f32 %v3323_v35, %v3325_v39 }
 0x7e7   :  { %v3326_v50 = vsel %vm3278_vm9, %v4438_v20, -3.4028235e+38  ;;  %v4003_v14 = vmax.f32 %v4001_v51, %v4002_v46  ;;  %4005 = vbcast.lane.b32.xlu0 %v3996_v6, 256 }
 0x7e8   :  { %v3103_v42 = vpop.f32.mrf.mxu1 }
 0x7e9   :  { %v3324_v23 = vsel %vm3276_vm8, %v3103_v42, -3.4028235e+38  ;;  %4008 = vbcast.lane.b32.xlu1 %v4003_v14, 256 }
 0x7ea   :  { %v4441_v49 = vpop.f32.mrf.mxu1  ;;  %v3340_v32 = vmax.f32 %v3324_v23, %v3326_v50 }
 0x7eb   :  { %v3329_v59 = vsel %vm3281_vm11, %v4441_v49, -3.4028235e+38 }
 0x7ec   :  { %v3116_v9 = vpop.f32.mrf.mxu1 }
 0x7ed   :  { %v6011_v48 = vsel %vm3279_vm7, %v3116_v9, -3.4028235e+38 }
 0x7ee   :  { %v4442_v62 = vpop.f32.mrf.mxu1  ;;  %v3341_v16 = vmax.f32 %v3339_v13, %v6011_v48 }
 0x7ef   :  { %v3330_v34 = vsel %vm3282_vm12, %v4442_v62, -3.4028235e+38 }
 0x7f0   :  { %v3119_v25 = vpop.f32.mrf.mxu1  ;;  %v3343_v21 = vmax.f32 %v3341_v16, %v3329_v59  ;;  %v3267_v16 = vpop.permute.xlu0 %3266 }
 0x7f1   :  { %v3328_v18 = vsel %vm3280_vm10, %v3119_v25, -3.4028235e+38  ;;  %v3274_v25 = vpop.permute.xlu1 %3273  ;;  %vm3289_vm3 = vcmp.gt.f32.partialorder %v3267_v16, 0.5 }
 0x7f2   :  { %v3342_v10 = vmax.f32 %v3340_v32, %v3328_v18  ;;  %v4445_v45 = vpop.f32.mrf.mxu1  ;;  %vm3290_vm4 = vcmp.gt.f32.partialorder %v3274_v25, 0.5 }
 0x7f4   :  { %v3344_v44 = vmax.f32 %v3342_v10, %v3330_v34  ;;  %v3132_v58 = vpop.f32.mrf.mxu1 }
 0x7f5   :  { %v3331_v32 = vsel %vm3283_vm13, %v3132_v58, -3.4028235e+38 }
 0x7f6   :  { %v3345_v20 = vmax.f32 %v3343_v21, %v3344_v44  ;;  %v4446_v42 = vpop.f32.mrf.mxu1 }
 0x7f7   :  { %v3334_v47 = vsel %vm3286_vm1, %v4446_v42, -3.4028235e+38 }
 0x7f8   :  { %v3353_v24 = vsub.f32 %v3323_v35, %v3345_v20  ;;  %v3354_v9 = vsub.f32 %v3324_v23, %v3345_v20  ;;  %v3355_v7 = vsub.f32 %v3325_v39, %v3345_v20  ;;  %v3135_v19 = vpop.f32.mrf.mxu1  ;;  %v3356_v28 = vsub.f32 %v3326_v50, %v3345_v20 }
 0x7f9   :  { %v3357_v38 = vsub.f32 %v6011_v48, %v3345_v20  ;;  %v3358_v35 = vsub.f32 %v3328_v18, %v3345_v20  ;;  %v3333_v39 = vsel %vm3285_vm5, %v4445_v45, -3.4028235e+38  ;;  %v3332_v50 = vsel %vm3284_vm14, %v3135_v19, -3.4028235e+38 }
 0x7fa   :  { %v3369_v49 = vmul.f32 1.442695, %v3353_v24  ;;  %v3371_v13 = vmul.f32 1.442695, %v3354_v9  ;;  %v4449_v62 = vpop.f32.mrf.mxu1  ;;  %v3373_v4 = vmul.f32 1.442695, %v3355_v7  ;;  %v3346_v1 = vmax.f32 %v3331_v32, %v3333_v39 }
 0x7fb   :  { %v3375_v22 = vmul.f32 1.442695, %v3356_v28  ;;  %v3359_v36 = vsub.f32 %v3329_v59, %v3345_v20  ;;  %v3377_v26 = vmul.f32 1.442695, %v3357_v38  ;;  %v3347_v18 = vmax.f32 %v3332_v50, %v3334_v47 }
 0x7fc   :  { %4793 = vpow2.f32 %v3369_v49  ;;  %v3148_v23 = vpop.f32.mrf.mxu1  ;;  %v3360_v57 = vsub.f32 %v3330_v34, %v3345_v20  ;;  %v3379_v51 = vmul.f32 1.442695, %v3358_v35  ;;  %v3337_v58 = vsel %vm3289_vm3, %v4449_v62, -3.4028235e+38 }
 0x7fd   :  { %4795 = vpow2.f32 %v3371_v13  ;;  %v3335_v37 = vsel %vm3287_vm15, %v3148_v23, -3.4028235e+38  ;;  %v3381_v2 = vmul.f32 1.442695, %v3359_v36 }
 0x7fe   :  { %v4450_v48 = vpop.f32.mrf.mxu1  ;;  %4797 = vpow2.f32 %v3373_v4  ;;  %v3348_v10 = vmax.f32 %v3346_v1, %v3335_v37  ;;  %v3383_v59 = vmul.f32 1.442695, %v3360_v57 }
 0x7ff   :  { %4799 = vpow2.f32 %v3375_v22  ;;  %v3338_v17 = vsel %vm3290_vm4, %v4450_v48, -3.4028235e+38 }
 0x800   :  { %v3151_v45 = vpop.f32.mrf.mxu1  ;;  %4801 = vpow2.f32 %v3377_v26  ;;  %v3350_v54 = vmax.f32 %v3348_v10, %v3337_v58 }
 0x801   :  { %v3336_v21 = vsel %vm3288_vm2, %v3151_v45, -3.4028235e+38  ;;  %4803 = vpow2.f32 %v3379_v51 }
 0x802   :  { %v3349_v44 = vmax.f32 %v3347_v18, %v3336_v21  ;;  %4805 = vpow2.f32 %v3381_v2 }
 0x803   :  { %4807 = vpow2.f32 %v3383_v59 }
 0x804   :  { %v3351_v46 = vmax.f32 %v3349_v44, %v3338_v17 }
 0x806   :  { %v3352_v6 = vmax.f32 %v3350_v54, %v3351_v46 }
 0x808   :  { %v3361_v42 = vsub.f32 %v3331_v32, %v3352_v6  ;;  %v3362_v14 = vsub.f32 %v3332_v50, %v3352_v6  ;;  %v3363_v24 = vsub.f32 %v3333_v39, %v3352_v6  ;;  %v3364_v34 = vsub.f32 %v3334_v47, %v3352_v6 }
 0x809   :  { %v4794_v9 = vpop.eup %4793  ;;  %v3365_v49 = vsub.f32 %v3335_v37, %v3352_v6  ;;  %v3366_v4 = vsub.f32 %v3336_v21, %v3352_v6  ;;  %v3367_v32 = vsub.f32 %v3337_v58, %v3352_v6  ;;  %v3368_v16 = vsub.f32 %v3338_v17, %v3352_v6 }
 0x80a   :  { %v4796_v20 = vpop.eup %4795  ;;  %v3385_v7 = vmul.f32 1.442695, %v3361_v42  ;;  %v3387_v19 = vmul.f32 1.442695, %v3362_v14  ;;  %v3389_v13 = vmul.f32 1.442695, %v3363_v24 }
 0x80b   :  { %v3401_v28 = vadd.f32 %v4796_v20, %v4794_v9  ;;  %v4798_v62 = vpop.eup %4797  ;;  %v3391_v35 = vmul.f32 1.442695, %v3364_v34  ;;  %v3393_v39 = vmul.f32 1.442695, %v3365_v49  ;;  %v3395_v1 = vmul.f32 1.442695, %v3366_v4 }
 0x80c   :  { %4809 = vpow2.f32 %v3385_v7  ;;  %v4800_v23 = vpop.eup %4799  ;;  %v3397_v37 = vmul.f32 1.442695, %v3367_v32  ;;  %v3399_v47 = vmul.f32 1.442695, %v3368_v16 }
 0x80d   :  { %v3402_v38 = vadd.f32 %v4798_v62, %v3401_v28  ;;  %4811 = vpow2.f32 %v3387_v19  ;;  %v4802_v50 = vpop.eup %4801 }
 0x80e   :  { %4813 = vpow2.f32 %v3389_v13  ;;  %v4804_v48 = vpop.eup %4803 }
 0x80f   :  { %v3403_v22 = vadd.f32 %v4800_v23, %v3402_v38  ;;  %4815 = vpow2.f32 %v3391_v35  ;;  %v4806_v26 = vpop.eup %4805 }
 0x810   :  { %4817 = vpow2.f32 %v3393_v39  ;;  %v4808_v10 = vpop.eup %4807 }
 0x811   :  { %v3404_v25 = vadd.f32 %v4802_v50, %v3403_v22  ;;  %4819 = vpow2.f32 %v3395_v1  ;;  %v2824_v1 = vcombine.high %v5851_v53, %v5851_v53 }
 0x812   :  { %4821 = vpow2.f32 %v3397_v37 }
 0x813   :  { %v3405_v36 = vadd.f32 %v4804_v48, %v3404_v25  ;;  %4823 = vpow2.f32 %v3399_v47 }
 0x815   :  { %v3406_v18 = vadd.f32 %v4806_v26, %v3405_v36 }
 0x817   :  { %v3407_v45 = vadd.f32 %v4808_v10, %v3406_v18 }
 0x819   :  { %v4810_v57 = vpop.eup %4809  ;;  %4825 = vrcp.f32 %v3407_v45 }
 0x81a   :  { %v4812_v51 = vpop.eup %4811 }
 0x81b   :  { %v3408_v21 = vadd.f32 %v4812_v51, %v4810_v57  ;;  %v4814_v44 = vpop.eup %4813 }
 0x81c   :  { %v4816_v58 = vpop.eup %4815 }
 0x81d   :  { %v3409_v2 = vadd.f32 %v4814_v44, %v3408_v21  ;;  %v4818_v54 = vpop.eup %4817 }
 0x81e   :  { %v4820_v59 = vpop.eup %4819 }
 0x81f   :  { %v3410_v17 = vadd.f32 %v4816_v58, %v3409_v2  ;;  %v4822_v42 = vpop.eup %4821 }
 0x820   :  { %v4824_v14 = vpop.eup %4823 }
 0x821   :  { %v3411_v46 = vadd.f32 %v4818_v54, %v3410_v17  ;;  %v2873_v17 = vcombine.high %v5908_v27, %v5908_v27 }
 0x823   :  { %v3412_v6 = vadd.f32 %v4820_v59, %v3411_v46  ;;  %v2194_v46 = vld [vmem:[#allocation5 + $0xfc] sm:$0xf] }
 0x825   :  { %v3413_v24 = vadd.f32 %v4822_v42, %v3412_v6 }
 0x826   :  { %v4826_v34 = vpop.eup %4825 }
 0x827   :  { %v3414_v7 = vadd.f32 %v4824_v14, %v3413_v24  ;;  %v3417_v19 = vmul.f32 %v4826_v34, %v4794_v9  ;;  %v3418_v28 = vmul.f32 %v4826_v34, %v4796_v20  ;;  %v3419_v49 = vmul.f32 %v4826_v34, %v4798_v62 }
 0x828   :  { %v3420_v13 = vmul.f32 %v4826_v34, %v4800_v23  ;;  %v3421_v35 = vmul.f32 %v4826_v34, %v4802_v50  ;;  %v3422_v39 = vmul.f32 %v4826_v34, %v4804_v48  ;;  %v3423_v9 = vmul.f32 %v4826_v34, %v4806_v26  ;;  %v2186_v23 = vld [vmem:[#allocation5 + $0x7c] sm:$0xf] }
 0x829   :  { %4827 = vrcp.f32 %v3414_v7  ;;  %v3433_v38 = vmul.f32 %v3417_v19, %v5856_v33  ;;  %v3434_v4 = vmul.f32 %v3418_v28, %v5866_v30  ;;  %v3435_v22 = vmul.f32 %v3419_v49, %v5868_v12 }
 0x82a   :  { %v3436_v16 = vmul.f32 %v3420_v13, %v5872_v56  ;;  %v3437_v20 = vmul.f32 %v3421_v35, %v5870_v5  ;;  %v3438_v33 = vmul.f32 %v3422_v39, %v5874_v41  ;;  %v2921_v30 = vrot.slane %v2824_v1, %v5373_v63  ;;  %v4696_v39 = vld [vmem:[#allocation22 + $0xa8] ss:$16 sps:$4 sm:$0xff]   ;;  %v4699_v1 = vld [vmem:[#allocation22 + $0x80] ss:$16 sps:$4 sm:$0xff]  }
 0x82b   :  { %v3449_v32 = vadd.f32 %v3434_v4, %v3433_v38  ;;  %v2881_v50 = vunpack.c.l.bf16 %v2186_v23  ;;  %v3439_v12 = vmul.f32 %v3423_v9, %v5876_v15  ;;  %v3424_v37 = vmul.f32 %v4826_v34, %v4808_v10  ;;  %v4684_v4 = vld [vmem:[#allocation22 + $0xe8] ss:$16 sps:$4 sm:$0xff]   ;;  %v4705_v23 = vld [vmem:[#allocation22 + $0x60] ss:$16 sps:$4 sm:$0xff]  }
 0x82c   :  { %v4702_v9 = vld [vmem:[#allocation22 + $0x88] ss:$16 sps:$4 sm:$0xff]  }
 0x82d   :  { %v3450_v25 = vadd.f32 %v3449_v32, %v3435_v22  ;;  %v2977_v18 = vadd.f32 %v2921_v30, %v2881_v50  ;;  %v4689_v22 = vld [vmem:[#allocation22 + $0xc4] ss:$16 sps:$4 sm:$0xff]   ;;  %v4692_v32 = vld [vmem:[#allocation22 + $0xcc] ss:$16 sps:$4 sm:$0xff]   ;;  %v4711_v30 = vld [vmem:[#allocation22 + $0x40] ss:$16 sps:$4 sm:$0xff]  }
 0x82e   :  { %v4714_v50 = vld [vmem:[#allocation22 + $0x48] ss:$16 sps:$4 sm:$0xff]  }
 0x82f   :  { %v3451_v62 = vadd.f32 %v3450_v25, %v3436_v16  ;;  %v3440_v5 = vmul.f32 %v3424_v37, %v2977_v18  ;;  %v4701_v16 = vld [vmem:[#allocation22 + $0x84] ss:$16 sps:$4 sm:$0xff]   ;;  %v4704_v25 = vld [vmem:[#allocation22 + $0x8c] ss:$16 sps:$4 sm:$0xff]   ;;  %v4717_v37 = vld [vmem:[#allocation22 + $0x20] ss:$16 sps:$4 sm:$0xff]  }
 0x830   :  { %v4728_v18 = vld [vmem:[#allocation22 + $0xc] ss:$16 sps:$4 sm:$0xff]  }
 0x831   :  { %v3452_v36 = vadd.f32 %v3451_v62, %v3437_v20  ;;  %v4707_v20 = vld [vmem:[#allocation22 + $0x64] ss:$16 sps:$4 sm:$0xff]   ;;  %v4710_v62 = vld [vmem:[#allocation22 + $0x6c] ss:$16 sps:$4 sm:$0xff]  }
 0x833   :  { %v3453_v48 = vadd.f32 %v3452_v36, %v3438_v33  ;;  %v4713_v33 = vld [vmem:[#allocation22 + $0x44] ss:$16 sps:$4 sm:$0xff]   ;;  %v4716_v36 = vld [vmem:[#allocation22 + $0x4c] ss:$16 sps:$4 sm:$0xff]  }
 0x835   :  { %v3454_v56 = vadd.f32 %v3453_v48, %v3439_v12  ;;  %v4719_v12 = vld [vmem:[#allocation22 + $0x24] ss:$16 sps:$4 sm:$0xff]   ;;  %v4722_v48 = vld [vmem:[#allocation22 + $0x2c] ss:$16 sps:$4 sm:$0xff]  }
 0x836   :  { %v4828_v47 = vpop.eup %4827 }
 0x837   :  { %v3425_v45 = vmul.f32 %v4828_v47, %v4810_v57  ;;  %v3426_v53 = vmul.f32 %v4828_v47, %v4812_v51  ;;  %v3427_v26 = vmul.f32 %v4828_v47, %v4814_v44  ;;  %v3428_v21 = vmul.f32 %v4828_v47, %v4816_v58 }
 0x838   :  { %v3429_v6 = vmul.f32 %v4828_v47, %v4818_v54  ;;  %v3455_v10 = vadd.f32 %v3454_v56, %v3440_v5  ;;  %v3430_v34 = vmul.f32 %v4828_v47, %v4820_v59  ;;  %v2889_v44 = vunpack.c.l.bf16 %v2194_v46  ;;  %v4720_v56 = vld [vmem:[#allocation22 + $0x28] ss:$16 sps:$4 sm:$0xff]  }
 0x839   :  { %v3441_v2 = vmul.f32 %v3425_v45, %v5915_v40  ;;  %v3442_v41 = vmul.f32 %v3426_v53, %v5924_v8  ;;  %v3443_v15 = vmul.f32 %v3427_v26, %v5928_v43  ;;  %v3444_v57 = vmul.f32 %v3428_v21, %v5938_v29  ;;  %v4681_v29 = vld [vmem:[#allocation22 + $0xe0] ss:$16 sps:$4 sm:$0xff]   ;;  %v4726_v53 = vld [vmem:[#allocation22 + $0x8] ss:$16 sps:$4 sm:$0xff]  }
 0x83a   :  { %v2953_v58 = vrot.slane %v2873_v17, %v5373_v63  ;;  %v3431_v7 = vmul.f32 %v4828_v47, %v4822_v42  ;;  %v3445_v40 = vmul.f32 %v3429_v6, %v5932_v61  ;;  %v3432_v19 = vmul.f32 %v4828_v47, %v4824_v14  ;;  %v4687_v61 = vld [vmem:[#allocation22 + $0xc0] ss:$16 sps:$4 sm:$0xff]   ;;  %v4690_v42 = vld [vmem:[#allocation22 + $0xc8] ss:$16 sps:$4 sm:$0xff]   ;;  %v4698_v14 = vld [vmem:[#allocation22 + $0xac] ss:$16 sps:$4 sm:$0xff]  }
 0x83b   :  { %v3456_v24 = vadd.f32 %v3442_v41, %v3441_v2  ;;  %v3446_v27 = vmul.f32 %v3430_v34, %v5942_v60  ;;  %v4695_v60 = vld [vmem:[#allocation22 + $0xa4] ss:$16 sps:$4 sm:$0xff]   ;;  %v4723_v45 = vld [vmem:[#allocation22] ss:$16 sps:$4 sm:$0xff]   ;;  %v3676_v26 = vpack.c.bf16 %v5716_v52, %v5711_v31 }
 0x83c   :  { %v2985_v54 = vadd.f32 %v2953_v58, %v2889_v44  ;;  %v3447_v43 = vmul.f32 %v3431_v7, %v5946_v55  ;;  %v4693_v55 = vld [vmem:[#allocation22 + $0xa0] ss:$16 sps:$4 sm:$0xff]   ;;  %v4725_v47 = vld [vmem:[#allocation22 + $0x4] ss:$16 sps:$4 sm:$0xff]  }
 0x83d   :  { %v3457_v51 = vadd.f32 %v3456_v24, %v3443_v15  ;;  %v2294_v15 = vld [vmem:[%s6080_s18] sm:$0xf]  ;;  %s5180_s18 = smov [#allocation23]  }
 0x83e   :  { %v3448_v13 = vmul.f32 %v3432_v19, %v2985_v54  ;;  %v3685_v58 = vrot.slane %v2294_v15, %v5375_v0  ;;  %s4025_s20 = sshll.u32 %s5180_s18, 4  ;;  %s4026_s20 = int_to_ptr.vmem [resolvable:$true] %s4025_s20 }
 0x83f   :  { %v3458_v8 = vadd.f32 %v3457_v51, %v3444_v57  ;;  %s5119_s22 = scalar_lea.vmem %s4026_s20, 256  ;;  %p5124_p10 = scmp.lt.s32.totalorder %s4026_s20, %s4026_s20 }
 0x840   :  { %p5120_p9 = scmp.ne.s32.totalorder %s4026_s20, %s5119_s22  ;;  %p5125_p11 = scmp.lt.s32.totalorder %s5119_s22, %s5119_s22 }
 0x841   :  { %v3459_v28 = vadd.f32 %v3458_v8, %v3445_v40 }
 0x842   :  { %p5126_p12 = por %p5125_p11, %p5124_p10 }
 0x843   :  { %v3460_v49 = vadd.f32 %v3459_v28, %v3446_v27 }
 0x844   :  { %p5127_p13 = pnand %p5126_p12, %p5120_p9 }
 0x845   :  { %v3461_v59 = vadd.f32 %v3460_v49, %v3447_v43 }
 0x847   :  { %v3462_v38 = vadd.f32 %v3461_v59, %v3448_v13 }
 0x849   :  { %v3463_v35 = vpack.c.bf16 %v3462_v38, %v3455_v10  ;;  %v3681_v10 = vrot.slane %v2294_v15, %v5373_v63 }
 0x84b   :  { %3625 = vmatmul.mubr.bf16.vlgmr.msra.gmra.mxu0 %v3463_v35  ;;  %4468 = vmatmul.mubr.bf16.vlgmr.msra.gmra.mxu1 %v3463_v35 }
 0x84c   :  { %3859 = vmatpush1.bf16.msra.mxu0 %v4681_v29  ;;  %3902 = vmatpush1.bf16.msra.mxu1 %v4684_v4 }
 0x84d   :  { %3860 = vmatprep.subr.bf16.mxu0 %v4689_v22  ;;  %3903 = vmatprep.subr.bf16.mxu1 %v4692_v32  ;;  %v3689_v32 = vrot.slane %v2294_v15, %v5381_v3 }
 0x84e   :  { %3890 = vmatprep.mubr.bf16.mxu0 %v6108_v11  ;;  %3933 = vmatprep.mubr.bf16.mxu1 %v6108_v11  ;;  %v4708_v11 = vld [vmem:[#allocation22 + $0x68] ss:$16 sps:$4 sm:$0xff]  }
 0x850   :  { %3861 = vmatpush1.bf16.msra.mxu0 %v4687_v61  ;;  %3904 = vmatpush1.bf16.msra.mxu1 %v4690_v42  ;;  %v6115_v42 = vld [vmem:[#allocation32_spill] sm:$0xff] }
 0x851   :  { %3862 = vmatprep.subr.bf16.mxu0 %v4695_v60  ;;  %3905 = vmatprep.subr.bf16.mxu1 %v4698_v14  ;;  %v3693_v60 = vrot.slane %v2294_v15, %v6115_v42 }
 0x854   :  { %3863 = vmatpush1.bf16.msra.mxu0 %v4693_v55  ;;  %3906 = vmatpush1.bf16.msra.mxu1 %v4696_v39 }
 0x855   :  { %3864 = vmatprep.subr.bf16.mxu0 %v4701_v16  ;;  %3907 = vmatprep.subr.bf16.mxu1 %v4704_v25 }
 0x858   :  { %3865 = vmatpush1.bf16.msra.mxu0 %v4699_v1  ;;  %3908 = vmatpush1.bf16.msra.mxu1 %v4702_v9 }
 0x859   :  { %3866 = vmatprep.subr.bf16.mxu0 %v4707_v20  ;;  %3909 = vmatprep.subr.bf16.mxu1 %v4710_v62 }
 0x85c   :  { %3867 = vmatpush1.bf16.msra.mxu0 %v4705_v23  ;;  %3910 = vmatpush1.bf16.msra.mxu1 %v4708_v11 }
 0x85d   :  { %3868 = vmatprep.subr.bf16.mxu0 %v4713_v33  ;;  %3911 = vmatprep.subr.bf16.mxu1 %v4716_v36 }
 0x860   :  { %3869 = vmatpush1.bf16.msra.mxu0 %v4711_v30  ;;  %3912 = vmatpush1.bf16.msra.mxu1 %v4714_v50 }
 0x861   :  { %3870 = vmatprep.subr.bf16.mxu0 %v4719_v12  ;;  %3913 = vmatprep.subr.bf16.mxu1 %v4722_v48 }
 0x864   :  { %3871 = vmatpush1.bf16.msra.mxu0 %v4717_v37  ;;  %3914 = vmatpush1.bf16.msra.mxu1 %v4720_v56 }
 0x865   :  { %3872 = vmatprep.subr.bf16.mxu0 %v4725_v47  ;;  %3915 = vmatprep.subr.bf16.mxu1 %v4728_v18  ;;  %v4006_v18 = vpop.permute.xlu0 %4005 }
 0x866   :  { %vm4010_vm0 = vcmp.gt.f32.partialorder %v4006_v18, 0.5 }
 0x868   :  { %3873 = vmatpush1.bf16.msra.mxu0 %v4723_v45  ;;  %3916 = vmatpush1.bf16.msra.mxu1 %v4726_v53 }
 0x86b   :  { %3891 = vmatmul.mubr.bf16.vlgmr.msra.gmra.mxu0 %v3676_v26  ;;  %3934 = vmatmul.mubr.bf16.vlgmr.msra.gmra.mxu1 %v3676_v26 }
 0x90b   :  { %v3669_v21 = vpop.f32.mrf.mxu1  ;;  %v3626_v17 = vpop.f32.mrf.mxu0 }
 0x90d   :  { %v4469_v5 = vpop.f32.mrf.mxu1  ;;  %v3628_v46 = vpop.f32.mrf.mxu0 }
 0x90f   :  { %v3672_v2 = vpop.f32.mrf.mxu1  ;;  %v3630_v6 = vpop.f32.mrf.mxu0 }
 0x911   :  { %v4470_v41 = vpop.f32.mrf.mxu1  ;;  %v3632_v24 = vpop.f32.mrf.mxu0 }
 0x912   :  { %v4009_v41 = vpop.permute.xlu1 %4008 }
 0x913   :  { %vm4011_vm6 = vcmp.gt.f32.partialorder %v4009_v41, 0.5 }
 0x92b   :  { %v3892_v34 = vpop.f32.mrf.mxu0  ;;  %v3935_v35 = vpop.f32.mrf.mxu1 }
 0x92c   :  { %v3893_v57 = vadd.f32 %v3892_v34, %v3681_v10  ;;  %v3936_v39 = vadd.f32 %v3935_v35, %v3689_v32 }
 0x92d   :  { %v3894_v51 = vpop.f32.mrf.mxu0  ;;  %v3937_v22 = vpop.f32.mrf.mxu1 }
 0x92e   :  { %v3944_v44 = vadd.f32 %v3893_v57, %v3626_v17  ;;  %v3895_v19 = vadd.f32 %v3894_v51, %v3685_v58  ;;  %v3938_v1 = vadd.f32 %v3937_v22, %v3693_v60  ;;  %v3972_v23 = vadd.f32 %v3936_v39, %v3669_v21 }
 0x92f   :  { %v3896_v7 = vpop.f32.mrf.mxu0  ;;  %v3939_v14 = vpop.f32.mrf.mxu1 }
 0x930   :  { %v4237_v40 = vmul.f32 -1.442695, %v3944_v44  ;;  %v3897_v8 = vadd.f32 %v3896_v7, %v3681_v10  ;;  %v3958_v49 = vadd.f32 %v3895_v19, %v3628_v46  ;;  %v3940_v33 = vadd.f32 %v3939_v14, %v3689_v32 }
 0x931   :  { %v3898_v28 = vpop.f32.mrf.mxu0  ;;  %v3941_v62 = vpop.f32.mrf.mxu1 }
 0x932   :  { %4829 = vpow2.f32 %v4237_v40  ;;  %v3945_v27 = vadd.f32 %v3897_v8, %v3630_v6  ;;  %v3899_v43 = vadd.f32 %v3898_v28, %v3685_v58  ;;  %v4239_v63 = vmul.f32 -1.442695, %v3958_v49 }
 0x933   :  { %v3942_v50 = vadd.f32 %v3941_v62, %v3693_v60  ;;  %v3973_v12 = vadd.f32 %v3940_v33, %v3672_v2 }
 0x934   :  { %v4238_v54 = vmul.f32 -1.442695, %v3945_v27  ;;  %v3959_v13 = vadd.f32 %v3899_v43, %v3632_v24 }
 0x936   :  { %4831 = vpow2.f32 %v4238_v54  ;;  %v4240_v59 = vmul.f32 -1.442695, %v3959_v13 }
 0x937   :  { %4833 = vpow2.f32 %v4239_v63 }
 0x938   :  { %4835 = vpow2.f32 %v4240_v59 }
 0x93f   :  { %v4830_v38 = vpop.eup %4829 }
 0x940   :  { %v3952_v29 = vadd.f32 1.0, %v4830_v38 }
 0x942   :  { %4837 = vrcp.f32 %v3952_v29 }
 0x943   :  { %v4832_v0 = vpop.eup %4831 }
 0x944   :  { %v3953_v4 = vadd.f32 1.0, %v4832_v0  ;;  %v4834_v61 = vpop.eup %4833 }
 0x945   :  { %v4836_v55 = vpop.eup %4835  ;;  %v3966_v16 = vadd.f32 1.0, %v4834_v61 }
 0x946   :  { %4839 = vrcp.f32 %v3953_v4  ;;  %v3967_v20 = vadd.f32 1.0, %v4836_v55 }
 0x947   :  { %4841 = vrcp.f32 %v3966_v16 }
 0x948   :  { %4843 = vrcp.f32 %v3967_v20 }
 0x94f   :  { %v4838_v25 = vpop.eup %4837 }
 0x950   :  { %v4241_v9 = vadd.f32 -1.0, %v4838_v25 }
 0x952   :  { %v3976_v11 = vmul.f32 %v4241_v9, %v3938_v1 }
 0x953   :  { %v4840_v36 = vpop.eup %4839 }
 0x954   :  { %v3978_v30 = vadd.f32 %v3976_v11, %v3972_v23  ;;  %v4242_v3 = vadd.f32 -1.0, %v4840_v36  ;;  %v4842_v56 = vpop.eup %4841 }
 0x955   :  { %v4844_v47 = vpop.eup %4843  ;;  %v3982_v45 = vsub.f32 1.0, %v4842_v56  ;;  %v3986_v21 = vmul.f32 %v4842_v56, %v5711_v31 }
 0x956   :  { %4845 = vtanh.f32 %v3978_v30  ;;  %v3977_v48 = vmul.f32 %v4242_v3, %v3942_v50  ;;  %v3983_v17 = vsub.f32 1.0, %v4844_v47  ;;  %v3987_v2 = vmul.f32 %v4844_v47, %v5716_v52 }
 0x958   :  { %v3979_v37 = vadd.f32 %v3977_v48, %v3973_v12 }
 0x95a   :  { %4847 = vtanh.f32 %v3979_v37 }
 0x963   :  { %v4846_v53 = vpop.eup %4845 }
 0x964   :  { %v3984_v26 = vmul.f32 %v4846_v53, %v3982_v45 }
 0x966   :  { %v3988_v5 = vadd.f32 %v3986_v21, %v3984_v26 }
 0x967   :  { %v4848_v46 = vpop.eup %4847 }
 0x968   :  { %v4016_v6 = vsel %vm4010_vm0, %v3988_v5, %v5711_v31  ;;  %v3985_v15 = vmul.f32 %v4848_v46, %v3983_v17 }
 0x969   :  { %4018 = vst [vmem:[#allocation23] sm:$0xff] %v4016_v6 }
 0x96a   :  { %v3989_v10 = vadd.f32 %v3987_v2, %v3985_v15 }
 0x96c   :  { %v4017_v24 = vsel %vm4011_vm6, %v3989_v10, %v5716_v52 }
 0x96d   :  { %4019 = vst [vmem:[#allocation23 + $0x8] sm:$0xff] %v4017_v24 }
 0x96e   :  { %5130 = shalt.err (!%p5127_p13)
}
 0x96f   :  { %4031 = dma.vmem_to_hbm [thread:$0]  %s4026_s20, 256, %s6081_s19, [#allocation4], %s5160_s28, %s5160_s28, %s5161_s29  }
 0x970   :  { %5153 = dma.done.wait [#allocation4], 256  }
 0x971   :  { %5154 = vsyncadd [#allocation4], 4294967040 }
 0x972   :  { %4035 = vsyncpa [#allocation3], 1 }
 0x973   :  { %4036 = vsyncpa [#allocation6], 1 }
 0x974   :  { %4037 = vsyncpa [#allocation9], 1 }
 0x975   :  { %4038 = vsyncpa [#allocation12], 1 }
 0x976   :  { %4039 = vsyncpa [#allocation15], 1 }
 0x977   :  { %4040 = vsyncpa [#allocation18], 1 }
 0x978   :  { %4041 = vsyncpa [#allocation21], 1 }
 0x979   :  { %4042 = vsyncpa [#allocation4], 1 }

</bundles_post_ra>
